<compile_context>
chip_gen: v5e
topology: v5e:2x2
jax: 0.10.0
libtpu: 0.0.40
codegen_flags: <defaults>
</compile_context>

<pallas_src>
import functools

import jax
import jax.numpy as jnp
from jax.experimental import pallas as pl
from jax.experimental.pallas import tpu as pltpu


# ---------------------------------------------------------------------------
# Pallas kernel: G sentences x B rows of LSTMCell recurrence + vocab projection.
# ---------------------------------------------------------------------------
def _decoder_kernel(topics_ref,   # (B, G, 1, D)  bf16 topic vectors (length-sorted rows)
                    emb_ref,      # (B, G, T, E)  bf16 word embeddings
                    mask_ref,     # (B, G, T, 1)  f32  write mask
                    wih_ref,      # (D, 4H)       bf16 LSTMCell W_ih^T
                    whh_ref,      # (H, 4H)       bf16 LSTMCell W_hh^T
                    b_ref,        # (1, 4H)       f32  b_ih + b_hh
                    wlin_ref,     # (H, V)        bf16 output Linear W^T
                    blin_ref,     # (1, V)        f32  output Linear b
                    out_ref,      # (B, G, T, V)  f32  predictions
                    hbuf_ref):    # (B*G, T, H)   f32  scratch: hidden state per step
    B, G, T, E = emb_ref.shape
    D = wih_ref.shape[0]
    H = whh_ref.shape[0]
    V = wlin_ref.shape[1]
    R = B * G

    whh = whh_ref[...]
    bias = b_ref[...]                                       # (1, 4H) f32, hoisted

    def gate_act(gates, c_prev):                            # gates: (R, 4H) f32
        i_g = jax.nn.sigmoid(gates[:, 0 * H:1 * H])         # H is 128-aligned
        f_g = jax.nn.sigmoid(gates[:, 1 * H:2 * H])
        g_g = jnp.tanh(gates[:, 2 * H:3 * H])
        o_g = jax.nn.sigmoid(gates[:, 3 * H:4 * H])
        c_new = f_g * c_prev + i_g * g_g
        h_new = o_g * jnp.tanh(c_new)
        return h_new, c_new

    # --- one batched input-to-hidden matmul for all R*T tokens (bias hoisted) ---
    x_all = emb_ref[...].reshape(R * T, E)                  # rows ordered (b, g, t)
    gate_x = jnp.dot(x_all, wih_ref[...], preferred_element_type=jnp.float32)
    gate_x = (gate_x + bias).reshape(R, T, 4 * H)

    # --- initial state: h, c = LSTMCell(topic, (0, 0))  (h=0 => W_hh term is 0) ---
    topics = topics_ref[...].reshape(R, D)                  # (R, D) bf16
    gates0 = jnp.dot(topics, wih_ref[...],
                     preferred_element_type=jnp.float32) + bias
    h, c = gate_act(gates0, jnp.zeros((R, H), jnp.float32))

    # --- recurrence: only the dependent h @ W_hh matmul remains in the loop ---
    for t in range(T):                                      # static unroll (T small)
        gates = gate_x[:, t, :] + jnp.dot(
            h.astype(jnp.bfloat16), whh, preferred_element_type=jnp.float32)
        h, c = gate_act(gates, c)
        hbuf_ref[:, pl.ds(t, 1), :] = h[:, None, :]

    # --- one batched vocab projection, masked, stored in final (B,S,T,V) layout ---
    h_all = hbuf_ref[...].reshape(R * T, H).astype(jnp.bfloat16)
    logits = jnp.dot(h_all, wlin_ref[...], preferred_element_type=jnp.float32)
    logits = (logits + blin_ref[...]).reshape(B, G, T, V)
    out_ref[...] = logits * mask_ref[...]


# ---------------------------------------------------------------------------
# Wrapper: sorting / embedding-lookup glue in plain JAX, hot path in Pallas.
# ---------------------------------------------------------------------------
def word_lstm_decoder_forward(params, topic_vectors, num_sents, paragraphs,
                              sentence_lengths, *, sents_per_block=2):
    """topic_vectors: (B, S, D) f32 ; num_sents: (B,) i32
       paragraphs: (B, S, T) i32 ; sentence_lengths: (B, S) i32
       returns predictions: (B, S, T, V) f32 (the tensor PyTorch fills)."""
    B, S, D = topic_vectors.shape
    T = paragraphs.shape[-1]
    H = params["whh_t"].shape[0]
    V = params["wlin_t"].shape[1]
    E = params["embed_w"].shape[1]
    G = sents_per_block
    assert S % G == 0, "max_num_sents must be divisible by sents_per_block"
    assert D == E, "topic_vector_size must equal embed_size (LSTMCell input size)"
    assert H % 128 == 0 and V % 128 == 0, "H and V must be lane-aligned (x128)"

    # --- batch-level sort by num_sents (descending), as in the reference ---
    sort_ind = jnp.argsort(-num_sents)
    num_sents_s = num_sents[sort_ind]
    topic_vectors = topic_vectors[sort_ind]
    paragraphs = paragraphs[sort_ind]
    sentence_lengths = sentence_lengths[sort_ind]

    # --- per-sentence sort of the batch by caption length (descending) ---
    perm = jnp.argsort(-jnp.transpose(sentence_lengths, (1, 0)), axis=1)   # (S, B)
    b_of = jnp.transpose(perm, (1, 0))                                     # (B, S)
    s_of = jnp.arange(S)[None, :]
    topics_p = topic_vectors[b_of, s_of]                                   # (B, S, D)
    caps_p = paragraphs[b_of, s_of]                                        # (B, S, T)

    # embedding lookup (gather glue stays in plain JAX); bf16 feeds the MXU.
    # TODO(synk): at production sizes the gather could move in-kernel via
    # scalar-prefetched token ids + manual DMA to skip the HBM activation pass.
    emb_p = jnp.take(params["embed_w"], caps_p, axis=0)                    # (B,S,T,E) bf16
    topics_p = topics_p.astype(jnp.bfloat16)[:, :, None, :]                # (B,S,1,D)

    # --- write mask: predictions[:batch_size_j, i, j, :] = preds ---
    # batch_size_i / batch_size_j are BOTH derived from num_sents, exactly as
    # the PyTorch loops compute them.
    bidx = jnp.arange(B)
    bsz_i = jnp.sum(num_sents_s[None, :] > jnp.arange(S)[:, None], axis=1)   # (S,)
    bsz_j = jnp.sum(num_sents_s[None, :] > jnp.arange(T)[:, None], axis=1)   # (T,)
    valid = jnp.minimum(bsz_i[None, :, None], bsz_j[None, None, :])          # (1,S,T)
    mask = (bidx[:, None, None] < valid).astype(jnp.float32)[..., None]      # (B,S,T,1)

    four_h = 4 * H
    grid_spec = pltpu.PrefetchScalarGridSpec(
        num_scalar_prefetch=0,
        grid=(S // G,),
        in_specs=[
            pl.BlockSpec((B, G, 1, D), lambda i: (0, i, 0, 0)),
            pl.BlockSpec((B, G, T, E), lambda i: (0, i, 0, 0)),
            pl.BlockSpec((B, G, T, 1), lambda i: (0, i, 0, 0)),
            # TODO(synk): pipeline_mode=pl.Buffered(1) on these constant weight
            # specs would avoid double-buffering them once V is production-sized.
            pl.BlockSpec((D, four_h), lambda i: (0, 0)),
            pl.BlockSpec((H, four_h), lambda i: (0, 0)),
            pl.BlockSpec((1, four_h), lambda i: (0, 0)),
            pl.BlockSpec((H, V), lambda i: (0, 0)),
            pl.BlockSpec((1, V), lambda i: (0, 0)),
        ],
        out_specs=pl.BlockSpec((B, G, T, V), lambda i: (0, i, 0, 0)),
        scratch_shapes=[pltpu.VMEM((B * G, T, H), jnp.float32)],
    )

    # Output comes back directly in the reference (B, max_num_sents, T, V)
    # layout; no wrapper transpose / extra HBM round trip.
    return pl.pallas_call(
        _decoder_kernel,
        out_shape=jax.ShapeDtypeStruct((B, S, T, V), jnp.float32),
        grid_spec=grid_spec,
        compiler_params=pltpu.CompilerParams(
            dimension_semantics=("parallel",)),   # sentence groups shard over TCs (v7x)
    )(topics_p, emb_p, mask,
      params["wih_t"], params["whh_t"], params["bias"],
      params["wlin_t"], params["blin"])


# ---------------------------------------------------------------------------
# Pure-JAX reference (same math & same bf16 cast points) for correctness check.
# ---------------------------------------------------------------------------
def _reference_forward(params, topic_vectors, num_sents, paragraphs,
                       sentence_lengths):
    B, S, D = topic_vectors.shape
    T = paragraphs.shape[-1]
    H = params["whh_t"].shape[0]
    V = params["wlin_t"].shape[1]

    sort_ind = jnp.argsort(-num_sents)
    num_sents_s = num_sents[sort_ind]
    topic_vectors = topic_vectors[sort_ind]
    paragraphs = paragraphs[sort_ind]
    sentence_lengths = sentence_lengths[sort_ind]

    perm = jnp.argsort(-jnp.transpose(sentence_lengths, (1, 0)), axis=1)   # (S, B)
    b_of = jnp.transpose(perm, (1, 0))                                     # (B, S)
    s_of = jnp.arange(S)[None, :]
    topics_p = topic_vectors[b_of, s_of].astype(jnp.bfloat16)              # (B, S, D)
    caps_p = paragraphs[b_of, s_of]                                        # (B, S, T)
    emb_p = jnp.take(params["embed_w"], caps_p, axis=0)                    # (B,S,T,E) bf16

    bidx = jnp.arange(B)
    bsz_i = jnp.sum(num_sents_s[None, :] > jnp.arange(S)[:, None], axis=1)
    bsz_j = jnp.sum(num_sents_s[None, :] > jnp.arange(T)[:, None], axis=1)
    valid = jnp.minimum(bsz_i[None, :, None], bsz_j[None, None, :])        # (1, S, T)
    mask = (bidx[:, None, None] < valid).astype(jnp.float32)               # (B, S, T)

    wih, whh = params["wih_t"], params["whh_t"]
    bias, wlin, blin = params["bias"], params["wlin_t"], params["blin"]

    def lstm_step(gx, h, c):
        gates = gx + jnp.dot(h.astype(jnp.bfloat16), whh,
                             preferred_element_type=jnp.float32)
        i_g = jax.nn.sigmoid(gates[:, 0 * H:1 * H])
        f_g = jax.nn.sigmoid(gates[:, 1 * H:2 * H])
        g_g = jnp.tanh(gates[:, 2 * H:3 * H])
        o_g = jax.nn.sigmoid(gates[:, 3 * H:4 * H])
        c_new = f_g * c + i_g * g_g
        return o_g * jnp.tanh(c_new), c_new

    out = jnp.zeros((B, S, T, V), jnp.float32)
    for s in range(S):
        gx0 = jnp.dot(topics_p[:, s], wih,
                      preferred_element_type=jnp.float32) + bias
        h, c = lstm_step(gx0, jnp.zeros((B, H), jnp.float32),
                         jnp.zeros((B, H), jnp.float32))
        for t in range(T):
            gx = jnp.dot(emb_p[:, s, t], wih,
                         preferred_element_type=jnp.float32) + bias
            h, c = lstm_step(gx, h, c)
            preds = jnp.dot(h.astype(jnp.bfloat16), wlin,
                            preferred_element_type=jnp.float32) + blin
            out = out.at[:, s, t, :].set(preds * mask[:, s, t:t + 1])
    return out


# ---------------------------------------------------------------------------
# Deterministic parameter init + demo run.
# ---------------------------------------------------------------------------
def init_params(key, vocab_size, topic_dim, embed_size, hidden_size):
    ks = jax.random.split(key, 8)
    four_h = 4 * hidden_size
    # nn.LSTMCell(topic_dim, hidden) parameters (stored pre-transposed, bf16 for MXU)
    w_ih = jax.random.normal(ks[0], (four_h, topic_dim), jnp.float32) * 0.1
    w_hh = jax.random.normal(ks[1], (four_h, hidden_size), jnp.float32) * 0.1
    b_ih = jax.random.normal(ks[2], (four_h,), jnp.float32) * 0.1
    b_hh = jax.random.normal(ks[3], (four_h,), jnp.float32) * 0.1
    # nn.Linear(hidden, vocab)
    w_lin = jax.random.normal(ks[4], (vocab_size, hidden_size), jnp.float32) * 0.1
    b_lin = jax.random.normal(ks[5], (vocab_size,), jnp.float32) * 0.1
    # nn.Embedding(vocab, embed)
    embed_w = jax.random.normal(ks[6], (vocab_size, embed_size), jnp.float32) * 0.1
    # init_h / init_c exist in __init__ but are unused by forward(); kept for parity.
    _unused_init_h = jax.random.normal(ks[7], (hidden_size, topic_dim), jnp.float32) * 0.1
    return {
        "embed_w": embed_w.astype(jnp.bfloat16),              # (V, E)
        "wih_t": jnp.transpose(w_ih).astype(jnp.bfloat16),    # (D, 4H)
        "whh_t": jnp.transpose(w_hh).astype(jnp.bfloat16),    # (H, 4H)
        "bias": (b_ih + b_hh)[None, :],                       # (1, 4H) f32
        "wlin_t": jnp.transpose(w_lin).astype(jnp.bfloat16),  # (H, V)
        "blin": b_lin[None, :],                               # (1, V) f32
    }


if __name__ == "__main__":
    # small, lane-aligned shapes: batch=2, max_num_sents=4, max_seq_length=8,
    # topic_vector_size = embed_size = 128, hidden_size = 128, vocab = 256
    B, S, T = 2, 4, 8
    D = E = 128
    H = 128
    V = 256

    key = jax.random.PRNGKey(0)
    kp, k1, k2, k3, k4 = jax.random.split(key, 5)
    params = init_params(kp, V, D, E, H)

    topic_vectors = jax.random.normal(k1, (B, S, D), jnp.float32)
    num_sents = jax.random.randint(k2, (B,), 1, S + 1, jnp.int32)
    paragraphs = jax.random.randint(k3, (B, S, T), 0, V, jnp.int32)
    sentence_lengths = jax.random.randint(k4, (B, S), 2, T + 1, jnp.int32)

    fwd = jax.jit(functools.partial(word_lstm_decoder_forward, params,
                                    sents_per_block=2))
    preds = fwd(topic_vectors, num_sents, paragraphs, sentence_lengths)
    preds = jax.block_until_ready(preds)
    assert preds.shape == (B, S, T, V)

    ref = _reference_forward(params, topic_vectors, num_sents, paragraphs,
                             sentence_lengths)
    max_err = float(jnp.max(jnp.abs(preds - ref)))
    assert jnp.allclose(preds, ref, atol=2e-2, rtol=2e-2), (
        f"mismatch vs JAX reference (max abs err {max_err})")

    print("KERNEL_OK")
</pallas_src>

<mosaic_0001>
module attributes {stable_mosaic.version = 11 : i64} {
  func.func @_decoder_kernel(%arg0: i32, %arg1: memref<2x2x1x128xbf16, #tpu.memory_space<vmem>>, %arg2: memref<2x2x8x128xbf16, #tpu.memory_space<vmem>>, %arg3: memref<2x2x8x1xf32, #tpu.memory_space<vmem>>, %arg4: memref<128x512xbf16, #tpu.memory_space<vmem>>, %arg5: memref<128x512xbf16, #tpu.memory_space<vmem>>, %arg6: memref<1x512xf32, #tpu.memory_space<vmem>>, %arg7: memref<128x256xbf16, #tpu.memory_space<vmem>>, %arg8: memref<1x256xf32, #tpu.memory_space<vmem>>, %arg9: memref<2x2x8x256xf32, #tpu.memory_space<vmem>>, %arg10: memref<4x8x128xf32, #tpu.memory_space<vmem>>) attributes {dimension_semantics = [#tpu.dimension_semantics<parallel>], iteration_bounds = array<i64: 2>, scalar_prefetch = 0 : i64, scratch_operands = 1 : i64, tpu.core_type = #tpu.core_type<tc>, window_params = [{transform_indices = @transform_0, window_bounds = array<i64: 2, 2, 1, 128>}, {transform_indices = @transform_1, window_bounds = array<i64: 2, 2, 8, 128>}, {transform_indices = @transform_2, window_bounds = array<i64: 2, 2, 8, 1>}, {pipeline_mode = #tpu.pipeline_mode<synchronous>, transform_indices = @transform_3, window_bounds = array<i64: 128, 512>}, {pipeline_mode = #tpu.pipeline_mode<synchronous>, transform_indices = @transform_4, window_bounds = array<i64: 128, 512>}, {pipeline_mode = #tpu.pipeline_mode<synchronous>, transform_indices = @transform_5, window_bounds = array<i64: 1, 512>}, {pipeline_mode = #tpu.pipeline_mode<synchronous>, transform_indices = @transform_6, window_bounds = array<i64: 128, 256>}, {pipeline_mode = #tpu.pipeline_mode<synchronous>, transform_indices = @transform_7, window_bounds = array<i64: 1, 256>}, {transform_indices = @transform_8, window_bounds = array<i64: 2, 2, 8, 256>}]} {
    %c0 = arith.constant 0 : index
    %c0_0 = arith.constant 0 : index
    %0 = vector.load %arg5[%c0, %c0_0] : memref<128x512xbf16, #tpu.memory_space<vmem>>, vector<128x512xbf16>
    %c0_1 = arith.constant 0 : index
    %c0_2 = arith.constant 0 : index
    %1 = vector.load %arg6[%c0_1, %c0_2] : memref<1x512xf32, #tpu.memory_space<vmem>>, vector<1x512xf32>
    %c0_3 = arith.constant 0 : index
    %c0_4 = arith.constant 0 : index
    %c0_5 = arith.constant 0 : index
    %c0_6 = arith.constant 0 : index
    %2 = vector.load %arg2[%c0_3, %c0_4, %c0_5, %c0_6] : memref<2x2x8x128xbf16, #tpu.memory_space<vmem>>, vector<2x2x8x128xbf16>
    %3 = vector.shape_cast %2 : vector<2x2x8x128xbf16> to vector<32x128xbf16>
    %c0_7 = arith.constant 0 : index
    %c0_8 = arith.constant 0 : index
    %4 = vector.load %arg4[%c0_7, %c0_8] : memref<128x512xbf16, #tpu.memory_space<vmem>>, vector<128x512xbf16>
    %cst = arith.constant dense<0.000000e+00> : vector<32x512xf32>
    %5 = tpu.matmul %3, %4, %cst {dimension_numbers = #tpu.dot_dimension_numbers<[1], [0], [0], [1], [0, 0, 1, 1], [], []>} : vector<32x128xbf16>, vector<128x512xbf16>, vector<32x512xf32> -> vector<32x512xf32>
    %6 = vector.broadcast %1 : vector<1x512xf32> to vector<32x512xf32>
    %7 = arith.addf %5, %6 : vector<32x512xf32>
    %8 = vector.shape_cast %7 : vector<32x512xf32> to vector<4x8x512xf32>
    %c0_9 = arith.constant 0 : index
    %c0_10 = arith.constant 0 : index
    %c0_11 = arith.constant 0 : index
    %c0_12 = arith.constant 0 : index
    %9 = vector.load %arg1[%c0_9, %c0_10, %c0_11, %c0_12] : memref<2x2x1x128xbf16, #tpu.memory_space<vmem>>, vector<2x2x1x128xbf16>
    %10 = vector.shape_cast %9 : vector<2x2x1x128xbf16> to vector<4x128xbf16>
    %c0_13 = arith.constant 0 : index
    %c0_14 = arith.constant 0 : index
    %11 = vector.load %arg4[%c0_13, %c0_14] : memref<128x512xbf16, #tpu.memory_space<vmem>>, vector<128x512xbf16>
    %cst_15 = arith.constant dense<0.000000e+00> : vector<4x512xf32>
    %12 = tpu.matmul %10, %11, %cst_15 {dimension_numbers = #tpu.dot_dimension_numbers<[1], [0], [0], [1], [0, 0, 1, 1], [], []>} : vector<4x128xbf16>, vector<128x512xbf16>, vector<4x512xf32> -> vector<4x512xf32>
    %13 = vector.broadcast %1 : vector<1x512xf32> to vector<4x512xf32>
    %14 = arith.addf %12, %13 : vector<4x512xf32>
    %cst_16 = arith.constant 0.000000e+00 : f32
    %15 = vector.broadcast %cst_16 : f32 to vector<4x128xf32>
    %16 = vector.extract_strided_slice %14 {offsets = [0, 0], sizes = [4, 128], strides = [1, 1]} : vector<4x512xf32> to vector<4x128xf32>
    %17 = arith.negf %16 : vector<4x128xf32>
    %18 = math.exp %17 : vector<4x128xf32>
    %cst_17 = arith.constant 1.000000e+00 : f32
    %19 = vector.broadcast %cst_17 : f32 to vector<4x128xf32>
    %20 = arith.addf %19, %18 : vector<4x128xf32>
    %21 = arith.divf %19, %20 : vector<4x128xf32>
    %22 = vector.extract_strided_slice %14 {offsets = [0, 128], sizes = [4, 128], strides = [1, 1]} : vector<4x512xf32> to vector<4x128xf32>
    %23 = arith.negf %22 : vector<4x128xf32>
    %24 = math.exp %23 : vector<4x128xf32>
    %cst_18 = arith.constant 1.000000e+00 : f32
    %25 = vector.broadcast %cst_18 : f32 to vector<4x128xf32>
    %26 = arith.addf %25, %24 : vector<4x128xf32>
    %27 = arith.divf %25, %26 : vector<4x128xf32>
    %28 = vector.extract_strided_slice %14 {offsets = [0, 256], sizes = [4, 128], strides = [1, 1]} : vector<4x512xf32> to vector<4x128xf32>
    %29 = math.tanh %28 : vector<4x128xf32>
    %30 = vector.extract_strided_slice %14 {offsets = [0, 384], sizes = [4, 128], strides = [1, 1]} : vector<4x512xf32> to vector<4x128xf32>
    %31 = arith.negf %30 : vector<4x128xf32>
    %32 = math.exp %31 : vector<4x128xf32>
    %cst_19 = arith.constant 1.000000e+00 : f32
    %33 = vector.broadcast %cst_19 : f32 to vector<4x128xf32>
    %34 = arith.addf %33, %32 : vector<4x128xf32>
    %35 = arith.divf %33, %34 : vector<4x128xf32>
    %36 = arith.mulf %27, %15 : vector<4x128xf32>
    %37 = arith.mulf %21, %29 : vector<4x128xf32>
    %38 = arith.addf %36, %37 : vector<4x128xf32>
    %39 = math.tanh %38 : vector<4x128xf32>
    %40 = arith.mulf %35, %39 : vector<4x128xf32>
    %41 = vector.extract_strided_slice %8 {offsets = [0, 0, 0], sizes = [4, 1, 512], strides = [1, 1, 1]} : vector<4x8x512xf32> to vector<4x1x512xf32>
    %42 = vector.shape_cast %41 : vector<4x1x512xf32> to vector<4x512xf32>
    %43 = arith.truncf %40 : vector<4x128xf32> to vector<4x128xbf16>
    %cst_20 = arith.constant dense<0.000000e+00> : vector<4x512xf32>
    %44 = tpu.matmul %43, %0, %cst_20 {dimension_numbers = #tpu.dot_dimension_numbers<[1], [0], [0], [1], [0, 0, 1, 1], [], []>} : vector<4x128xbf16>, vector<128x512xbf16>, vector<4x512xf32> -> vector<4x512xf32>
    %45 = arith.addf %42, %44 : vector<4x512xf32>
    %46 = vector.extract_strided_slice %45 {offsets = [0, 0], sizes = [4, 128], strides = [1, 1]} : vector<4x512xf32> to vector<4x128xf32>
    %47 = arith.negf %46 : vector<4x128xf32>
    %48 = math.exp %47 : vector<4x128xf32>
    %cst_21 = arith.constant 1.000000e+00 : f32
    %49 = vector.broadcast %cst_21 : f32 to vector<4x128xf32>
    %50 = arith.addf %49, %48 : vector<4x128xf32>
    %51 = arith.divf %49, %50 : vector<4x128xf32>
    %52 = vector.extract_strided_slice %45 {offsets = [0, 128], sizes = [4, 128], strides = [1, 1]} : vector<4x512xf32> to vector<4x128xf32>
    %53 = arith.negf %52 : vector<4x128xf32>
    %54 = math.exp %53 : vector<4x128xf32>
    %cst_22 = arith.constant 1.000000e+00 : f32
    %55 = vector.broadcast %cst_22 : f32 to vector<4x128xf32>
    %56 = arith.addf %55, %54 : vector<4x128xf32>
    %57 = arith.divf %55, %56 : vector<4x128xf32>
    %58 = vector.extract_strided_slice %45 {offsets = [0, 256], sizes = [4, 128], strides = [1, 1]} : vector<4x512xf32> to vector<4x128xf32>
    %59 = math.tanh %58 : vector<4x128xf32>
    %60 = vector.extract_strided_slice %45 {offsets = [0, 384], sizes = [4, 128], strides = [1, 1]} : vector<4x512xf32> to vector<4x128xf32>
    %61 = arith.negf %60 : vector<4x128xf32>
    %62 = math.exp %61 : vector<4x128xf32>
    %cst_23 = arith.constant 1.000000e+00 : f32
    %63 = vector.broadcast %cst_23 : f32 to vector<4x128xf32>
    %64 = arith.addf %63, %62 : vector<4x128xf32>
    %65 = arith.divf %63, %64 : vector<4x128xf32>
    %66 = arith.mulf %57, %38 : vector<4x128xf32>
    %67 = arith.mulf %51, %59 : vector<4x128xf32>
    %68 = arith.addf %66, %67 : vector<4x128xf32>
    %69 = math.tanh %68 : vector<4x128xf32>
    %70 = arith.mulf %65, %69 : vector<4x128xf32>
    %71 = vector.shape_cast %70 : vector<4x128xf32> to vector<4x1x128xf32>
    %c0_24 = arith.constant 0 : index
    %c0_25 = arith.constant 0 : index
    %c0_26 = arith.constant 0 : index
    %72 = vector.load %arg10[%c0_24, %c0_25, %c0_26] : memref<4x8x128xf32, #tpu.memory_space<vmem>>, vector<4x1x128xf32>
    tpu.vector_store %arg10[%c0_24, %c0_25, %c0_26], %71 {strides = array<i32>} : memref<4x8x128xf32, #tpu.memory_space<vmem>>, vector<4x1x128xf32>,
    %73 = vector.extract_strided_slice %8 {offsets = [0, 1, 0], sizes = [4, 1, 512], strides = [1, 1, 1]} : vector<4x8x512xf32> to vector<4x1x512xf32>
    %74 = vector.shape_cast %73 : vector<4x1x512xf32> to vector<4x512xf32>
    %75 = arith.truncf %70 : vector<4x128xf32> to vector<4x128xbf16>
    %cst_27 = arith.constant dense<0.000000e+00> : vector<4x512xf32>
    %76 = tpu.matmul %75, %0, %cst_27 {dimension_numbers = #tpu.dot_dimension_numbers<[1], [0], [0], [1], [0, 0, 1, 1], [], []>} : vector<4x128xbf16>, vector<128x512xbf16>, vector<4x512xf32> -> vector<4x512xf32>
    %77 = arith.addf %74, %76 : vector<4x512xf32>
    %78 = vector.extract_strided_slice %77 {offsets = [0, 0], sizes = [4, 128], strides = [1, 1]} : vector<4x512xf32> to vector<4x128xf32>
    %79 = arith.negf %78 : vector<4x128xf32>
    %80 = math.exp %79 : vector<4x128xf32>
    %cst_28 = arith.constant 1.000000e+00 : f32
    %81 = vector.broadcast %cst_28 : f32 to vector<4x128xf32>
    %82 = arith.addf %81, %80 : vector<4x128xf32>
    %83 = arith.divf %81, %82 : vector<4x128xf32>
    %84 = vector.extract_strided_slice %77 {offsets = [0, 128], sizes = [4, 128], strides = [1, 1]} : vector<4x512xf32> to vector<4x128xf32>
    %85 = arith.negf %84 : vector<4x128xf32>
    %86 = math.exp %85 : vector<4x128xf32>
    %cst_29 = arith.constant 1.000000e+00 : f32
    %87 = vector.broadcast %cst_29 : f32 to vector<4x128xf32>
    %88 = arith.addf %87, %86 : vector<4x128xf32>
    %89 = arith.divf %87, %88 : vector<4x128xf32>
    %90 = vector.extract_strided_slice %77 {offsets = [0, 256], sizes = [4, 128], strides = [1, 1]} : vector<4x512xf32> to vector<4x128xf32>
    %91 = math.tanh %90 : vector<4x128xf32>
    %92 = vector.extract_strided_slice %77 {offsets = [0, 384], sizes = [4, 128], strides = [1, 1]} : vector<4x512xf32> to vector<4x128xf32>
    %93 = arith.negf %92 : vector<4x128xf32>
    %94 = math.exp %93 : vector<4x128xf32>
    %cst_30 = arith.constant 1.000000e+00 : f32
    %95 = vector.broadcast %cst_30 : f32 to vector<4x128xf32>
    %96 = arith.addf %95, %94 : vector<4x128xf32>
    %97 = arith.divf %95, %96 : vector<4x128xf32>
    %98 = arith.mulf %89, %68 : vector<4x128xf32>
    %99 = arith.mulf %83, %91 : vector<4x128xf32>
    %100 = arith.addf %98, %99 : vector<4x128xf32>
    %101 = math.tanh %100 : vector<4x128xf32>
    %102 = arith.mulf %97, %101 : vector<4x128xf32>
    %103 = vector.shape_cast %102 : vector<4x128xf32> to vector<4x1x128xf32>
    %c0_31 = arith.constant 0 : index
    %c1 = arith.constant 1 : index
    %c0_32 = arith.constant 0 : index
    %104 = vector.load %arg10[%c0_31, %c1, %c0_32] : memref<4x8x128xf32, #tpu.memory_space<vmem>>, vector<4x1x128xf32>
    tpu.vector_store %arg10[%c0_31, %c1, %c0_32], %103 {strides = array<i32>} : memref<4x8x128xf32, #tpu.memory_space<vmem>>, vector<4x1x128xf32>,
    %105 = vector.extract_strided_slice %8 {offsets = [0, 2, 0], sizes = [4, 1, 512], strides = [1, 1, 1]} : vector<4x8x512xf32> to vector<4x1x512xf32>
    %106 = vector.shape_cast %105 : vector<4x1x512xf32> to vector<4x512xf32>
    %107 = arith.truncf %102 : vector<4x128xf32> to vector<4x128xbf16>
    %cst_33 = arith.constant dense<0.000000e+00> : vector<4x512xf32>
    %108 = tpu.matmul %107, %0, %cst_33 {dimension_numbers = #tpu.dot_dimension_numbers<[1], [0], [0], [1], [0, 0, 1, 1], [], []>} : vector<4x128xbf16>, vector<128x512xbf16>, vector<4x512xf32> -> vector<4x512xf32>
    %109 = arith.addf %106, %108 : vector<4x512xf32>
    %110 = vector.extract_strided_slice %109 {offsets = [0, 0], sizes = [4, 128], strides = [1, 1]} : vector<4x512xf32> to vector<4x128xf32>
    %111 = arith.negf %110 : vector<4x128xf32>
    %112 = math.exp %111 : vector<4x128xf32>
    %cst_34 = arith.constant 1.000000e+00 : f32
    %113 = vector.broadcast %cst_34 : f32 to vector<4x128xf32>
    %114 = arith.addf %113, %112 : vector<4x128xf32>
    %115 = arith.divf %113, %114 : vector<4x128xf32>
    %116 = vector.extract_strided_slice %109 {offsets = [0, 128], sizes = [4, 128], strides = [1, 1]} : vector<4x512xf32> to vector<4x128xf32>
    %117 = arith.negf %116 : vector<4x128xf32>
    %118 = math.exp %117 : vector<4x128xf32>
    %cst_35 = arith.constant 1.000000e+00 : f32
    %119 = vector.broadcast %cst_35 : f32 to vector<4x128xf32>
    %120 = arith.addf %119, %118 : vector<4x128xf32>
    %121 = arith.divf %119, %120 : vector<4x128xf32>
    %122 = vector.extract_strided_slice %109 {offsets = [0, 256], sizes = [4, 128], strides = [1, 1]} : vector<4x512xf32> to vector<4x128xf32>
    %123 = math.tanh %122 : vector<4x128xf32>
    %124 = vector.extract_strided_slice %109 {offsets = [0, 384], sizes = [4, 128], strides = [1, 1]} : vector<4x512xf32> to vector<4x128xf32>
    %125 = arith.negf %124 : vector<4x128xf32>
    %126 = math.exp %125 : vector<4x128xf32>
    %cst_36 = arith.constant 1.000000e+00 : f32
    %127 = vector.broadcast %cst_36 : f32 to vector<4x128xf32>
    %128 = arith.addf %127, %126 : vector<4x128xf32>
    %129 = arith.divf %127, %128 : vector<4x128xf32>
    %130 = arith.mulf %121, %100 : vector<4x128xf32>
    %131 = arith.mulf %115, %123 : vector<4x128xf32>
    %132 = arith.addf %130, %131 : vector<4x128xf32>
    %133 = math.tanh %132 : vector<4x128xf32>
    %134 = arith.mulf %129, %133 : vector<4x128xf32>
    %135 = vector.shape_cast %134 : vector<4x128xf32> to vector<4x1x128xf32>
    %c0_37 = arith.constant 0 : index
    %c2 = arith.constant 2 : index
    %c0_38 = arith.constant 0 : index
    %136 = vector.load %arg10[%c0_37, %c2, %c0_38] : memref<4x8x128xf32, #tpu.memory_space<vmem>>, vector<4x1x128xf32>
    tpu.vector_store %arg10[%c0_37, %c2, %c0_38], %135 {strides = array<i32>} : memref<4x8x128xf32, #tpu.memory_space<vmem>>, vector<4x1x128xf32>,
    %137 = vector.extract_strided_slice %8 {offsets = [0, 3, 0], sizes = [4, 1, 512], strides = [1, 1, 1]} : vector<4x8x512xf32> to vector<4x1x512xf32>
    %138 = vector.shape_cast %137 : vector<4x1x512xf32> to vector<4x512xf32>
    %139 = arith.truncf %134 : vector<4x128xf32> to vector<4x128xbf16>
    %cst_39 = arith.constant dense<0.000000e+00> : vector<4x512xf32>
    %140 = tpu.matmul %139, %0, %cst_39 {dimension_numbers = #tpu.dot_dimension_numbers<[1], [0], [0], [1], [0, 0, 1, 1], [], []>} : vector<4x128xbf16>, vector<128x512xbf16>, vector<4x512xf32> -> vector<4x512xf32>
    %141 = arith.addf %138, %140 : vector<4x512xf32>
    %142 = vector.extract_strided_slice %141 {offsets = [0, 0], sizes = [4, 128], strides = [1, 1]} : vector<4x512xf32> to vector<4x128xf32>
    %143 = arith.negf %142 : vector<4x128xf32>
    %144 = math.exp %143 : vector<4x128xf32>
    %cst_40 = arith.constant 1.000000e+00 : f32
    %145 = vector.broadcast %cst_40 : f32 to vector<4x128xf32>
    %146 = arith.addf %145, %144 : vector<4x128xf32>
    %147 = arith.divf %145, %146 : vector<4x128xf32>
    %148 = vector.extract_strided_slice %141 {offsets = [0, 128], sizes = [4, 128], strides = [1, 1]} : vector<4x512xf32> to vector<4x128xf32>
    %149 = arith.negf %148 : vector<4x128xf32>
    %150 = math.exp %149 : vector<4x128xf32>
    %cst_41 = arith.constant 1.000000e+00 : f32
    %151 = vector.broadcast %cst_41 : f32 to vector<4x128xf32>
    %152 = arith.addf %151, %150 : vector<4x128xf32>
    %153 = arith.divf %151, %152 : vector<4x128xf32>
    %154 = vector.extract_strided_slice %141 {offsets = [0, 256], sizes = [4, 128], strides = [1, 1]} : vector<4x512xf32> to vector<4x128xf32>
    %155 = math.tanh %154 : vector<4x128xf32>
    %156 = vector.extract_strided_slice %141 {offsets = [0, 384], sizes = [4, 128], strides = [1, 1]} : vector<4x512xf32> to vector<4x128xf32>
    %157 = arith.negf %156 : vector<4x128xf32>
    %158 = math.exp %157 : vector<4x128xf32>
    %cst_42 = arith.constant 1.000000e+00 : f32
    %159 = vector.broadcast %cst_42 : f32 to vector<4x128xf32>
    %160 = arith.addf %159, %158 : vector<4x128xf32>
    %161 = arith.divf %159, %160 : vector<4x128xf32>
    %162 = arith.mulf %153, %132 : vector<4x128xf32>
    %163 = arith.mulf %147, %155 : vector<4x128xf32>
    %164 = arith.addf %162, %163 : vector<4x128xf32>
    %165 = math.tanh %164 : vector<4x128xf32>
    %166 = arith.mulf %161, %165 : vector<4x128xf32>
    %167 = vector.shape_cast %166 : vector<4x128xf32> to vector<4x1x128xf32>
    %c0_43 = arith.constant 0 : index
    %c3 = arith.constant 3 : index
    %c0_44 = arith.constant 0 : index
    %168 = vector.load %arg10[%c0_43, %c3, %c0_44] : memref<4x8x128xf32, #tpu.memory_space<vmem>>, vector<4x1x128xf32>
    tpu.vector_store %arg10[%c0_43, %c3, %c0_44], %167 {strides = array<i32>} : memref<4x8x128xf32, #tpu.memory_space<vmem>>, vector<4x1x128xf32>,
    %169 = vector.extract_strided_slice %8 {offsets = [0, 4, 0], sizes = [4, 1, 512], strides = [1, 1, 1]} : vector<4x8x512xf32> to vector<4x1x512xf32>
    %170 = vector.shape_cast %169 : vector<4x1x512xf32> to vector<4x512xf32>
    %171 = arith.truncf %166 : vector<4x128xf32> to vector<4x128xbf16>
    %cst_45 = arith.constant dense<0.000000e+00> : vector<4x512xf32>
    %172 = tpu.matmul %171, %0, %cst_45 {dimension_numbers = #tpu.dot_dimension_numbers<[1], [0], [0], [1], [0, 0, 1, 1], [], []>} : vector<4x128xbf16>, vector<128x512xbf16>, vector<4x512xf32> -> vector<4x512xf32>
    %173 = arith.addf %170, %172 : vector<4x512xf32>
    %174 = vector.extract_strided_slice %173 {offsets = [0, 0], sizes = [4, 128], strides = [1, 1]} : vector<4x512xf32> to vector<4x128xf32>
    %175 = arith.negf %174 : vector<4x128xf32>
    %176 = math.exp %175 : vector<4x128xf32>
    %cst_46 = arith.constant 1.000000e+00 : f32
    %177 = vector.broadcast %cst_46 : f32 to vector<4x128xf32>
    %178 = arith.addf %177, %176 : vector<4x128xf32>
    %179 = arith.divf %177, %178 : vector<4x128xf32>
    %180 = vector.extract_strided_slice %173 {offsets = [0, 128], sizes = [4, 128], strides = [1, 1]} : vector<4x512xf32> to vector<4x128xf32>
    %181 = arith.negf %180 : vector<4x128xf32>
    %182 = math.exp %181 : vector<4x128xf32>
    %cst_47 = arith.constant 1.000000e+00 : f32
    %183 = vector.broadcast %cst_47 : f32 to vector<4x128xf32>
    %184 = arith.addf %183, %182 : vector<4x128xf32>
    %185 = arith.divf %183, %184 : vector<4x128xf32>
    %186 = vector.extract_strided_slice %173 {offsets = [0, 256], sizes = [4, 128], strides = [1, 1]} : vector<4x512xf32> to vector<4x128xf32>
    %187 = math.tanh %186 : vector<4x128xf32>
    %188 = vector.extract_strided_slice %173 {offsets = [0, 384], sizes = [4, 128], strides = [1, 1]} : vector<4x512xf32> to vector<4x128xf32>
    %189 = arith.negf %188 : vector<4x128xf32>
    %190 = math.exp %189 : vector<4x128xf32>
    %cst_48 = arith.constant 1.000000e+00 : f32
    %191 = vector.broadcast %cst_48 : f32 to vector<4x128xf32>
    %192 = arith.addf %191, %190 : vector<4x128xf32>
    %193 = arith.divf %191, %192 : vector<4x128xf32>
    %194 = arith.mulf %185, %164 : vector<4x128xf32>
    %195 = arith.mulf %179, %187 : vector<4x128xf32>
    %196 = arith.addf %194, %195 : vector<4x128xf32>
    %197 = math.tanh %196 : vector<4x128xf32>
    %198 = arith.mulf %193, %197 : vector<4x128xf32>
    %199 = vector.shape_cast %198 : vector<4x128xf32> to vector<4x1x128xf32>
    %c0_49 = arith.constant 0 : index
    %c4 = arith.constant 4 : index
    %c0_50 = arith.constant 0 : index
    %200 = vector.load %arg10[%c0_49, %c4, %c0_50] : memref<4x8x128xf32, #tpu.memory_space<vmem>>, vector<4x1x128xf32>
    tpu.vector_store %arg10[%c0_49, %c4, %c0_50], %199 {strides = array<i32>} : memref<4x8x128xf32, #tpu.memory_space<vmem>>, vector<4x1x128xf32>,
    %201 = vector.extract_strided_slice %8 {offsets = [0, 5, 0], sizes = [4, 1, 512], strides = [1, 1, 1]} : vector<4x8x512xf32> to vector<4x1x512xf32>
    %202 = vector.shape_cast %201 : vector<4x1x512xf32> to vector<4x512xf32>
    %203 = arith.truncf %198 : vector<4x128xf32> to vector<4x128xbf16>
    %cst_51 = arith.constant dense<0.000000e+00> : vector<4x512xf32>
    %204 = tpu.matmul %203, %0, %cst_51 {dimension_numbers = #tpu.dot_dimension_numbers<[1], [0], [0], [1], [0, 0, 1, 1], [], []>} : vector<4x128xbf16>, vector<128x512xbf16>, vector<4x512xf32> -> vector<4x512xf32>
    %205 = arith.addf %202, %204 : vector<4x512xf32>
    %206 = vector.extract_strided_slice %205 {offsets = [0, 0], sizes = [4, 128], strides = [1, 1]} : vector<4x512xf32> to vector<4x128xf32>
    %207 = arith.negf %206 : vector<4x128xf32>
    %208 = math.exp %207 : vector<4x128xf32>
    %cst_52 = arith.constant 1.000000e+00 : f32
    %209 = vector.broadcast %cst_52 : f32 to vector<4x128xf32>
    %210 = arith.addf %209, %208 : vector<4x128xf32>
    %211 = arith.divf %209, %210 : vector<4x128xf32>
    %212 = vector.extract_strided_slice %205 {offsets = [0, 128], sizes = [4, 128], strides = [1, 1]} : vector<4x512xf32> to vector<4x128xf32>
    %213 = arith.negf %212 : vector<4x128xf32>
    %214 = math.exp %213 : vector<4x128xf32>
    %cst_53 = arith.constant 1.000000e+00 : f32
    %215 = vector.broadcast %cst_53 : f32 to vector<4x128xf32>
    %216 = arith.addf %215, %214 : vector<4x128xf32>
    %217 = arith.divf %215, %216 : vector<4x128xf32>
    %218 = vector.extract_strided_slice %205 {offsets = [0, 256], sizes = [4, 128], strides = [1, 1]} : vector<4x512xf32> to vector<4x128xf32>
    %219 = math.tanh %218 : vector<4x128xf32>
    %220 = vector.extract_strided_slice %205 {offsets = [0, 384], sizes = [4, 128], strides = [1, 1]} : vector<4x512xf32> to vector<4x128xf32>
    %221 = arith.negf %220 : vector<4x128xf32>
    %222 = math.exp %221 : vector<4x128xf32>
    %cst_54 = arith.constant 1.000000e+00 : f32
    %223 = vector.broadcast %cst_54 : f32 to vector<4x128xf32>
    %224 = arith.addf %223, %222 : vector<4x128xf32>
    %225 = arith.divf %223, %224 : vector<4x128xf32>
    %226 = arith.mulf %217, %196 : vector<4x128xf32>
    %227 = arith.mulf %211, %219 : vector<4x128xf32>
    %228 = arith.addf %226, %227 : vector<4x128xf32>
    %229 = math.tanh %228 : vector<4x128xf32>
    %230 = arith.mulf %225, %229 : vector<4x128xf32>
    %231 = vector.shape_cast %230 : vector<4x128xf32> to vector<4x1x128xf32>
    %c0_55 = arith.constant 0 : index
    %c5 = arith.constant 5 : index
    %c0_56 = arith.constant 0 : index
    %232 = vector.load %arg10[%c0_55, %c5, %c0_56] : memref<4x8x128xf32, #tpu.memory_space<vmem>>, vector<4x1x128xf32>
    tpu.vector_store %arg10[%c0_55, %c5, %c0_56], %231 {strides = array<i32>} : memref<4x8x128xf32, #tpu.memory_space<vmem>>, vector<4x1x128xf32>,
    %233 = vector.extract_strided_slice %8 {offsets = [0, 6, 0], sizes = [4, 1, 512], strides = [1, 1, 1]} : vector<4x8x512xf32> to vector<4x1x512xf32>
    %234 = vector.shape_cast %233 : vector<4x1x512xf32> to vector<4x512xf32>
    %235 = arith.truncf %230 : vector<4x128xf32> to vector<4x128xbf16>
    %cst_57 = arith.constant dense<0.000000e+00> : vector<4x512xf32>
    %236 = tpu.matmul %235, %0, %cst_57 {dimension_numbers = #tpu.dot_dimension_numbers<[1], [0], [0], [1], [0, 0, 1, 1], [], []>} : vector<4x128xbf16>, vector<128x512xbf16>, vector<4x512xf32> -> vector<4x512xf32>
    %237 = arith.addf %234, %236 : vector<4x512xf32>
    %238 = vector.extract_strided_slice %237 {offsets = [0, 0], sizes = [4, 128], strides = [1, 1]} : vector<4x512xf32> to vector<4x128xf32>
    %239 = arith.negf %238 : vector<4x128xf32>
    %240 = math.exp %239 : vector<4x128xf32>
    %cst_58 = arith.constant 1.000000e+00 : f32
    %241 = vector.broadcast %cst_58 : f32 to vector<4x128xf32>
    %242 = arith.addf %241, %240 : vector<4x128xf32>
    %243 = arith.divf %241, %242 : vector<4x128xf32>
    %244 = vector.extract_strided_slice %237 {offsets = [0, 128], sizes = [4, 128], strides = [1, 1]} : vector<4x512xf32> to vector<4x128xf32>
    %245 = arith.negf %244 : vector<4x128xf32>
    %246 = math.exp %245 : vector<4x128xf32>
    %cst_59 = arith.constant 1.000000e+00 : f32
    %247 = vector.broadcast %cst_59 : f32 to vector<4x128xf32>
    %248 = arith.addf %247, %246 : vector<4x128xf32>
    %249 = arith.divf %247, %248 : vector<4x128xf32>
    %250 = vector.extract_strided_slice %237 {offsets = [0, 256], sizes = [4, 128], strides = [1, 1]} : vector<4x512xf32> to vector<4x128xf32>
    %251 = math.tanh %250 : vector<4x128xf32>
    %252 = vector.extract_strided_slice %237 {offsets = [0, 384], sizes = [4, 128], strides = [1, 1]} : vector<4x512xf32> to vector<4x128xf32>
    %253 = arith.negf %252 : vector<4x128xf32>
    %254 = math.exp %253 : vector<4x128xf32>
    %cst_60 = arith.constant 1.000000e+00 : f32
    %255 = vector.broadcast %cst_60 : f32 to vector<4x128xf32>
    %256 = arith.addf %255, %254 : vector<4x128xf32>
    %257 = arith.divf %255, %256 : vector<4x128xf32>
    %258 = arith.mulf %249, %228 : vector<4x128xf32>
    %259 = arith.mulf %243, %251 : vector<4x128xf32>
    %260 = arith.addf %258, %259 : vector<4x128xf32>
    %261 = math.tanh %260 : vector<4x128xf32>
    %262 = arith.mulf %257, %261 : vector<4x128xf32>
    %263 = vector.shape_cast %262 : vector<4x128xf32> to vector<4x1x128xf32>
    %c0_61 = arith.constant 0 : index
    %c6 = arith.constant 6 : index
    %c0_62 = arith.constant 0 : index
    %264 = vector.load %arg10[%c0_61, %c6, %c0_62] : memref<4x8x128xf32, #tpu.memory_space<vmem>>, vector<4x1x128xf32>
    tpu.vector_store %arg10[%c0_61, %c6, %c0_62], %263 {strides = array<i32>} : memref<4x8x128xf32, #tpu.memory_space<vmem>>, vector<4x1x128xf32>,
    %265 = vector.extract_strided_slice %8 {offsets = [0, 7, 0], sizes = [4, 1, 512], strides = [1, 1, 1]} : vector<4x8x512xf32> to vector<4x1x512xf32>
    %266 = vector.shape_cast %265 : vector<4x1x512xf32> to vector<4x512xf32>
    %267 = arith.truncf %262 : vector<4x128xf32> to vector<4x128xbf16>
    %cst_63 = arith.constant dense<0.000000e+00> : vector<4x512xf32>
    %268 = tpu.matmul %267, %0, %cst_63 {dimension_numbers = #tpu.dot_dimension_numbers<[1], [0], [0], [1], [0, 0, 1, 1], [], []>} : vector<4x128xbf16>, vector<128x512xbf16>, vector<4x512xf32> -> vector<4x512xf32>
    %269 = arith.addf %266, %268 : vector<4x512xf32>
    %270 = vector.extract_strided_slice %269 {offsets = [0, 0], sizes = [4, 128], strides = [1, 1]} : vector<4x512xf32> to vector<4x128xf32>
    %271 = arith.negf %270 : vector<4x128xf32>
    %272 = math.exp %271 : vector<4x128xf32>
    %cst_64 = arith.constant 1.000000e+00 : f32
    %273 = vector.broadcast %cst_64 : f32 to vector<4x128xf32>
    %274 = arith.addf %273, %272 : vector<4x128xf32>
    %275 = arith.divf %273, %274 : vector<4x128xf32>
    %276 = vector.extract_strided_slice %269 {offsets = [0, 128], sizes = [4, 128], strides = [1, 1]} : vector<4x512xf32> to vector<4x128xf32>
    %277 = arith.negf %276 : vector<4x128xf32>
    %278 = math.exp %277 : vector<4x128xf32>
    %cst_65 = arith.constant 1.000000e+00 : f32
    %279 = vector.broadcast %cst_65 : f32 to vector<4x128xf32>
    %280 = arith.addf %279, %278 : vector<4x128xf32>
    %281 = arith.divf %279, %280 : vector<4x128xf32>
    %282 = vector.extract_strided_slice %269 {offsets = [0, 256], sizes = [4, 128], strides = [1, 1]} : vector<4x512xf32> to vector<4x128xf32>
    %283 = math.tanh %282 : vector<4x128xf32>
    %284 = vector.extract_strided_slice %269 {offsets = [0, 384], sizes = [4, 128], strides = [1, 1]} : vector<4x512xf32> to vector<4x128xf32>
    %285 = arith.negf %284 : vector<4x128xf32>
    %286 = math.exp %285 : vector<4x128xf32>
    %cst_66 = arith.constant 1.000000e+00 : f32
    %287 = vector.broadcast %cst_66 : f32 to vector<4x128xf32>
    %288 = arith.addf %287, %286 : vector<4x128xf32>
    %289 = arith.divf %287, %288 : vector<4x128xf32>
    %290 = arith.mulf %281, %260 : vector<4x128xf32>
    %291 = arith.mulf %275, %283 : vector<4x128xf32>
    %292 = arith.addf %290, %291 : vector<4x128xf32>
    %293 = math.tanh %292 : vector<4x128xf32>
    %294 = arith.mulf %289, %293 : vector<4x128xf32>
    %295 = vector.shape_cast %294 : vector<4x128xf32> to vector<4x1x128xf32>
    %c0_67 = arith.constant 0 : index
    %c7 = arith.constant 7 : index
    %c0_68 = arith.constant 0 : index
    %296 = vector.load %arg10[%c0_67, %c7, %c0_68] : memref<4x8x128xf32, #tpu.memory_space<vmem>>, vector<4x1x128xf32>
    tpu.vector_store %arg10[%c0_67, %c7, %c0_68], %295 {strides = array<i32>} : memref<4x8x128xf32, #tpu.memory_space<vmem>>, vector<4x1x128xf32>,
    %c0_69 = arith.constant 0 : index
    %c0_70 = arith.constant 0 : index
    %c0_71 = arith.constant 0 : index
    %297 = vector.load %arg10[%c0_69, %c0_70, %c0_71] : memref<4x8x128xf32, #tpu.memory_space<vmem>>, vector<4x8x128xf32>
    %298 = vector.shape_cast %297 : vector<4x8x128xf32> to vector<32x128xf32>
    %299 = arith.truncf %298 : vector<32x128xf32> to vector<32x128xbf16>
    %c0_72 = arith.constant 0 : index
    %c0_73 = arith.constant 0 : index
    %300 = vector.load %arg7[%c0_72, %c0_73] : memref<128x256xbf16, #tpu.memory_space<vmem>>, vector<128x256xbf16>
    %cst_74 = arith.constant dense<0.000000e+00> : vector<32x256xf32>
    %301 = tpu.matmul %299, %300, %cst_74 {dimension_numbers = #tpu.dot_dimension_numbers<[1], [0], [0], [1], [0, 0, 1, 1], [], []>} : vector<32x128xbf16>, vector<128x256xbf16>, vector<32x256xf32> -> vector<32x256xf32>
    %c0_75 = arith.constant 0 : index
    %c0_76 = arith.constant 0 : index
    %302 = vector.load %arg8[%c0_75, %c0_76] : memref<1x256xf32, #tpu.memory_space<vmem>>, vector<1x256xf32>
    %303 = vector.broadcast %302 : vector<1x256xf32> to vector<32x256xf32>
    %304 = arith.addf %301, %303 : vector<32x256xf32>
    %305 = vector.shape_cast %304 : vector<32x256xf32> to vector<2x2x8x256xf32>
    %c0_77 = arith.constant 0 : index
    %c0_78 = arith.constant 0 : index
    %c0_79 = arith.constant 0 : index
    %c0_80 = arith.constant 0 : index
    %306 = vector.load %arg3[%c0_77, %c0_78, %c0_79, %c0_80] : memref<2x2x8x1xf32, #tpu.memory_space<vmem>>, vector<2x2x8x1xf32>
    %307 = vector.broadcast %306 : vector<2x2x8x1xf32> to vector<2x2x8x256xf32>
    %308 = arith.mulf %305, %307 : vector<2x2x8x256xf32>
    %c0_81 = arith.constant 0 : index
    %c0_82 = arith.constant 0 : index
    %c0_83 = arith.constant 0 : index
    %c0_84 = arith.constant 0 : index
    %309 = vector.load %arg9[%c0_81, %c0_82, %c0_83, %c0_84] : memref<2x2x8x256xf32, #tpu.memory_space<vmem>>, vector<2x2x8x256xf32>
    tpu.vector_store %arg9[%c0_81, %c0_82, %c0_83, %c0_84], %308 {strides = array<i32>} : memref<2x2x8x256xf32, #tpu.memory_space<vmem>>, vector<2x2x8x256xf32>,
    return
  }
  func.func @transform_0(%arg0: i32) -> (i32, i32, i32, i32) {
    %c0_i32 = arith.constant 0 : i32
    %c0_i32_0 = arith.constant 0 : i32
    %c0_i32_1 = arith.constant 0 : i32
    %c0_i32_2 = arith.constant 0 : i32
    return %c0_i32, %arg0, %c0_i32_0, %c0_i32_1 : i32, i32, i32, i32
  }
  func.func @transform_1(%arg0: i32) -> (i32, i32, i32, i32) {
    %c0_i32 = arith.constant 0 : i32
    %c0_i32_0 = arith.constant 0 : i32
    %c0_i32_1 = arith.constant 0 : i32
    %c0_i32_2 = arith.constant 0 : i32
    return %c0_i32, %arg0, %c0_i32_0, %c0_i32_1 : i32, i32, i32, i32
  }
  func.func @transform_2(%arg0: i32) -> (i32, i32, i32, i32) {
    %c0_i32 = arith.constant 0 : i32
    %c0_i32_0 = arith.constant 0 : i32
    %c0_i32_1 = arith.constant 0 : i32
    %c0_i32_2 = arith.constant 0 : i32
    return %c0_i32, %arg0, %c0_i32_0, %c0_i32_1 : i32, i32, i32, i32
  }
  func.func @transform_3(%arg0: i32) -> (i32, i32) {
    %c0_i32 = arith.constant 0 : i32
    %c0_i32_0 = arith.constant 0 : i32
    %c0_i32_1 = arith.constant 0 : i32
    return %c0_i32, %c0_i32_0 : i32, i32
  }
  func.func @transform_4(%arg0: i32) -> (i32, i32) {
    %c0_i32 = arith.constant 0 : i32
    %c0_i32_0 = arith.constant 0 : i32
    %c0_i32_1 = arith.constant 0 : i32
    return %c0_i32, %c0_i32_0 : i32, i32
  }
  func.func @transform_5(%arg0: i32) -> (i32, i32) {
    %c0_i32 = arith.constant 0 : i32
    %c0_i32_0 = arith.constant 0 : i32
    %c0_i32_1 = arith.constant 0 : i32
    return %c0_i32, %c0_i32_0 : i32, i32
  }
  func.func @transform_6(%arg0: i32) -> (i32, i32) {
    %c0_i32 = arith.constant 0 : i32
    %c0_i32_0 = arith.constant 0 : i32
    %c0_i32_1 = arith.constant 0 : i32
    return %c0_i32, %c0_i32_0 : i32, i32
  }
  func.func @transform_7(%arg0: i32) -> (i32, i32) {
    %c0_i32 = arith.constant 0 : i32
    %c0_i32_0 = arith.constant 0 : i32
    %c0_i32_1 = arith.constant 0 : i32
    return %c0_i32, %c0_i32_0 : i32, i32
  }
  func.func @transform_8(%arg0: i32) -> (i32, i32, i32, i32) {
    %c0_i32 = arith.constant 0 : i32
    %c0_i32_0 = arith.constant 0 : i32
    %c0_i32_1 = arith.constant 0 : i32
    %c0_i32_2 = arith.constant 0 : i32
    return %c0_i32, %arg0, %c0_i32_0, %c0_i32_1 : i32, i32, i32, i32
  }
}

</mosaic_0001>

<bundles_post_ra>
// kernel: neg.2
= control target key start
LH: loop header
LB: loop body
LE: loop exit
PB: predicated region body
PF: predicated region fallthrough
CT: control target
= control target key end

     0   :  { %s24_s0 = inlined_call_operand.vmem [shape: s32[2], index: 0, kind: input, shape index: {}]   ;;  %s25_s1 = inlined_call_operand.vmem [shape: s32[2], index: 1, kind: output, shape index: {}]  }
   0x1   :  { %v2_v0 = vld [vmem:[%s24_s0] sm:$0x1] }
   0x2   :  { %v5_v1 = vsub.s32 0, %v2_v0 }
   0x4   :  { %7 = vst [vmem:[%s25_s1] sm:$0x1] %v5_v1 }

// kernel: word_lstm_decoder_forward.1
= control target key start
LH: loop header
LB: loop body
LE: loop exit
PB: predicated region body
PF: predicated region fallthrough
CT: control target
= control target key end

     0   :  { %13 = vsyncpa [#allocation7], 0  ;;  %s9597_s0 = inlined_call_operand.vmem [shape: bf16[2,4,1,128], index: 0, kind: input, shape index: {}]   ;;  %s9598_s1 = inlined_call_operand.vmem [shape: bf16[2,4,8,128], index: 1, kind: input, shape index: {}]   ;;  %s9599_s2 = inlined_call_operand.vmem [shape: f32[2,4,8,1], index: 2, kind: input, shape index: {}]   ;;  %s9600_s3 = inlined_call_operand.vmem [shape: bf16[128,512], index: 3, kind: input, shape index: {}]   ;;  %s9601_s4 = inlined_call_operand.vmem [shape: bf16[128,512], index: 4, kind: input, shape index: {}]   ;;  %s9602_s5 = inlined_call_operand.vmem [shape: f32[1,512], index: 5, kind: input, shape index: {}]   ;;  %s9603_s6 = inlined_call_operand.vmem [shape: bf16[128,256], index: 6, kind: input, shape index: {}]   ;;  %s9604_s7 = inlined_call_operand.vmem [shape: f32[1,256], index: 7, kind: input, shape index: {}]   ;;  %s9605_s8 = inlined_call_operand.hbm [shape: f32[2,4,8,256], index: 8, kind: output, shape index: {}]  }
   0x1   :  { %15 = vsyncpa [#allocation7 + $0x1], 0  ;;  %s5764_s27 = smov 0   ;;  %s5766_s28 = smov 0  }
   0x2   :  { %s5768_s29 = smov 0   ;;  %s5770_s30 = smov 0  }
   0x3 LB: > { %s4556_s9 = sadd.s32 4294967295, %s5709_s30   ;;  %s4557_s10 = sadd.s32 4294967294, %s5709_s30   ;;  %s5709_s30 = sphi %s5770_s30, %s10159_s30   ;;  %s5705_s29 = sphi %s5768_s29, %s10158_s29   ;;  %s5701_s28 = sphi %s5766_s28, %s10157_s28   ;;  %s5697_s27 = sphi %s5764_s27, %s10156_s27  }
   0x4   : > { %s5787_s11 = sadd.s32 1, %s5709_s30   ;;  %s28_s12 = sadd.s32 1, %s5705_s29 }
   0x5   : > { %s25_s13 = ssub.s32 %s5709_s30, %s5787_s11  ;;  %p35_p0 = scmp.ne.s32.totalorder %s5705_s29, %s5701_s28 }
   0x6   : > { %p26_p1 = scmp.eq.s32.totalorder %s25_s13, 0  ;;  %p36_p2 = scmp.eq.s32.totalorder %s5709_s30, 0 }
   0x7   : > { %p222_p3 = scmp.eq.s32.totalorder %s4556_s9, 1  ;;  %p227_p4 = scmp.ne.s32.totalorder %s5701_s28, %s5697_s27 }
   0x8   : > { %s5800_s14 = scalar_select %p26_p1, %s5705_s29, %s28_s12  }
   0x9   : > { %p5802_p5 = por %p36_p2, %p35_p0  ;;  %p5806_p6 = por %p222_p3, %p35_p0 }
   0xa   : > { %p228_p7 = scmp.eq.s32.totalorder %s4557_s10, 1  ;;  %p4559_p9 = scmp.ge.s32.totalorder %s5709_s30, 2 }
   0xc   : > { %p5810_p8 = por %p228_p7, %p227_p4  ;;  %259 = sbr.rel (%p4559_p9) target bundleno = 37 (0x25), region = 36 }
  0x11   : > { %262 = sbr.rel (!%p5802_p5) target bundleno = 23 (0x17), region = 40  ;;  %s264_s18 = sand.u32 (%p5802_p5), 1, %s5705_s29  }
  0x12   : > { %s4561_s19 = sshll.u32 (%p5802_p5), %s5709_s30, 1  ;;  %s4560_s20 = sshll.u32 (%p5802_p5), %s264_s18, 2 }
  0x13   : > { %s268_s23 = scalar_lea.vmem (%p5802_p5), %s9597_s0, %s4561_s19  ;;  %s266_s24 = scalar_lea.vmem (%p5802_p5), [#allocation3], %s4560_s20 }
  0x14   : > { %v285_v0 = vld [vmem:[%s268_s23] sm:$0x3] (%p5802_p5)  ;;  %v287_v1 = vld [vmem:[%s268_s23 + $0x4] sm:$0x3] (%p5802_p5) }
  0x15   : > { %286 = vst [vmem:[%s266_s24] sm:$0x3] (%p5802_p5), %v285_v0 }
  0x16   : > { %288 = vst [vmem:[%s266_s24 + $0x2] sm:$0x3] %v287_v1 }
  0x17 PF: > { %308 = sbr.rel (!%p5802_p5) target bundleno = 29 (0x1d), region = 74  ;;  %s310_s25 = sand.u32 (%p5802_p5), 1, %s5705_s29  }
  0x18   : > { %s5006_s26 = sshll.u32 (%p5802_p5), %s5709_s30, 3  ;;  %s4562_s10 = sshll.u32 (%p5802_p5), %s310_s25, 4 }
  0x19   : > { %s315_s18 = scalar_lea.vmem (%p5802_p5), %s9598_s1, %s5006_s26  ;;  %s312_s19 = scalar_lea.vmem (%p5802_p5), [#allocation4], %s4562_s10 }
  0x1a   : > { %v332_v2 = vld [vmem:[%s315_s18] sm:$0xff] (%p5802_p5)   ;;  %v336_v3 = vld [vmem:[%s315_s18 + $0x10] sm:$0xff] (%p5802_p5)  }
  0x1b   : > { %333 = vst [vmem:[%s312_s19] sm:$0xff] (%p5802_p5), %v332_v2  }
  0x1c   : > { %337 = vst [vmem:[%s312_s19 + $0x8] sm:$0xff] %v336_v3  }
  0x1d PF: > { %371 = sbr.rel (!%p5802_p5) target bundleno = 37 (0x25), region = 115  ;;  %s373_s20 = sand.u32 (%p5802_p5), 1, %s5705_s29  }
  0x1e   : > { %s5007_s21 = sshll.u32 (%p5802_p5), %s5709_s30, 4  ;;  %s4565_s22 = sshll.u32 (%p5802_p5), %s373_s20, 5 }
  0x1f   : > { %s378_s25 = scalar_lea.vmem (%p5802_p5), %s9599_s2, %s5007_s21  ;;  %s375_s26 = scalar_lea.vmem (%p5802_p5), [#allocation5], %s4565_s22 }
  0x20   : > { %v413_v4 = vld [vmem:[%s378_s25] sm:$0xff] (%p5802_p5)  ;;  %v415_v5 = vld [vmem:[%s378_s25 + $0x8] sm:$0xff] (%p5802_p5) }
  0x21   : > { %v417_v6 = vld [vmem:[%s378_s25 + $0x20] sm:$0xff] (%p5802_p5)  ;;  %414 = vst [vmem:[%s375_s26] sm:$0xff] (%p5802_p5), %v413_v4  ;;  %v419_v7 = vld [vmem:[%s378_s25 + $0x28] sm:$0xff] (%p5802_p5) }
  0x22   : > { %416 = vst [vmem:[%s375_s26 + $0x8] sm:$0xff] %v415_v5 }
  0x23   : > { %418 = vst [vmem:[%s375_s26 + $0x10] sm:$0xff] %v417_v6 }
  0x24   : > { %420 = vst [vmem:[%s375_s26 + $0x18] sm:$0xff] %v419_v7 }
  0x25 PF: > { %p4568_p10 = scmp.ge.s32.totalorder %s5709_s30, 1  ;;  %p425_p11 = scmp.lt.s32.totalorder %s5709_s30, 3 }
  0x27   : > { %p426_p12 = pnand %p4568_p10, %p425_p11 }
  0x29   : > { %429 = sbr.rel (%p426_p12) target bundleno = 2127 (0x84f), region = 153 }
  0x2e   : > { %v4695_v8 = vld [vmem:[%s9600_s3 + $0xe0] sm:$0xf]  ;;  %v5072_v9 = vld [vmem:[%s9600_s3 + $0xec] sm:$0xf0]  ;;  %v5070_v10 = vld [vmem:[%s9600_s3 + $0xe4] sm:$0xf] }
  0x2f   : > { %v4696_v11 = vor.u32 %v5072_v9, %v4695_v8  ;;  %v4697_v12 = vld [vmem:[%s9600_s3 + $0xf0] sm:$0xf0]  ;;  %v4679_v13 = vld [vmem:[%s9600_s3 + $0xc0] sm:$0xf]  ;;  %v5068_v14 = vld [vmem:[%s9600_s3 + $0xcc] sm:$0xf0] }
  0x30   : > { %v4700_v15 = vor.u32 %v5070_v10, %v4697_v12  ;;  %v5066_v16 = vld [vmem:[%s9600_s3 + $0xc4] sm:$0xf]  ;;  %v4681_v17 = vld [vmem:[%s9600_s3 + $0xd0] sm:$0xf0]  ;;  %v4680_v18 = vor.u32 %v5068_v14, %v4679_v13  ;;  %v4663_v20 = vld [vmem:[%s9600_s3 + $0xa0] sm:$0xf] }
  0x31   : > { %741 = vmatpush.bf16.msra.mxu2 %v4696_v11  ;;  %852 = vmatpush.bf16.msra.mxu0 %v4696_v11  ;;  %v4684_v19 = vor.u32 %v5066_v16, %v4681_v17  ;;  %v5064_v21 = vld [vmem:[%s9600_s3 + $0xac] sm:$0xf0]  ;;  %v5062_v22 = vld [vmem:[%s9600_s3 + $0xa4] sm:$0xf]  ;;  %v4665_v23 = vld [vmem:[%s9600_s3 + $0xb0] sm:$0xf0] }
  0x32   : > { %760 = vmatpush.bf16.msra.mxu3 %v4700_v15  ;;  %865 = vmatpush.bf16.msra.mxu1 %v4700_v15  ;;  %v4664_v24 = vor.u32 %v5064_v21, %v4663_v20  ;;  %v4668_v25 = vor.u32 %v5062_v22, %v4665_v23  ;;  %v4647_v26 = vld [vmem:[%s9600_s3 + $0x80] sm:$0xf]  ;;  %v5060_v27 = vld [vmem:[%s9600_s3 + $0x8c] sm:$0xf0]  ;;  %v5058_v28 = vld [vmem:[%s9600_s3 + $0x84] sm:$0xf] }
  0x33   : > { %v4649_v29 = vld [vmem:[%s9600_s3 + $0x90] sm:$0xf0]  ;;  %v4648_v30 = vor.u32 %v5060_v27, %v4647_v26  ;;  %v4631_v32 = vld [vmem:[%s9600_s3 + $0x60] sm:$0xf]  ;;  %v5056_v33 = vld [vmem:[%s9600_s3 + $0x6c] sm:$0xf0] }
  0x34   : > { %v4652_v31 = vor.u32 %v5058_v28, %v4649_v29  ;;  %s5895_s24 = sand.u32 1, %s5701_s28   ;;  %v5054_v34 = vld [vmem:[%s9600_s3 + $0x64] sm:$0xf]  ;;  %v4633_v35 = vld [vmem:[%s9600_s3 + $0x70] sm:$0xf0]  ;;  %v4632_v36 = vor.u32 %v5056_v33, %v4631_v32  ;;  %vm842_vm0 = vcmask 1041409  }
  0x35   : > { %742 = vmatpush.bf16.msra.mxu2 %v4680_v18  ;;  %853 = vmatpush.bf16.msra.mxu0 %v4680_v18  ;;  %s4569_s12 = sshll.u32 %s5895_s24, 2  ;;  %v4636_v37 = vor.u32 %v5054_v34, %v4633_v35  ;;  %v4615_v38 = vld [vmem:[%s9600_s3 + $0x40] sm:$0xf]  ;;  %v5052_v39 = vld [vmem:[%s9600_s3 + $0x4c] sm:$0xf0]  ;;  %s4570_s20 = sshll.u32 %s5895_s24, 4 }
  0x36   : > { %761 = vmatpush.bf16.msra.mxu3 %v4684_v19  ;;  %866 = vmatpush.bf16.msra.mxu1 %v4684_v19  ;;  %v5050_v40 = vld [vmem:[%s9600_s3 + $0x44] sm:$0xf]  ;;  %v4617_v41 = vld [vmem:[%s9600_s3 + $0x50] sm:$0xf0]  ;;  %v4616_v42 = vor.u32 %v5052_v39, %v4615_v38  ;;  %s5916_s26 = scalar_lea.vmem [#allocation3], %s4569_s12  ;;  %s5969_s22 = scalar_lea.vmem [#allocation4], %s4570_s20 }
  0x37   : > { %v817_v43 = vld [vmem:[%s5916_s26] sm:$0x1]  ;;  %v4620_v44 = vor.u32 %v5050_v40, %v4617_v41  ;;  %v4599_v45 = vld [vmem:[%s9600_s3 + $0x20] sm:$0xf]  ;;  %v5048_v46 = vld [vmem:[%s9600_s3 + $0x2c] sm:$0xf0] }
  0x38   : > { %822 = vst [vmem:[#allocation1] ss:$9 sm:$0xff] %v817_v43  ;;  %v5046_v47 = vld [vmem:[%s9600_s3 + $0x24] sm:$0xf]  ;;  %v4601_v48 = vld [vmem:[%s9600_s3 + $0x30] sm:$0xf0]  ;;  %v4600_v49 = vor.u32 %v5048_v46, %v4599_v45 }
  0x39   : > { %743 = vmatpush.bf16.msra.mxu2 %v4664_v24  ;;  %854 = vmatpush.bf16.msra.mxu0 %v4664_v24  ;;  %v4583_v50 = vld [vmem:[%s9600_s3] sm:$0xf]  ;;  %v5044_v51 = vld [vmem:[%s9600_s3 + $0xc] sm:$0xf0]  ;;  %v4604_v52 = vor.u32 %v5046_v47, %v4601_v48  ;;  %v5042_v53 = vld [vmem:[%s9600_s3 + $0x4] sm:$0xf] }
  0x3a   : > { %762 = vmatpush.bf16.msra.mxu3 %v4668_v25  ;;  %867 = vmatpush.bf16.msra.mxu1 %v4668_v25  ;;  %v4585_v54 = vld [vmem:[%s9600_s3 + $0x10] sm:$0xf0]  ;;  %v4703_v55 = vld [vmem:[%s9600_s3 + $0xe8] sm:$0xf]  ;;  %v5073_v56 = vld [vmem:[%s9600_s3 + $0xf4] sm:$0xf0]  ;;  %v4584_v60 = vor.u32 %v5044_v51, %v4583_v50 }
  0x3b   : > { %v818_v57 = vld [vmem:[%s5916_s26 + $0x1] sm:$0x1]  ;;  %v4705_v59 = vld [vmem:[%s9600_s3 + $0xf8] sm:$0xf0]  ;;  %v4588_v62 = vor.u32 %v5042_v53, %v4585_v54  ;;  %v5959_v63 = vor.u32 %v5073_v56, %v4703_v55  ;;  %v5069_v2 = vld [vmem:[%s9600_s3 + $0xd4] sm:$0xf0] }
  0x3c   : > { %v5071_v58 = vld [vmem:[%s9600_s3 + $0xec] sm:$0xf]  ;;  %v4687_v1 = vld [vmem:[%s9600_s3 + $0xc8] sm:$0xf]  ;;  %v5972_v3 = vld [vmem:[%s5969_s22] sm:$0xff]  ;;  %vm9676_vm1 = vcmask 1042434  }
  0x3d   : > { %744 = vmatpush.bf16.msra.mxu2 %v4648_v30  ;;  %855 = vmatpush.bf16.msra.mxu0 %v4648_v30  ;;  %v5961_v0 = vor.u32 %v5071_v58, %v4705_v59  ;;  %v5067_v4 = vld [vmem:[%s9600_s3 + $0xcc] sm:$0xf]  ;;  %v4689_v5 = vld [vmem:[%s9600_s3 + $0xd8] sm:$0xf0]  ;;  %v5981_v6 = vor.u32 %v5069_v2, %v4687_v1  ;;  %v4671_v8 = vld [vmem:[%s9600_s3 + $0xa8] sm:$0xf] }
  0x3e   : > { %763 = vmatpush.bf16.msra.mxu3 %v4652_v31  ;;  %868 = vmatpush.bf16.msra.mxu1 %v4652_v31  ;;  %v5984_v7 = vor.u32 %v5067_v4, %v4689_v5  ;;  %v5065_v9 = vld [vmem:[%s9600_s3 + $0xb4] sm:$0xf0]  ;;  %v819_v10 = vld [vmem:[%s5916_s26 + $0x2] sm:$0x1]  ;;  %v4673_v12 = vld [vmem:[%s9600_s3 + $0xb8] sm:$0xf0] }
  0x3f   : > { %v5957_v61 = vld [vmem:[#allocation1] sm:$0xf]  ;;  %v5063_v11 = vld [vmem:[%s9600_s3 + $0xac] sm:$0xf]  ;;  %v6002_v14 = vor.u32 %v5065_v9, %v4671_v8  ;;  %v4655_v16 = vld [vmem:[%s9600_s3 + $0x88] sm:$0xf] }
  0x40   : > { %826 = vst [vmem:[#allocation1] ss:$9 sm:$0xff] %v818_v57  ;;  %v6005_v15 = vor.u32 %v5063_v11, %v4673_v12  ;;  %v5061_v17 = vld [vmem:[%s9600_s3 + $0x94] sm:$0xf0]  ;;  %v5059_v18 = vld [vmem:[%s9600_s3 + $0x8c] sm:$0xf] }
  0x41   : > { %745 = vmatpush.bf16.msra.mxu2 %v4632_v36  ;;  %856 = vmatpush.bf16.msra.mxu0 %v4632_v36  ;;  %v4657_v19 = vld [vmem:[%s9600_s3 + $0x98] sm:$0xf0]  ;;  %v6020_v20 = vor.u32 %v5061_v17, %v4655_v16  ;;  %v4639_v22 = vld [vmem:[%s9600_s3 + $0x68] sm:$0xf]  ;;  %v5057_v23 = vld [vmem:[%s9600_s3 + $0x74] sm:$0xf0] }
  0x42   : > { %764 = vmatpush.bf16.msra.mxu3 %v4636_v37  ;;  %869 = vmatpush.bf16.msra.mxu1 %v4636_v37  ;;  %v6023_v21 = vor.u32 %v5059_v18, %v4657_v19  ;;  %v820_v24 = vld [vmem:[%s5916_s26 + $0x3] sm:$0x1]  ;;  %v4641_v26 = vld [vmem:[%s9600_s3 + $0x78] sm:$0xf0]  ;;  %v4640_v29 = vor.u32 %v5057_v23, %v4639_v22  ;;  %v5053_v32 = vld [vmem:[%s9600_s3 + $0x54] sm:$0xf0]  ;;  %v837_v37 = vunpack.c.l.b16 %v5957_v61 }
  0x43   : > { %v5055_v25 = vld [vmem:[%s9600_s3 + $0x6c] sm:$0xf]  ;;  %v4623_v31 = vld [vmem:[%s9600_s3 + $0x48] sm:$0xf]  ;;  %v4625_v36 = vld [vmem:[%s9600_s3 + $0x58] sm:$0xf0] }
  0x44   : > { %v4644_v30 = vor.u32 %v5055_v25, %v4641_v26  ;;  %v5041_v34 = vld [vmem:[%s5969_s22 + $0x8] sm:$0xff]  ;;  %v4624_v39 = vor.u32 %v5053_v32, %v4623_v31  ;;  %vm9665_vm2 = vcmask 1043459   ;;  %v523_v61 = vld [vmem:[%s9602_s5] sm:$0xf]  ;;  %v5036_v31 = vld [vmem:[%s9601_s4 + $0xe4] sm:$0xf] }
  0x45   : > { %746 = vmatpush.bf16.msra.mxu2 %v4616_v42  ;;  %857 = vmatpush.bf16.msra.mxu0 %v4616_v42  ;;  %v5051_v35 = vld [vmem:[%s9600_s3 + $0x4c] sm:$0xf]  ;;  %v4607_v41 = vld [vmem:[%s9600_s3 + $0x28] sm:$0xf]  ;;  %v5049_v42 = vld [vmem:[%s9600_s3 + $0x34] sm:$0xf0] }
  0x46   : > { %765 = vmatpush.bf16.msra.mxu3 %v4620_v44  ;;  %870 = vmatpush.bf16.msra.mxu1 %v4620_v44  ;;  %v4628_v40 = vor.u32 %v5051_v35, %v4625_v36  ;;  %v5047_v44 = vld [vmem:[%s9600_s3 + $0x2c] sm:$0xf]  ;;  %v4609_v45 = vld [vmem:[%s9600_s3 + $0x38] sm:$0xf0]  ;;  %v4608_v48 = vor.u32 %v5049_v42, %v4607_v41  ;;  %v4591_v51 = vld [vmem:[%s9600_s3 + $0x8] sm:$0xf] }
  0x47   : > { %v827_v13 = vld [vmem:[#allocation1] sm:$0xf]  ;;  %v4612_v50 = vor.u32 %v5047_v44, %v4609_v45  ;;  %v5043_v54 = vld [vmem:[%s9600_s3 + $0xc] sm:$0xf]  ;;  %v4593_v55 = vld [vmem:[%s9600_s3 + $0x18] sm:$0xf0] }
  0x48   : > { %830 = vst [vmem:[#allocation1] ss:$9 sm:$0xff] %v819_v10  ;;  %v838_v27 = vunpack.c.l.b16 %v827_v13  ;;  %v4596_v59 = vor.u32 %v5043_v54, %v4593_v55  ;;  %v6121_v19 = vperm.slane %v523_v61, 2  ;;  %v4828_v32 = vld [vmem:[%s9601_s4 + $0xf0] sm:$0xf0]  ;;  %s4571_s10 = sshll.u32 %s5895_s24, 5 }
  0x49   : > { %747 = vmatpush.bf16.msra.mxu2 %v4600_v49  ;;  %858 = vmatpush.bf16.msra.mxu0 %v4600_v49  ;;  %v5039_v35 = vld [vmem:[%s9601_s4 + $0xf4] sm:$0xf0]  ;;  %v5037_v36 = vld [vmem:[%s9601_s4 + $0xec] sm:$0xf]  ;;  %v4812_v44 = vld [vmem:[%s9601_s4 + $0xd0] sm:$0xf0] }
  0x4a   : > { %766 = vmatpush.bf16.msra.mxu3 %v4604_v52  ;;  %871 = vmatpush.bf16.msra.mxu1 %v4604_v52  ;;  %v841_v38 = vrot.slane %v838_v27, 7  ;;  %v5045_v52 = vld [vmem:[%s9600_s3 + $0x14] sm:$0xf0]  ;;  %v4826_v27 = vld [vmem:[%s9601_s4 + $0xe0] sm:$0xf]  ;;  %s9469_s23 = scalar_lea.vmem [#allocation5], %s4571_s10 }
  0x4b   : > { %v4592_v57 = vor.u32 %v5045_v52, %v4591_v51  ;;  %v4818_v45 = vld [vmem:[%s9601_s4 + $0xc8] sm:$0xf]  ;;  %s4572_s13 = sshll.u32 %s5895_s24, 6  ;;  %s4414_s22 = scalar_lea.sflag [#allocation7], %s5895_s24 }
  0x4c   : > { %v843_v46 = vsel %vm842_vm0, %v841_v38, %v837_v37  ;;  %v4836_v38 = vld [vmem:[%s9601_s4 + $0xf8] sm:$0xf0]  ;;  %s9548_s18 = scalar_lea.vmem [#allocation6], %s4572_s13 }
  0x4d   : > { %748 = vmatpush.bf16.msra.mxu2 %v4584_v60  ;;  %859 = vmatpush.bf16.msra.mxu0 %v4584_v60  ;;  %v6170_v41 = vor.u32 %v5037_v36, %v4836_v38 }
  0x4e   : > { %767 = vmatpush.bf16.msra.mxu3 %v4588_v62  ;;  %872 = vmatpush.bf16.msra.mxu1 %v4588_v62  ;;  %v6094_v62 = vperm.slane %v523_v61, 0 }
  0x4f   : > { %v831_v28 = vld [vmem:[#allocation1] sm:$0xf] }
  0x50   : > { %749 = vmatmul.bf16.vlgmr.msra.gmra.mxu2 %v5972_v3  ;;  %834 = vst [vmem:[#allocation1] ss:$9 sm:$0xff] %v820_v24  ;;  %v839_v33 = vunpack.c.l.b16 %v831_v28  ;;  %v5038_v28 = vld [vmem:[%s9601_s4 + $0xec] sm:$0xf0] }
  0x51   : > { %779 = vmatpush.bf16.msrb.mxu2 %v5959_v63  ;;  %768 = vmatmul.bf16.vlgmr.msra.gmra.mxu3 %v5972_v3 }
  0x52   : > { %798 = vmatpush.bf16.msrb.mxu3 %v5961_v0  ;;  %v844_v43 = vrot.slane %v839_v33, 6  ;;  %v4834_v33 = vld [vmem:[%s9601_s4 + $0xe8] sm:$0xf] }
  0x53   : > { %v6158_v37 = vor.u32 %v5039_v35, %v4834_v33  ;;  %v5025_v33 = vld [vmem:[%s9601_s4 + $0x8c] sm:$0xf]  ;;  %v4788_v35 = vld [vmem:[%s9601_s4 + $0x98] sm:$0xf0] }
  0x54   : > { %v846_v53 = vsel %vm9676_vm1, %v844_v43, %v843_v46  ;;  %v5032_v43 = vld [vmem:[%s9601_s4 + $0xc4] sm:$0xf] }
  0x55   : > { %780 = vmatpush.bf16.msrb.mxu2 %v5981_v6 }
  0x56   : > { %799 = vmatpush.bf16.msrb.mxu3 %v5984_v7 }
  0x57   : > { %v835_v47 = vld [vmem:[#allocation1] sm:$0xf] }
  0x58   : > { %v840_v49 = vunpack.c.l.b16 %v835_v47  ;;  %v6184_v47 = vor.u32 %v5032_v43, %v4812_v44  ;;  %v4762_v43 = vld [vmem:[%s9601_s4 + $0x60] sm:$0xf]  ;;  %v5022_v44 = vld [vmem:[%s9601_s4 + $0x6c] sm:$0xf0] }
  0x59   : > { %781 = vmatpush.bf16.msrb.mxu2 %v6002_v14 }
  0x5a   : > { %800 = vmatpush.bf16.msrb.mxu3 %v6005_v15  ;;  %v847_v56 = vrot.slane %v840_v49, 5  ;;  %v5033_v49 = vld [vmem:[%s9601_s4 + $0xcc] sm:$0xf] }
  0x5c   : > { %v849_v58 = vsel %vm9665_vm2, %v847_v56, %v846_v53 }
  0x5d   : > { %782 = vmatpush.bf16.msrb.mxu2 %v6020_v20  ;;  %v850_v60 = vpack.c.b16 %v849_v58, %v849_v58  ;;  %v5030_v58 = vld [vmem:[%s9601_s4 + $0xac] sm:$0xf0] }
  0x5e   : > { %801 = vmatpush.bf16.msrb.mxu3 %v6023_v21 }
  0x5f   : > { %860 = vmatmul.bf16.vlgmr.msra.gmra.mxu0 %v850_v60  ;;  %873 = vmatmul.bf16.vlgmr.msra.gmra.mxu1 %v850_v60 }
  0x60   : > { %754 = vmatmul.bf16.gmra.mxu2 %v5041_v34 }
  0x61   : > { %783 = vmatpush.bf16.msrb.mxu2 %v4640_v29  ;;  %773 = vmatmul.bf16.gmra.mxu3 %v5041_v34 }
  0x62   : > { %802 = vmatpush.bf16.msrb.mxu3 %v4644_v30 }
  0x65   : > { %784 = vmatpush.bf16.msrb.mxu2 %v4624_v39 }
  0x66   : > { %803 = vmatpush.bf16.msrb.mxu3 %v4628_v40 }
  0x69   : > { %785 = vmatpush.bf16.msrb.mxu2 %v4608_v48 }
  0x6a   : > { %804 = vmatpush.bf16.msrb.mxu3 %v4612_v50 }
  0x6d   : > { %786 = vmatpush.bf16.msrb.mxu2 %v4592_v57 }
  0x6e   : > { %805 = vmatpush.bf16.msrb.mxu3 %v4596_v59 }
  0x70   : > { %787 = vmatmul.bf16.vlgmr.msrb.gmra.mxu2 %v5972_v3 }
  0x71   : > { %878 = vmatpush.bf16.msra.mxu2 %v5959_v63  ;;  %806 = vmatmul.bf16.vlgmr.msrb.gmra.mxu3 %v5972_v3  ;;  %v6096_v63 = vperm.slane %v523_v61, 1 }
  0x72   : > { %891 = vmatpush.bf16.msra.mxu3 %v5961_v0 }
  0x75   : > { %879 = vmatpush.bf16.msra.mxu2 %v5981_v6 }
  0x76   : > { %892 = vmatpush.bf16.msra.mxu3 %v5984_v7 }
  0x79   : > { %880 = vmatpush.bf16.msra.mxu2 %v6002_v14 }
  0x7a   : > { %893 = vmatpush.bf16.msra.mxu3 %v6005_v15 }
  0x7d   : > { %881 = vmatpush.bf16.msra.mxu2 %v6020_v20  ;;  %v6123_v20 = vperm.slane %v523_v61, 3  ;;  %v4796_v61 = vld [vmem:[%s9601_s4 + $0xb0] sm:$0xf0] }
  0x7e   : > { %894 = vmatpush.bf16.msra.mxu3 %v6023_v21 }
  0x80   : > { %792 = vmatmul.bf16.gmra.mxu2 %v5041_v34 }
  0x81   : > { %882 = vmatpush.bf16.msra.mxu2 %v4640_v29  ;;  %811 = vmatmul.bf16.gmra.mxu3 %v5041_v34  ;;  %v6150_v34 = vor.u32 %v5036_v31, %v4828_v32 }
  0x82   : > { %895 = vmatpush.bf16.msra.mxu3 %v4644_v30  ;;  %v6138_v30 = vor.u32 %v5038_v28, %v4826_v27  ;;  %v5027_v27 = vld [vmem:[%s9601_s4 + $0x94] sm:$0xf0] }
  0x83   : > { %1141 = vmatpush.bf16.msrb.mxu1 %v6150_v34 }
  0x84   : > { %1128 = vmatpush.bf16.msrb.mxu0 %v6138_v30 }
  0x85   : > { %883 = vmatpush.bf16.msra.mxu2 %v4624_v39  ;;  %v4810_v39 = vld [vmem:[%s9601_s4 + $0xc0] sm:$0xf] }
  0x86   : > { %896 = vmatpush.bf16.msra.mxu3 %v4628_v40  ;;  %v5034_v40 = vld [vmem:[%s9601_s4 + $0xcc] sm:$0xf0] }
  0x87   : > { %v6172_v42 = vor.u32 %v5034_v40, %v4810_v39  ;;  %1142 = vmatpush.bf16.msrb.mxu1 %v6184_v47  ;;  %v6287_v40 = vor.u32 %v5025_v33, %v4788_v35 }
  0x89   : > { %884 = vmatpush.bf16.msra.mxu2 %v4608_v48  ;;  %v5035_v48 = vld [vmem:[%s9601_s4 + $0xd4] sm:$0xf0]  ;;  %1129 = vmatpush.bf16.msrb.mxu0 %v6172_v42  ;;  %9698 = vst [vmem:[#allocation27_spill] sm:$0xff] %v6287_v40 }
  0x8a   : > { %897 = vmatpush.bf16.msra.mxu3 %v4612_v50  ;;  %v4820_v50 = vld [vmem:[%s9601_s4 + $0xd8] sm:$0xf0]  ;;  %v6200_v53 = vor.u32 %v5035_v48, %v4818_v45  ;;  %v5020_v45 = vld [vmem:[%s9601_s4 + $0x64] sm:$0xf]  ;;  %v4764_v48 = vld [vmem:[%s9601_s4 + $0x70] sm:$0xf0] }
  0x8b   : > { %v6205_v56 = vor.u32 %v5033_v49, %v4820_v50  ;;  %v4770_v49 = vld [vmem:[%s9601_s4 + $0x68] sm:$0xf]  ;;  %v6310_v50 = vor.u32 %v5020_v45, %v4764_v48  ;;  %v5012_v45 = vld [vmem:[%s9601_s4 + $0x24] sm:$0xf]  ;;  %v4732_v48 = vld [vmem:[%s9601_s4 + $0x30] sm:$0xf0] }
  0x8d   : > { %885 = vmatpush.bf16.msra.mxu2 %v4592_v57  ;;  %v4794_v57 = vld [vmem:[%s9601_s4 + $0xa0] sm:$0xf]  ;;  %9700 = vst [vmem:[#allocation29_spill] sm:$0xff] %v6310_v50 }
  0x8e   : > { %898 = vmatpush.bf16.msra.mxu3 %v4596_v59  ;;  %v6214_v59 = vor.u32 %v5030_v58, %v4794_v57  ;;  %v4772_v57 = vld [vmem:[%s9601_s4 + $0x78] sm:$0xf0] }
  0x90   : > { %886 = vmatmul.bf16.vlgmr.msra.gmra.mxu2 %v850_v60  ;;  %1130 = vmatpush.bf16.msrb.mxu0 %v6214_v59 }
  0x91   : > { %899 = vmatmul.bf16.vlgmr.msra.gmra.mxu3 %v850_v60  ;;  %1154 = vmatpush.bf16.msrb.mxu2 %v6158_v37  ;;  %v5028_v60 = vld [vmem:[%s9601_s4 + $0xa4] sm:$0xf] }
  0x92   : > { %1167 = vmatpush.bf16.msrb.mxu3 %v6170_v41 }
  0x95   : > { %1155 = vmatpush.bf16.msrb.mxu2 %v6200_v53 }
  0x96   : > { %1168 = vmatpush.bf16.msrb.mxu3 %v6205_v56 }
  0xd3   : > { %v750_v0 = vpop.f32.mrf.mxu2 }
  0xd4   : > { %v6099_v1 = vadd.f32 %v750_v0, %v6094_v62  ;;  %v769_v2 = vpop.f32.mrf.mxu3  ;;  %v6223_v0 = vor.u32 %v5028_v60, %v4796_v61  ;;  %v4746_v61 = vld [vmem:[%s9601_s4 + $0x40] sm:$0xf] }
  0xd5   : > { %v6102_v3 = vadd.f32 %v769_v2, %v6096_v63  ;;  %v4802_v2 = vld [vmem:[%s9601_s4 + $0xa8] sm:$0xf] }
  0xd6   : > { %9682 = vst [vmem:[#allocation11_spill] sm:$0xff] %v6099_v1  ;;  %1143 = vmatpush.bf16.msrb.mxu1 %v6223_v0 }
  0xd7   : > { %9683 = vst [vmem:[#allocation12_spill] sm:$0xff] %v6102_v3 }
  0xdb   : > { %v6104_v4 = vpop.f32.mrf.mxu2 }
  0xdc   : > { %v6106_v5 = vpop.f32.mrf.mxu3  ;;  %v861_v10 = vpop.f32.mrf.mxu0 }
  0xdd   : > { %v874_v11 = vpop.f32.mrf.mxu1  ;;  %v862_v18 = vadd.f32 %v861_v10, %v6094_v62 }
  0xde   : > { %v875_v21 = vadd.f32 %v874_v11, %v6096_v63 }
  0xdf   : > { %v4709_v23 = vmul.f32 -1.442695, %v862_v18  ;;  %v5026_v18 = vld [vmem:[%s9601_s4 + $0x8c] sm:$0xf0] }
  0xe0   : > { %v4710_v29 = vmul.f32 -1.442695, %v875_v21  ;;  %v5024_v21 = vld [vmem:[%s9601_s4 + $0x84] sm:$0xf] }
  0xe1   : > { %5147 = vpow2.f32 %v4709_v23  ;;  %v4780_v23 = vld [vmem:[%s9601_s4 + $0x90] sm:$0xf0] }
  0xe2   : > { %5149 = vpow2.f32 %v4710_v29  ;;  %v6269_v31 = vor.u32 %v5024_v21, %v4780_v23 }
  0xe3   : > { %v755_v6 = vpop.f32.mrf.mxu2 }
  0xe4   : > { %v6109_v7 = vadd.f32 %v755_v6, %v6094_v62  ;;  %v774_v8 = vpop.f32.mrf.mxu3  ;;  %v863_v16 = vpop.f32.mrf.mxu0  ;;  %v5031_v6 = vld [vmem:[%s9601_s4 + $0xb4] sm:$0xf0]  ;;  %9694 = vst [vmem:[#allocation23_spill] sm:$0xff] %v6269_v31  ;;  %1144 = vmatpush.bf16.msrb.mxu1 %v6269_v31 }
  0xe5   : > { %v6112_v9 = vadd.f32 %v774_v8, %v6096_v63  ;;  %v876_v17 = vpop.f32.mrf.mxu1  ;;  %v5029_v8 = vld [vmem:[%s9601_s4 + $0xac] sm:$0xf] }
  0xe6   : > { %9684 = vst [vmem:[#allocation13_spill] sm:$0xff] %v6109_v7  ;;  %v4778_v17 = vld [vmem:[%s9601_s4 + $0x80] sm:$0xf] }
  0xe7   : > { %9685 = vst [vmem:[#allocation14_spill] sm:$0xff] %v6112_v9  ;;  %v5148_v54 = vpop.eup %5147 }
  0xe8   : > { %v5150_v10 = vpop.eup %5149  ;;  %v6234_v11 = vadd.f32 1.0, %v5148_v54  ;;  %v5021_v54 = vld [vmem:[%s9601_s4 + $0x6c] sm:$0xf]  ;;  %1145 = vmatpush.bf16.msrb.mxu1 %v6310_v50 }
  0xe9   : > { %v6266_v28 = vadd.f32 1.0, %v5150_v10  ;;  %v6325_v60 = vor.u32 %v5021_v54, %v4772_v57  ;;  %v4748_v10 = vld [vmem:[%s9601_s4 + $0x50] sm:$0xf0]  ;;  %v4738_v57 = vld [vmem:[%s9601_s4 + $0x28] sm:$0xf] }
  0xea   : > { %5151 = vrcp.f32 %v6234_v11  ;;  %vm913_vm3 = vweird.f32 %v6234_v11 }
  0xeb   : > { %v757_v12 = vpop.f32.mrf.mxu2  ;;  %5153 = vrcp.f32 %v6266_v28  ;;  %9702 = vst [vmem:[#allocation31_spill] sm:$0xff] %v6325_v60  ;;  %vm932_vm5 = vweird.f32 %v6266_v28 }
  0xec   : > { %v6115_v13 = vadd.f32 %v757_v12, %v6094_v62  ;;  %v776_v14 = vpop.f32.mrf.mxu3  ;;  %v6238_v12 = vor.u32 %v5031_v6, %v4802_v2  ;;  %v5018_v2 = vld [vmem:[%s9601_s4 + $0x4c] sm:$0xf0]  ;;  %v5016_v6 = vld [vmem:[%s9601_s4 + $0x44] sm:$0xf] }
  0xed   : > { %v6118_v15 = vadd.f32 %v776_v14, %v6096_v63  ;;  %v4804_v14 = vld [vmem:[%s9601_s4 + $0xb8] sm:$0xf0]  ;;  %v6349_v21 = vor.u32 %v5016_v6, %v4748_v10  ;;  %v6397_v6 = vor.u32 %v5012_v45, %v4732_v48  ;;  %v4722_v48 = vld [vmem:[%s9601_s4 + $0x8] sm:$0xf] }
  0xee   : > { %9686 = vst [vmem:[#allocation15_spill] sm:$0xff] %v6115_v13  ;;  %v6243_v16 = vor.u32 %v5029_v8, %v4804_v14  ;;  %1156 = vmatpush.bf16.msrb.mxu2 %v6238_v12  ;;  %v6337_v8 = vor.u32 %v5018_v2, %v4746_v61  ;;  %v4754_v14 = vld [vmem:[%s9601_s4 + $0x48] sm:$0xf]  ;;  %v5015_v61 = vld [vmem:[%s9601_s4 + $0x34] sm:$0xf0] }
  0xef   : > { %9687 = vst [vmem:[#allocation16_spill] sm:$0xff] %v6118_v15  ;;  %v5013_v2 = vld [vmem:[%s9601_s4 + $0x2c] sm:$0xf]  ;;  %1146 = vmatpush.bf16.msrb.mxu1 %v6349_v21  ;;  %v4740_v10 = vld [vmem:[%s9601_s4 + $0x38] sm:$0xf0] }
  0xf0   : > { %9692 = vst [vmem:[#allocation21_spill] sm:$0xff] %v6243_v16  ;;  %1169 = vmatpush.bf16.msrb.mxu3 %v6243_v16  ;;  %v6362_v33 = vpop.eup %5151 }
  0xf1   : > { %9703 = vst [vmem:[#allocation32_spill] sm:$0xff] %v6337_v8  ;;  %vm914_vm4 = vweird.f32 %v6362_v33 }
  0xf2   : > { %9704 = vst [vmem:[#allocation33_spill] sm:$0xff] %v6349_v21  ;;  %vm6470_vm7 = vmor %vm913_vm3, %vm914_vm4 }
  0xf3   : > { %v788_v22 = vpop.f32.mrf.mxu2  ;;  %9710 = vst [vmem:[#allocation39_spill] sm:$0xff] %v6397_v6  ;;  %1147 = vmatpush.bf16.msrb.mxu1 %v6397_v6 }
  0xf4   : > { %v6127_v24 = vadd.f32 %v788_v22, %v6121_v19  ;;  %v807_v25 = vpop.f32.mrf.mxu3  ;;  %v6255_v22 = vor.u32 %v5026_v18, %v4778_v17  ;;  %1170 = vmatpush.bf16.msrb.mxu3 %v6287_v40  ;;  %v5019_v17 = vld [vmem:[%s9601_s4 + $0x54] sm:$0xf0] }
  0xf5   : > { %v6130_v26 = vadd.f32 %v807_v25, %v6123_v20  ;;  %v4786_v25 = vld [vmem:[%s9601_s4 + $0x88] sm:$0xf]  ;;  %v6351_v23 = vor.u32 %v5019_v17, %v4754_v14  ;;  %v4714_v14 = vld [vmem:[%s9601_s4] sm:$0xf]  ;;  %v5010_v17 = vld [vmem:[%s9601_s4 + $0xc] sm:$0xf0] }
  0xf6   : > { %9688 = vst [vmem:[#allocation17_spill] sm:$0xff] %v6127_v24  ;;  %v6271_v32 = vor.u32 %v5027_v27, %v4786_v25  ;;  %1131 = vmatpush.bf16.msrb.mxu0 %v6255_v22  ;;  %v5017_v25 = vld [vmem:[%s9601_s4 + $0x4c] sm:$0xf]  ;;  %v4756_v27 = vld [vmem:[%s9601_s4 + $0x58] sm:$0xf0]  ;;  %v6425_v45 = vor.u32 %v5010_v17, %v4714_v14 }
  0xf7   : > { %9689 = vst [vmem:[#allocation18_spill] sm:$0xff] %v6130_v26 }
  0xf8   : > { %9693 = vst [vmem:[#allocation22_spill] sm:$0xff] %v6255_v22  ;;  %1157 = vmatpush.bf16.msrb.mxu2 %v6271_v32  ;;  %1171 = vmatpush.bf16.msrb.mxu3 %v6325_v60 }
  0xf9   : > { %9695 = vst [vmem:[#allocation24_spill] sm:$0xff] %v6271_v32 }
  0xfa   : > { %9705 = vst [vmem:[#allocation34_spill] sm:$0xff] %v6351_v23 }
  0xfb   : > { %v790_v46 = vpop.f32.mrf.mxu2  ;;  %9713 = vst [vmem:[#allocation42_spill] sm:$0xff] %v6425_v45 }
  0xfc   : > { %v6196_v51 = vadd.f32 %v790_v46, %v6121_v19  ;;  %v809_v52 = vpop.f32.mrf.mxu3  ;;  %v6300_v46 = vor.u32 %v5022_v44, %v4762_v43  ;;  %v6369_v43 = vor.u32 %v5017_v25, %v4756_v27  ;;  %v5014_v44 = vld [vmem:[%s9601_s4 + $0x2c] sm:$0xf0]  ;;  %v6411_v25 = vor.u32 %v5015_v61, %v4738_v57  ;;  %v5008_v27 = vld [vmem:[%s9601_s4 + $0x4] sm:$0xf]  ;;  %v5011_v57 = vld [vmem:[%s9601_s4 + $0x14] sm:$0xf0] }
  0xfd   : > { %v6203_v55 = vadd.f32 %v809_v52, %v6123_v20  ;;  %v5023_v52 = vld [vmem:[%s9601_s4 + $0x74] sm:$0xf0]  ;;  %v5009_v61 = vld [vmem:[%s9601_s4 + $0xc] sm:$0xf]  ;;  %v6443_v14 = vor.u32 %v5011_v57, %v4722_v48  ;;  %v936_v57 = vand.u32 2147483647, %v6266_v28 }
  0xfe   : > { %9690 = vst [vmem:[#allocation19_spill] sm:$0xff] %v6196_v51  ;;  %1132 = vmatpush.bf16.msrb.mxu0 %v6300_v46  ;;  %v6323_v58 = vor.u32 %v5023_v52, %v4770_v49  ;;  %v6380_v49 = vpop.eup %5153  ;;  %1172 = vmatpush.bf16.msrb.mxu3 %v6369_v43 }
  0xff   : > { %9691 = vst [vmem:[#allocation20_spill] sm:$0xff] %v6203_v55  ;;  %vm933_vm6 = vweird.f32 %v6380_v49  ;;  %vm937_vm10 = vcmp.eq.f32.partialorder %v936_v57, 8.507059e+37 }
 0x100   : > { %9699 = vst [vmem:[#allocation28_spill] sm:$0xff] %v6300_v46  ;;  %1158 = vmatpush.bf16.msrb.mxu2 %v6323_v58  ;;  %vm6477_vm8 = vmor %vm932_vm5, %vm933_vm6 }
 0x101   : > { %9701 = vst [vmem:[#allocation30_spill] sm:$0xff] %v6323_v58 }
 0x102   : > { %1133 = vmatpush.bf16.msrb.mxu0 %v6337_v8  ;;  %9707 = vst [vmem:[#allocation36_spill] sm:$0xff] %v6369_v43 }
 0x103   : > { %v793_v29 = vpop.f32.mrf.mxu2  ;;  %9711 = vst [vmem:[#allocation40_spill] sm:$0xff] %v6411_v25 }
 0x104   : > { %v6280_v36 = vadd.f32 %v793_v29, %v6121_v19  ;;  %v812_v38 = vpop.f32.mrf.mxu3  ;;  %v4730_v29 = vld [vmem:[%s9601_s4 + $0x20] sm:$0xf]  ;;  %1159 = vmatpush.bf16.msrb.mxu2 %v6351_v23  ;;  %9715 = vst [vmem:[#allocation44_spill] sm:$0xff] %v6443_v14 }
 0x105   : > { %v6285_v39 = vadd.f32 %v812_v38, %v6123_v20  ;;  %v6385_v54 = vor.u32 %v5014_v44, %v4730_v29  ;;  %v4716_v29 = vld [vmem:[%s9601_s4 + $0x10] sm:$0xf0]  ;;  %v6423_v44 = vor.u32 %v5013_v2, %v4740_v10 }
 0x106   : > { %9696 = vst [vmem:[#allocation25_spill] sm:$0xff] %v6280_v36  ;;  %v6440_v2 = vor.u32 %v5008_v27, %v4716_v29 }
 0x107   : > { %9697 = vst [vmem:[#allocation26_spill] sm:$0xff] %v6285_v39  ;;  %1134 = vmatpush.bf16.msrb.mxu0 %v6385_v54  ;;  %1173 = vmatpush.bf16.msrb.mxu3 %v6423_v44 }
 0x108   : > { %9709 = vst [vmem:[#allocation38_spill] sm:$0xff] %v6385_v54  ;;  %1160 = vmatpush.bf16.msrb.mxu2 %v6411_v25  ;;  %1148 = vmatpush.bf16.msrb.mxu1 %v6440_v2 }
 0x109   : > { %9712 = vst [vmem:[#allocation41_spill] sm:$0xff] %v6423_v44 }
 0x10a   : > { %9714 = vst [vmem:[#allocation43_spill] sm:$0xff] %v6440_v2 }
 0x10b   : > { %v795_v18 = vpop.f32.mrf.mxu2  ;;  %1135 = vmatpush.bf16.msrb.mxu0 %v6425_v45 }
 0x10c   : > { %v6365_v35 = vadd.f32 %v795_v18, %v6121_v19  ;;  %v814_v38 = vpop.f32.mrf.mxu3  ;;  %v909_v18 = vmul.f32 %v6362_v33, %v6234_v11  ;;  %1161 = vmatpush.bf16.msrb.mxu2 %v6443_v14  ;;  %1525 = vmatpush.bf16.msra.mxu1 %v6150_v34 }
 0x10d   : > { %v6383_v52 = vadd.f32 %v814_v38, %v6123_v20  ;;  %v928_v38 = vmul.f32 %v6380_v49, %v6266_v28 }
 0x10e   : > { %9706 = vst [vmem:[#allocation35_spill] sm:$0xff] %v6365_v35  ;;  %v910_v17 = vsub.f32 1.0, %v909_v18 }
 0x10f   : > { %9708 = vst [vmem:[#allocation37_spill] sm:$0xff] %v6383_v52  ;;  %v4724_v52 = vld [vmem:[%s9601_s4 + $0x18] sm:$0xf0]  ;;  %v929_v39 = vsub.f32 1.0, %v928_v38  ;;  %1512 = vmatpush.bf16.msra.mxu0 %v6138_v30 }
 0x110   : > { %v6447_v35 = vor.u32 %v5009_v61, %v4724_v52  ;;  %v911_v38 = vmul.f32 %v6362_v33, %v910_v17  ;;  %1538 = vmatpush.bf16.msra.mxu2 %v6158_v37  ;;  %1526 = vmatpush.bf16.msra.mxu1 %v6184_v47 }
 0x111   : > { %v930_v18 = vmul.f32 %v6380_v49, %v929_v39 }
 0x112   : > { %9716 = vst [vmem:[#allocation45_spill] sm:$0xff] %v6447_v35  ;;  %1174 = vmatpush.bf16.msrb.mxu3 %v6447_v35  ;;  %v912_v39 = vadd.f32 %v6362_v33, %v911_v38 }
 0x113   : > { %v887_v10 = vpop.f32.mrf.mxu2  ;;  %1513 = vmatpush.bf16.msra.mxu0 %v6172_v42  ;;  %v931_v48 = vadd.f32 %v6380_v49, %v930_v18 }
 0x114   : > { %v900_v55 = vpop.f32.mrf.mxu3  ;;  %v888_v27 = vadd.f32 %v887_v10, %v6121_v19  ;;  %v938_v19 = vand.u32 2147483648, %v6266_v28  ;;  %1539 = vmatpush.bf16.msra.mxu2 %v6200_v53  ;;  %1527 = vmatpush.bf16.msra.mxu1 %v6223_v0  ;;  %v916_v28 = vsel %vm6470_vm7, %v6362_v33, %v912_v39 }
 0x115   : > { %v901_v36 = vadd.f32 %v900_v55, %v6123_v20  ;;  %v917_v20 = vand.u32 2147483647, %v6234_v11  ;;  %v919_v55 = vand.u32 2147483648, %v6234_v11 }
 0x116   : > { %1551 = vmatpush.bf16.msra.mxu3 %v6170_v41  ;;  %v939_v17 = vor.u32 1.1754944e-38, %v938_v19 }
 0x117   : > { %v4711_v29 = vmul.f32 -1.442695, %v901_v36  ;;  %1514 = vmatpush.bf16.msra.mxu0 %v6214_v59  ;;  %vm918_vm9 = vcmp.eq.f32.partialorder %v917_v20, 8.507059e+37 }
 0x118   : > { %1540 = vmatpush.bf16.msra.mxu2 %v6238_v12  ;;  %1528 = vmatpush.bf16.msra.mxu1 %v6269_v31 }
 0x119   : > { %5155 = vpow2.f32 %v4711_v29  ;;  %v935_v29 = vsel %vm6477_vm8, %v6380_v49, %v931_v48 }
 0x11a   : > { %5157 = vtanh.f32 %v888_v27  ;;  %1552 = vmatpush.bf16.msra.mxu3 %v6205_v56  ;;  %v920_v27 = vor.u32 1.1754944e-38, %v919_v55  ;;  %v940_v20 = vsel %vm937_vm10, %v939_v17, %v935_v29 }
 0x11b   : > { %v889_v36 = vpop.f32.mrf.mxu2  ;;  %1515 = vmatpush.bf16.msra.mxu0 %v6255_v22  ;;  %v962_v33 = vmul.f32 0.0, %v940_v20 }
 0x11c   : > { %v902_v61 = vpop.f32.mrf.mxu3  ;;  %v921_v19 = vsel %vm918_vm9, %v920_v27, %v916_v28  ;;  %1541 = vmatpush.bf16.msra.mxu2 %v6271_v32  ;;  %1529 = vmatpush.bf16.msra.mxu1 %v6310_v50 }
 0x11e   : > { %1553 = vmatpush.bf16.msra.mxu3 %v6243_v16 }
 0x11f   : > { %v5156_v11 = vpop.eup %5155  ;;  %1516 = vmatpush.bf16.msra.mxu0 %v6300_v46 }
 0x120   : > { %v946_v18 = vadd.f32 1.0, %v5156_v11  ;;  %v5158_v38 = vpop.eup %5157  ;;  %1542 = vmatpush.bf16.msra.mxu2 %v6323_v58  ;;  %1530 = vmatpush.bf16.msra.mxu1 %v6349_v21 }
 0x121   : > { %v963_v55 = vmul.f32 %v5158_v38, %v921_v19  ;;  %v6549_v38 = vadd.f32 %v6104_v4, %v6094_v62  ;;  %v6553_v19 = vadd.f32 %v6106_v5, %v6096_v63 }
 0x122   : > { %5159 = vrcp.f32 %v946_v18  ;;  %1554 = vmatpush.bf16.msra.mxu3 %v6287_v40  ;;  %v958_v48 = vand.u32 2147483648, %v946_v18  ;;  %v956_v61 = vand.u32 2147483647, %v946_v18  ;;  %vm952_vm12 = vweird.f32 %v946_v18 }
 0x123   : > { %v6498_v36 = vadd.f32 %v963_v55, %v962_v33  ;;  %1517 = vmatpush.bf16.msra.mxu0 %v6337_v8  ;;  %9721 = vst [vmem:[#allocation46_spill] sm:$0xff] %v6549_v38 }
 0x124   : > { %1543 = vmatpush.bf16.msra.mxu2 %v6351_v23  ;;  %1531 = vmatpush.bf16.msra.mxu1 %v6397_v6  ;;  %v959_v11 = vor.u32 1.1754944e-38, %v958_v48  ;;  %vm957_vm14 = vcmp.eq.f32.partialorder %v956_v61, 8.507059e+37  ;;  %9722 = vst [vmem:[#allocation47_spill] sm:$0xff] %v6553_v19 }
 0x125   : > { %5161 = vtanh.f32 %v6498_v36 }
 0x126   : > { %1555 = vmatpush.bf16.msra.mxu3 %v6325_v60 }
 0x127   : > { %1518 = vmatpush.bf16.msra.mxu0 %v6385_v54 }
 0x128   : > { %v5160_v49 = vpop.eup %5159  ;;  %1544 = vmatpush.bf16.msra.mxu2 %v6411_v25  ;;  %1532 = vmatpush.bf16.msra.mxu1 %v6440_v2 }
 0x129   : > { %v948_v39 = vmul.f32 %v5160_v49, %v946_v18  ;;  %vm953_vm11 = vweird.f32 %v5160_v49 }
 0x12a   : > { %1556 = vmatpush.bf16.msra.mxu3 %v6369_v43  ;;  %vm954_vm13 = vmor %vm952_vm12, %vm953_vm11 }
 0x12b   : > { %v949_v52 = vsub.f32 1.0, %v948_v39  ;;  %1519 = vmatpush.bf16.msra.mxu0 %v6425_v45  ;;  %v5162_v27 = vpop.eup %5161 }
 0x12c   : > { %1545 = vmatpush.bf16.msra.mxu2 %v6443_v14 }
 0x12d   : > { %v950_v57 = vmul.f32 %v5160_v49, %v949_v52 }
 0x12e   : > { %1557 = vmatpush.bf16.msra.mxu3 %v6423_v44 }
 0x12f   : > { %v951_v10 = vadd.f32 %v5160_v49, %v950_v57 }
 0x131   : > { %v955_v17 = vsel %vm954_vm13, %v5160_v49, %v951_v10 }
 0x132   : > { %v960_v28 = vsel %vm957_vm14, %v959_v11, %v955_v17  ;;  %1558 = vmatpush.bf16.msra.mxu3 %v6447_v35 }
 0x133   : > { %v966_v29 = vmul.f32 %v5162_v27, %v960_v28 }
 0x135   : > { %v967_v18 = vpack.c.bf16 %v966_v29, %v966_v29 }
 0x137   : > { %1136 = vmatmul.bf16.vlgmr.msrb.gmra.mxu0 %v967_v18  ;;  %1149 = vmatmul.bf16.vlgmr.msrb.gmra.mxu1 %v967_v18 }
 0x138   : > { %1162 = vmatmul.bf16.vlgmr.msrb.gmra.mxu2 %v967_v18  ;;  %1175 = vmatmul.bf16.vlgmr.msrb.gmra.mxu3 %v967_v18 }
 0x139   : > { %1900 = vmatpush.bf16.msrb.mxu0 %v6138_v30  ;;  %1913 = vmatpush.bf16.msrb.mxu1 %v6150_v34 }
 0x13a   : > { %1926 = vmatpush.bf16.msrb.mxu2 %v6158_v37  ;;  %1939 = vmatpush.bf16.msrb.mxu3 %v6170_v41 }
 0x13d   : > { %1901 = vmatpush.bf16.msrb.mxu0 %v6172_v42  ;;  %1914 = vmatpush.bf16.msrb.mxu1 %v6184_v47 }
 0x13e   : > { %1927 = vmatpush.bf16.msrb.mxu2 %v6200_v53  ;;  %1940 = vmatpush.bf16.msrb.mxu3 %v6205_v56 }
 0x141   : > { %1902 = vmatpush.bf16.msrb.mxu0 %v6214_v59  ;;  %1915 = vmatpush.bf16.msrb.mxu1 %v6223_v0 }
 0x142   : > { %1928 = vmatpush.bf16.msrb.mxu2 %v6238_v12  ;;  %1941 = vmatpush.bf16.msrb.mxu3 %v6243_v16 }
 0x145   : > { %1903 = vmatpush.bf16.msrb.mxu0 %v6255_v22  ;;  %1916 = vmatpush.bf16.msrb.mxu1 %v6269_v31 }
 0x146   : > { %1929 = vmatpush.bf16.msrb.mxu2 %v6271_v32  ;;  %1942 = vmatpush.bf16.msrb.mxu3 %v6287_v40 }
 0x149   : > { %1904 = vmatpush.bf16.msrb.mxu0 %v6300_v46  ;;  %1917 = vmatpush.bf16.msrb.mxu1 %v6310_v50 }
 0x14a   : > { %1930 = vmatpush.bf16.msrb.mxu2 %v6323_v58  ;;  %1943 = vmatpush.bf16.msrb.mxu3 %v6325_v60 }
 0x14d   : > { %1905 = vmatpush.bf16.msrb.mxu0 %v6337_v8  ;;  %1918 = vmatpush.bf16.msrb.mxu1 %v6349_v21 }
 0x14e   : > { %1931 = vmatpush.bf16.msrb.mxu2 %v6351_v23  ;;  %1944 = vmatpush.bf16.msrb.mxu3 %v6369_v43 }
 0x151   : > { %1906 = vmatpush.bf16.msrb.mxu0 %v6385_v54  ;;  %1919 = vmatpush.bf16.msrb.mxu1 %v6397_v6 }
 0x152   : > { %1932 = vmatpush.bf16.msrb.mxu2 %v6411_v25  ;;  %1945 = vmatpush.bf16.msrb.mxu3 %v6423_v44  ;;  %v9726_v44 = vld [vmem:[#allocation26_spill] sm:$0xff] }
 0x155   : > { %1907 = vmatpush.bf16.msrb.mxu0 %v6425_v45  ;;  %1920 = vmatpush.bf16.msrb.mxu1 %v6440_v2  ;;  %v9725_v45 = vld [vmem:[#allocation20_spill] sm:$0xff] }
 0x156   : > { %1933 = vmatpush.bf16.msrb.mxu2 %v6443_v14  ;;  %1946 = vmatpush.bf16.msrb.mxu3 %v6447_v35  ;;  %v9723_v35 = vld [vmem:[#allocation25_spill] sm:$0xff] }
 0x1b4   : > { %v1137_v20 = vpop.f32.mrf.mxu0  ;;  %v1150_v55 = vpop.f32.mrf.mxu1 }
 0x1b5   : > { %v1184_v33 = vrot.slane %v1137_v20, 1  ;;  %v1188_v49 = vrot.slane %v1137_v20, 2  ;;  %v1192_v39 = vrot.slane %v1137_v20, 3  ;;  %v1212_v52 = vadd.f32 %v1137_v20, %v6099_v1 }
 0x1b6   : > { %v1185_v48 = vrot.slane %v1150_v55, 1  ;;  %v1189_v57 = vrot.slane %v1150_v55, 2  ;;  %v1193_v61 = vrot.slane %v1150_v55, 3  ;;  %v1213_v10 = vadd.f32 %v1150_v55, %v6102_v3 }
 0x1b7   : > { %v1216_v11 = vadd.f32 %v1184_v33, %v6549_v38  ;;  %v1220_v62 = vadd.f32 %v1188_v49, %v6109_v7  ;;  %v1224_v4 = vadd.f32 %v1192_v39, %v6115_v13  ;;  %v4840_v63 = vmul.f32 -1.442695, %v1212_v52 }
 0x1b8   : > { %v1217_v5 = vadd.f32 %v1185_v48, %v6553_v19  ;;  %v1221_v17 = vadd.f32 %v1189_v57, %v6112_v9  ;;  %v1225_v27 = vadd.f32 %v1193_v61, %v6118_v15  ;;  %v4844_v28 = vmul.f32 -1.442695, %v1213_v10 }
 0x1b9   : > { %5163 = vpow2.f32 %v4840_v63  ;;  %v4841_v29 = vmul.f32 -1.442695, %v1216_v11  ;;  %v4842_v18 = vmul.f32 -1.442695, %v1220_v62  ;;  %v4843_v20 = vmul.f32 -1.442695, %v1224_v4 }
 0x1ba   : > { %5165 = vpow2.f32 %v4844_v28  ;;  %v4845_v55 = vmul.f32 -1.442695, %v1217_v5  ;;  %v4846_v33 = vmul.f32 -1.442695, %v1221_v17  ;;  %v4847_v39 = vmul.f32 -1.442695, %v1225_v27 }
 0x1bb   : > { %5167 = vpow2.f32 %v4841_v29  ;;  %v1163_v3 = vpop.f32.mrf.mxu2  ;;  %v6563_v49 = vpop.f32.mrf.mxu3 }
 0x1bc   : > { %5169 = vpow2.f32 %v4842_v18  ;;  %v1139_v52 = vpop.f32.mrf.mxu0  ;;  %v1152_v48 = vpop.f32.mrf.mxu1 }
 0x1bd   : > { %5171 = vpow2.f32 %v4843_v20 }
 0x1be   : > { %5173 = vpow2.f32 %v4845_v55 }
 0x1bf   : > { %v5164_v57 = vpop.eup %5163  ;;  %5175 = vpow2.f32 %v4846_v33 }
 0x1c0   : > { %v5166_v61 = vpop.eup %5165  ;;  %v6565_v10 = vadd.f32 1.0, %v5164_v57  ;;  %5177 = vpow2.f32 %v4847_v39  ;;  %v1186_v57 = vrot.slane %v1163_v3, 1 }
 0x1c1   : > { %v5168_v11 = vpop.eup %5167  ;;  %v6572_v17 = vadd.f32 1.0, %v5166_v61  ;;  %v1190_v61 = vrot.slane %v1163_v3, 2 }
 0x1c2   : > { %v5170_v62 = vpop.eup %5169  ;;  %v6567_v4 = vadd.f32 1.0, %v5168_v11  ;;  %5179 = vrcp.f32 %v6565_v10  ;;  %v6613_v38 = vadd.f32 %v1186_v57, %v6196_v51  ;;  %v1253_v13 = vand.u32 2147483647, %v6565_v10 }
 0x1c3   : > { %v5172_v63 = vpop.eup %5171  ;;  %v6570_v5 = vadd.f32 1.0, %v5170_v62  ;;  %v1165_v27 = vpop.f32.mrf.mxu2  ;;  %v1194_v62 = vrot.slane %v1163_v3, 3  ;;  %v6616_v14 = vadd.f32 %v1190_v61, %v9723_v35  ;;  %v9727_v61 = vld [vmem:[#allocation37_spill] sm:$0xff]  ;;  %vm1249_vm15 = vweird.f32 %v6565_v10 }
 0x1c4   : > { %v1178_v28 = vpop.f32.mrf.mxu3  ;;  %v5174_v29 = vpop.eup %5173  ;;  %v6574_v18 = vadd.f32 1.0, %v5172_v63  ;;  %5181 = vrcp.f32 %v6567_v4  ;;  %v1214_v63 = vadd.f32 %v1163_v3, %v6127_v24  ;;  %v1215_v3 = vadd.f32 %v6563_v49, %v6130_v26 }
 0x1c5   : > { %v5176_v20 = vpop.eup %5175  ;;  %5183 = vrcp.f32 %v6570_v5  ;;  %v6578_v55 = vadd.f32 1.0, %v5174_v29  ;;  %v1187_v28 = vrot.slane %v6563_v49, 1  ;;  %v1191_v29 = vrot.slane %v6563_v49, 2 }
 0x1c6   : > { %v5178_v33 = vpop.eup %5177  ;;  %v6580_v39 = vadd.f32 1.0, %v5176_v20  ;;  %5185 = vrcp.f32 %v6572_v17  ;;  %v1195_v20 = vrot.slane %v6563_v49, 3  ;;  %v9724_v49 = vld [vmem:[#allocation35_spill] sm:$0xff]  ;;  %v6636_v51 = vmul.f32 -1.442695, %v1215_v3 }
 0x1c7   : > { %v6582_v52 = vadd.f32 1.0, %v5178_v33  ;;  %5187 = vrcp.f32 %v6574_v18  ;;  %v6621_v26 = vadd.f32 %v1194_v62, %v9724_v49  ;;  %v6625_v7 = vadd.f32 %v1187_v28, %v9725_v45 }
 0x1c8   : > { %v6585_v48 = vpop.eup %5179  ;;  %5189 = vrcp.f32 %v6578_v55  ;;  %v6634_v35 = vadd.f32 %v1195_v20, %v9727_v61  ;;  %v1255_v28 = vand.u32 2147483648, %v6565_v10  ;;  %v1346_v61 = vand.u32 2147483648, %v6578_v55 }
 0x1c9   : > { %v1245_v11 = vmul.f32 %v6585_v48, %v6565_v10  ;;  %5191 = vrcp.f32 %v6580_v39  ;;  %v1361_v45 = vand.u32 2147483648, %v6580_v39  ;;  %vm6656_vm3 = vcmp.eq.f32.partialorder %v1253_v13, 8.507059e+37 }
 0x1ca   : > { %v6592_v27 = vpop.eup %5181  ;;  %5193 = vrcp.f32 %v6582_v52  ;;  %vm1264_vm4 = vweird.f32 %v6567_v4  ;;  %vm1250_vm5 = vweird.f32 %v6585_v48  ;;  %v1256_v23 = vor.u32 1.1754944e-38, %v1255_v28 }
 0x1cb   : > { %v6598_v33 = vpop.eup %5183  ;;  %v1246_v15 = vsub.f32 1.0, %v1245_v11  ;;  %v1260_v9 = vmul.f32 %v6592_v27, %v6567_v4  ;;  %v1331_v11 = vand.u32 2147483648, %v6572_v17  ;;  %5195 = vtanh.f32 %v1214_v63  ;;  %vm6683_vm10 = vmor %vm1249_vm15, %vm1250_vm5 }
 0x1cc   : > { %v1275_v24 = vmul.f32 %v6598_v33, %v6570_v5  ;;  %v6609_v1 = vpop.eup %5185  ;;  %vm1265_vm7 = vweird.f32 %v6592_v27  ;;  %vm1325_vm8 = vweird.f32 %v6572_v17  ;;  %v6679_v28 = vor.u32 1.1754944e-38, %v1346_v61 }
 0x1cd   : > { %v1261_v19 = vsub.f32 1.0, %v1260_v9  ;;  %v6618_v2 = vpop.eup %5187  ;;  %v6628_v9 = vadd.f32 %v1191_v29, %v9726_v44  ;;  %v1247_v57 = vmul.f32 %v6585_v48, %v1246_v15  ;;  %v1268_v29 = vand.u32 2147483647, %v6567_v4  ;;  %vm6699_vm13 = vmor %vm1264_vm4, %vm1265_vm7 }
 0x1ce   : > { %v6630_v25 = vpop.eup %5189  ;;  %v1276_v49 = vsub.f32 1.0, %v1275_v24  ;;  %v1290_v15 = vmul.f32 %v6618_v2, %v6574_v18  ;;  %v1321_v63 = vmul.f32 %v6609_v1, %v6572_v17  ;;  %v6649_v20 = vor.u32 1.1754944e-38, %v1331_v11 }
 0x1cf   : > { %v6638_v62 = vpop.eup %5191  ;;  %v1262_v3 = vmul.f32 %v6592_v27, %v1261_v19  ;;  %v1336_v24 = vmul.f32 %v6630_v25, %v6578_v55  ;;  %v1376_v11 = vand.u32 2147483648, %v6582_v52  ;;  %v1248_v19 = vadd.f32 %v6585_v48, %v1247_v57 }
 0x1d0   : > { %v6643_v44 = vpop.eup %5193  ;;  %v1351_v54 = vmul.f32 %v6638_v62, %v6580_v39  ;;  %vm6668_vm6 = vcmp.eq.f32.partialorder %v1268_v29, 8.507059e+37  ;;  %v1277_v21 = vmul.f32 %v6598_v33, %v1276_v49  ;;  %v1291_v60 = vsub.f32 1.0, %v1290_v15 }
 0x1d1   : > { %v1366_v43 = vmul.f32 %v6643_v44, %v6582_v52  ;;  %v6673_v8 = vpop.eup %5195  ;;  %v1322_v58 = vsub.f32 1.0, %v1321_v63  ;;  %v1263_v50 = vadd.f32 %v6592_v27, %v1262_v3  ;;  %vm1326_vm9 = vweird.f32 %v6609_v1 }
 0x1d2   : > { %v1337_v57 = vsub.f32 1.0, %v1336_v24  ;;  %v1270_v49 = vand.u32 2147483648, %v6567_v4  ;;  %vm1340_vm11 = vweird.f32 %v6578_v55  ;;  %v1352_v15 = vsub.f32 1.0, %v1351_v54 }
 0x1d3   : > { %v6689_v63 = vor.u32 1.1754944e-38, %v1361_v45  ;;  %v6691_v3 = vor.u32 1.1754944e-38, %v1376_v11  ;;  %v1252_v61 = vsel %vm6683_vm10, %v6585_v48, %v1248_v19  ;;  %vm1355_vm12 = vweird.f32 %v6580_v39 }
 0x1d4   : > { %v1367_v10 = vsub.f32 1.0, %v1366_v43  ;;  %v1278_v46 = vadd.f32 %v6598_v33, %v1277_v21  ;;  %vm1280_vm14 = vweird.f32 %v6598_v33  ;;  %v1283_v54 = vand.u32 2147483647, %v6570_v5 }
 0x1d5   : > { %v1323_v45 = vmul.f32 %v6609_v1, %v1322_v58  ;;  %v1267_v48 = vsel %vm6699_vm13, %v6592_v27, %v1263_v50  ;;  %v1285_v43 = vand.u32 2147483648, %v6570_v5  ;;  %v1292_v4 = vmul.f32 %v6618_v2, %v1291_v60 }
 0x1d6   : > { %v1338_v11 = vmul.f32 %v6630_v25, %v1337_v57  ;;  %vm1341_vm15 = vweird.f32 %v6630_v25  ;;  %vm1370_vm4 = vweird.f32 %v6582_v52  ;;  %v1271_v21 = vor.u32 1.1754944e-38, %v1270_v49 }
 0x1d7   : > { %vm1279_vm5 = vweird.f32 %v6570_v5  ;;  %v1353_v19 = vmul.f32 %v6638_v62, %v1352_v15  ;;  %vm1356_vm7 = vweird.f32 %v6638_v62  ;;  %vm1371_vm10 = vweird.f32 %v6643_v44 }
 0x1d8   : > { %v1257_v50 = vsel %vm6656_vm3, %v1256_v23, %v1252_v61  ;;  %vm6723_vm13 = vmor %vm1279_vm5, %vm1280_vm14  ;;  %v1368_v60 = vmul.f32 %v6643_v44, %v1367_v10  ;;  %v1272_v5 = vsel %vm6668_vm6, %v1271_v21, %v1267_v48  ;;  %vm6733_vm2 = vcmp.eq.f32.partialorder %v1283_v54, 8.507059e+37 }
 0x1d9   : > { %v1282_v27 = vsel %vm6723_vm13, %v6598_v33, %v1278_v46  ;;  %v1286_v23 = vor.u32 1.1754944e-38, %v1285_v43  ;;  %v1293_v6 = vadd.f32 %v6618_v2, %v1292_v4  ;;  %vm1294_vm3 = vweird.f32 %v6574_v18  ;;  %vm6748_vm6 = vmor %vm1325_vm8, %vm1326_vm9 }
 0x1da   : > { %v1324_v29 = vadd.f32 %v6609_v1, %v1323_v45  ;;  %vm1295_vm14 = vweird.f32 %v6618_v2  ;;  %v1329_v13 = vand.u32 2147483647, %v6572_v17  ;;  %v1339_v49 = vadd.f32 %v6630_v25, %v1338_v11  ;;  %vm6760_vm5 = vmor %vm1340_vm11, %vm1341_vm15 }
 0x1db   : > { %5197 = vtanh.f32 %v6613_v38  ;;  %v1344_v33 = vand.u32 2147483647, %v6578_v55  ;;  %v1354_v15 = vadd.f32 %v6638_v62, %v1353_v19  ;;  %v4849_v61 = vmul.f32 -1.442695, %v6625_v7  ;;  %vm6772_vm8 = vmor %vm1355_vm12, %vm1356_vm7 }
 0x1dc   : > { %5199 = vpow2.f32 %v6636_v51  ;;  %v1369_v17 = vadd.f32 %v6643_v44, %v1368_v60  ;;  %v4850_v10 = vmul.f32 -1.442695, %v6628_v9  ;;  %v4851_v24 = vmul.f32 -1.442695, %v6634_v35  ;;  %vm6785_vm9 = vmor %vm1294_vm3, %vm1295_vm14 }
 0x1dd   : > { %5201 = vtanh.f32 %v6616_v14  ;;  %v1300_v51 = vand.u32 2147483648, %v6574_v18  ;;  %v1328_v55 = vsel %vm6748_vm6, %v6609_v1, %v1324_v29  ;;  %v1359_v14 = vand.u32 2147483647, %v6580_v39  ;;  %vm6798_vm11 = vmor %vm1370_vm4, %vm1371_vm10 }
 0x1de   : > { %5203 = vpow2.f32 %v4849_v61  ;;  %v1298_v9 = vand.u32 2147483647, %v6574_v18  ;;  %v1343_v54 = vsel %vm6760_vm5, %v6630_v25, %v1339_v49  ;;  %v1374_v45 = vand.u32 2147483647, %v6582_v52 }
 0x1df   : > { %5205 = vpow2.f32 %v4850_v10  ;;  %v1297_v39 = vsel %vm6785_vm9, %v6618_v2, %v1293_v6  ;;  %vm1330_vm12 = vcmp.eq.f32.partialorder %v1329_v13, 8.507059e+37  ;;  %v1358_v25 = vsel %vm6772_vm8, %v6638_v62, %v1354_v15 }
 0x1e0   : > { %5207 = vtanh.f32 %v6621_v26  ;;  %v1333_v48 = vsel %vm1330_vm12, %v6649_v20, %v1328_v55  ;;  %vm1345_vm15 = vcmp.eq.f32.partialorder %v1344_v33, 8.507059e+37  ;;  %v1373_v52 = vsel %vm6798_vm11, %v6643_v44, %v1369_v17 }
 0x1e1   : > { %v5198_v18 = vpop.eup %5197  ;;  %5209 = vpow2.f32 %v4851_v24  ;;  %v1287_v2 = vsel %vm6733_vm2, %v1286_v23, %v1282_v27  ;;  %v1301_v4 = vor.u32 1.1754944e-38, %v1300_v51  ;;  %v1348_v11 = vsel %vm1345_vm15, %v6679_v28, %v1343_v54 }
 0x1e2   : > { %v5200_v43 = vpop.eup %5199  ;;  %vm1360_vm4 = vcmp.eq.f32.partialorder %v1359_v14, 8.507059e+37  ;;  %vm1299_vm7 = vcmp.eq.f32.partialorder %v1298_v9, 8.507059e+37  ;;  %vm1375_vm10 = vcmp.eq.f32.partialorder %v1374_v45, 8.507059e+37  ;;  %v1468_v58 = vmul.f32 %v1333_v48, %v6498_v36 }
 0x1e3   : > { %v5202_v62 = vpop.eup %5201  ;;  %v1363_v26 = vsel %vm1360_vm4, %v6689_v63, %v1358_v25  ;;  %v6817_v20 = vadd.f32 1.0, %v5200_v43  ;;  %v1302_v19 = vsel %vm1299_vm7, %v1301_v4, %v1297_v39  ;;  %v1378_v44 = vsel %vm1375_vm10, %v6691_v3, %v1373_v52 }
 0x1e4   : > { %v5204_v21 = vpop.eup %5203  ;;  %v1472_v60 = vmul.f32 %v6673_v8, %v1257_v50  ;;  %v1463_v57 = vrot.slane %v6498_v36, 3  ;;  %v9750_v28 = vrot.slane %v6498_v36, 1  ;;  %v1473_v6 = vmul.f32 %v5198_v18, %v1272_v5 }
 0x1e5   : > { %v5206_v27 = vpop.eup %5205  ;;  %v6825_v29 = vadd.f32 1.0, %v5204_v21  ;;  %v9751_v13 = vrot.slane %v6498_v36, 2  ;;  %v1474_v46 = vmul.f32 %v5202_v62, %v1287_v2  ;;  %5211 = vrcp.f32 %v6817_v20  ;;  %v9757_v62 = vld [vmem:[#allocation28_spill] sm:$0xff] }
 0x1e6   : > { %v1469_v23 = vmul.f32 %v9750_v28, %v1348_v11  ;;  %v5208_v63 = vpop.eup %5207  ;;  %v6829_v33 = vadd.f32 1.0, %v5206_v27  ;;  %v1471_v15 = vmul.f32 %v1463_v57, %v1378_v44  ;;  %v6832_v8 = vadd.f32 %v1472_v60, %v1468_v58 }
 0x1e7   : > { %v1470_v49 = vmul.f32 %v9751_v13, %v1363_v26  ;;  %v5210_v3 = vpop.eup %5209  ;;  %v1475_v61 = vmul.f32 %v5208_v63, %v1302_v19  ;;  %5213 = vrcp.f32 %v6825_v29  ;;  %v1409_v17 = vand.u32 2147483647, %v6817_v20 }
 0x1e8   : > { %v6834_v50 = vadd.f32 1.0, %v5210_v3  ;;  %v6837_v5 = vadd.f32 %v1473_v6, %v1469_v23  ;;  %5215 = vrcp.f32 %v6829_v33  ;;  %v1411_v10 = vand.u32 2147483648, %v6817_v20 }
 0x1e9   : > { %v6840_v36 = vadd.f32 %v1474_v46, %v1470_v49  ;;  %v6843_v38 = vadd.f32 %v1475_v61, %v1471_v15  ;;  %v1426_v7 = vand.u32 2147483648, %v6825_v29  ;;  %vm1405_vm2 = vweird.f32 %v6817_v20 }
 0x1ea   : > { %5217 = vrcp.f32 %v6834_v50  ;;  %v1424_v14 = vand.u32 2147483647, %v6825_v29  ;;  %vm6855_vm13 = vcmp.eq.f32.partialorder %v1409_v17, 8.507059e+37  ;;  %vm1420_vm3 = vweird.f32 %v6825_v29 }
 0x1eb   : > { %5219 = vtanh.f32 %v6832_v8  ;;  %v5212_v24 = vpop.eup %5211  ;;  %v1412_v39 = vor.u32 1.1754944e-38, %v1411_v10  ;;  %vm1435_vm14 = vweird.f32 %v6829_v33  ;;  %v1427_v48 = vor.u32 1.1754944e-38, %v1426_v7 }
 0x1ec   : > { %5221 = vtanh.f32 %v6837_v5  ;;  %v1401_v55 = vmul.f32 %v5212_v24, %v6817_v20  ;;  %v1441_v52 = vand.u32 2147483648, %v6829_v33  ;;  %vm1406_vm6 = vweird.f32 %v5212_v24 }
 0x1ed   : > { %v5214_v51 = vpop.eup %5213  ;;  %5223 = vtanh.f32 %v6840_v36  ;;  %vm6865_vm5 = vcmp.eq.f32.partialorder %v1424_v14, 8.507059e+37  ;;  %v1439_v44 = vand.u32 2147483647, %v6829_v33  ;;  %v1456_v57 = vand.u32 2147483648, %v6834_v50  ;;  %vm1407_vm11 = vmor %vm1405_vm2, %vm1406_vm6 }
 0x1ee   : > { %v5216_v35 = vpop.eup %5215  ;;  %5225 = vtanh.f32 %v6843_v38  ;;  %v1416_v54 = vmul.f32 %v5214_v51, %v6825_v29  ;;  %v1402_v1 = vsub.f32 1.0, %v1401_v55  ;;  %vm1421_vm8 = vweird.f32 %v5214_v51 }
 0x1ef   : > { %v1431_v25 = vmul.f32 %v5216_v35, %v6829_v33  ;;  %vm1436_vm9 = vweird.f32 %v5216_v35  ;;  %v1454_v63 = vand.u32 2147483647, %v6834_v50  ;;  %vm1422_vm15 = vmor %vm1420_vm3, %vm1421_vm8  ;;  %v1442_v46 = vor.u32 1.1754944e-38, %v1441_v52 }
 0x1f0   : > { %v5218_v45 = vpop.eup %5217  ;;  %v1417_v18 = vsub.f32 1.0, %v1416_v54  ;;  %v1403_v4 = vmul.f32 %v5212_v24, %v1402_v1  ;;  %vm1450_vm4 = vweird.f32 %v6834_v50  ;;  %vm1437_vm7 = vmor %vm1435_vm14, %vm1436_vm9  ;;  %vm1440_vm10 = vcmp.eq.f32.partialorder %v1439_v44, 8.507059e+37  ;;  %v9761_v44 = vld [vmem:[#allocation32_spill] sm:$0xff] }
 0x1f1   : > { %v1446_v43 = vmul.f32 %v5218_v45, %v6834_v50  ;;  %v5220_v2 = vpop.eup %5219  ;;  %v1432_v11 = vsub.f32 1.0, %v1431_v25  ;;  %vm1451_vm12 = vweird.f32 %v5218_v45  ;;  %v1457_v17 = vor.u32 1.1754944e-38, %v1456_v57  ;;  %v9765_v57 = vld [vmem:[#allocation38_spill] sm:$0xff] }
 0x1f2   : > { %v5222_v26 = vpop.eup %5221  ;;  %v1418_v21 = vmul.f32 %v5214_v51, %v1417_v18  ;;  %v1404_v60 = vadd.f32 %v5212_v24, %v1403_v4  ;;  %vm1452_vm2 = vmor %vm1450_vm4, %vm1451_vm12  ;;  %vm1455_vm3 = vcmp.eq.f32.partialorder %v1454_v63, 8.507059e+37  ;;  %v9769_v63 = vld [vmem:[#allocation42_spill] sm:$0xff] }
 0x1f3   : > { %v1447_v19 = vsub.f32 1.0, %v1446_v43  ;;  %v5224_v58 = vpop.eup %5223  ;;  %v1433_v27 = vmul.f32 %v5216_v35, %v1432_v11 }
 0x1f4   : > { %v5226_v28 = vpop.eup %5225  ;;  %v1419_v23 = vadd.f32 %v5214_v51, %v1418_v21  ;;  %v1408_v13 = vsel %vm1407_vm11, %v5212_v24, %v1404_v60  ;;  %v9759_v21 = vld [vmem:[#allocation30_spill] sm:$0xff] }
 0x1f5   : > { %v1448_v6 = vmul.f32 %v5218_v45, %v1447_v19  ;;  %v1434_v49 = vadd.f32 %v5216_v35, %v1433_v27  ;;  %v1413_v3 = vsel %vm6855_vm13, %v1412_v39, %v1408_v13  ;;  %vm9756_vm13 = vcmask 1043459   ;;  %v9760_v19 = vld [vmem:[#allocation31_spill] sm:$0xff]  ;;  %v9763_v60 = vld [vmem:[#allocation34_spill] sm:$0xff]  ;;  %v9764_v27 = vld [vmem:[#allocation36_spill] sm:$0xff] }
 0x1f6   : > { %v1423_v15 = vsel %vm1422_vm15, %v5214_v51, %v1419_v23  ;;  %v1484_v10 = vmul.f32 %v5220_v2, %v1413_v3  ;;  %v9767_v23 = vld [vmem:[#allocation40_spill] sm:$0xff]  ;;  %v9770_v13 = vld [vmem:[#allocation43_spill] sm:$0xff] }
 0x1f7   : > { %v1449_v20 = vadd.f32 %v5218_v45, %v1448_v6  ;;  %v1428_v61 = vsel %vm6865_vm5, %v1427_v48, %v1423_v15  ;;  %v1438_v29 = vsel %vm1437_vm7, %v5216_v35, %v1434_v49  ;;  %v9768_v6 = vld [vmem:[#allocation41_spill] sm:$0xff]  ;;  %v9771_v49 = vld [vmem:[#allocation44_spill] sm:$0xff] }
 0x1f8   : > { %v1443_v24 = vsel %vm1440_vm10, %v1442_v46, %v1438_v29  ;;  %v1485_v50 = vmul.f32 %v5222_v26, %v1428_v61  ;;  %1488 = vst [vmem:[#allocation2 + $0x10] sm:$0x1] %v1484_v10  ;;  %v1492_v33 = vpack.c.bf16 %v1484_v10, %v1484_v10  ;;  %v9758_v26 = vld [vmem:[#allocation29_spill] sm:$0xff] }
 0x1f9   : > { %v1453_v7 = vsel %vm1452_vm2, %v5218_v45, %v1449_v20  ;;  %v1486_v14 = vmul.f32 %v5224_v58, %v1443_v24  ;;  %v9762_v58 = vld [vmem:[#allocation33_spill] sm:$0xff] }
 0x1fa   : > { %v1458_v55 = vsel %vm1455_vm3, %v1457_v17, %v1453_v7  ;;  %1489 = vst [vmem:[#allocation2] sm:$0x1] %v1485_v50  ;;  %v1493_v9 = vpack.c.bf16 %v1485_v50, %v1485_v50  ;;  %v1500_v25 = vunpack.c.l.b16 %v1492_v33  ;;  %v9772_v46 = vld [vmem:[#allocation45_spill] sm:$0xff]  ;;  %v9773_v17 = vld [vmem:[#allocation46_spill] sm:$0xff] }
 0x1fb   : > { %v1487_v51 = vmul.f32 %v5226_v28, %v1458_v55  ;;  %1490 = vst [vmem:[#allocation2 + $0x18] sm:$0x1] %v1486_v14  ;;  %v1494_v54 = vpack.c.bf16 %v1486_v14, %v1486_v14  ;;  %v9766_v28 = vld [vmem:[#allocation39_spill] sm:$0xff] }
 0x1fc   : > { %v1501_v39 = vunpack.c.l.b16 %v1493_v9  ;;  %v9774_v55 = vld [vmem:[#allocation47_spill] sm:$0xff]  ;;  %v9776_v9 = vld [vmem:[#allocation13_spill] sm:$0xff] }
 0x1fd   : > { %1491 = vst [vmem:[#allocation2 + $0x8] sm:$0x1] %v1487_v51  ;;  %v1495_v1 = vpack.c.bf16 %v1487_v51, %v1487_v51  ;;  %v1502_v35 = vunpack.c.l.b16 %v1494_v54  ;;  %v9775_v51 = vld [vmem:[#allocation11_spill] sm:$0xff] }
 0x1fe   : > { %v1504_v48 = vrot.slane %v1501_v39, 7 }
 0x1ff   : > { %v1503_v18 = vunpack.c.l.b16 %v1495_v1  ;;  %v1506_v52 = vrot.slane %v1502_v35, 6  ;;  %v9777_v1 = vld [vmem:[#allocation15_spill] sm:$0xff] }
 0x200   : > { %v1505_v45 = vsel %vm842_vm0, %v1504_v48, %v1500_v25  ;;  %v9778_v25 = vld [vmem:[#allocation12_spill] sm:$0xff]  ;;  %v9779_v48 = vld [vmem:[#allocation14_spill] sm:$0xff] }
 0x201   : > { %v1508_v43 = vrot.slane %v1503_v18, 5  ;;  %v1507_v2 = vsel %vm9676_vm1, %v1506_v52, %v1505_v45  ;;  %v9780_v45 = vld [vmem:[#allocation16_spill] sm:$0xff] }
 0x203   : > { %v1509_v4 = vsel %vm9756_vm13, %v1508_v43, %v1507_v2 }
 0x204   : > { %v1510_v11 = vpack.c.b16 %v1509_v4, %v1509_v4 }
 0x206   : > { %1520 = vmatmul.bf16.vlgmr.msra.gmra.mxu0 %v1510_v11  ;;  %1533 = vmatmul.bf16.vlgmr.msra.gmra.mxu1 %v1510_v11 }
 0x207   : > { %1546 = vmatmul.bf16.vlgmr.msra.gmra.mxu2 %v1510_v11  ;;  %1559 = vmatmul.bf16.vlgmr.msra.gmra.mxu3 %v1510_v11 }
 0x208   : > { %2288 = vmatpush.bf16.msra.mxu0 %v6138_v30  ;;  %2301 = vmatpush.bf16.msra.mxu1 %v6150_v34 }
 0x209   : > { %2314 = vmatpush.bf16.msra.mxu2 %v6158_v37  ;;  %2327 = vmatpush.bf16.msra.mxu3 %v6170_v41 }
 0x20c   : > { %2289 = vmatpush.bf16.msra.mxu0 %v6172_v42  ;;  %2302 = vmatpush.bf16.msra.mxu1 %v6184_v47 }
 0x20d   : > { %2315 = vmatpush.bf16.msra.mxu2 %v6200_v53  ;;  %2328 = vmatpush.bf16.msra.mxu3 %v6205_v56 }
 0x210   : > { %2290 = vmatpush.bf16.msra.mxu0 %v6214_v59  ;;  %2303 = vmatpush.bf16.msra.mxu1 %v6223_v0 }
 0x211   : > { %2316 = vmatpush.bf16.msra.mxu2 %v6238_v12  ;;  %2329 = vmatpush.bf16.msra.mxu3 %v6243_v16 }
 0x214   : > { %2291 = vmatpush.bf16.msra.mxu0 %v6255_v22  ;;  %2304 = vmatpush.bf16.msra.mxu1 %v6269_v31 }
 0x215   : > { %2317 = vmatpush.bf16.msra.mxu2 %v6271_v32  ;;  %2330 = vmatpush.bf16.msra.mxu3 %v6287_v40 }
 0x218   : > { %2292 = vmatpush.bf16.msra.mxu0 %v9757_v62  ;;  %2305 = vmatpush.bf16.msra.mxu1 %v9758_v26 }
 0x219   : > { %2318 = vmatpush.bf16.msra.mxu2 %v9759_v21  ;;  %2331 = vmatpush.bf16.msra.mxu3 %v9760_v19 }
 0x21c   : > { %2293 = vmatpush.bf16.msra.mxu0 %v9761_v44  ;;  %2306 = vmatpush.bf16.msra.mxu1 %v9762_v58 }
 0x21d   : > { %2319 = vmatpush.bf16.msra.mxu2 %v9763_v60  ;;  %2332 = vmatpush.bf16.msra.mxu3 %v9764_v27 }
 0x220   : > { %2294 = vmatpush.bf16.msra.mxu0 %v9765_v57  ;;  %2307 = vmatpush.bf16.msra.mxu1 %v9766_v28  ;;  %v9786_v28 = vld [vmem:[#allocation20_spill] sm:$0xff] }
 0x221   : > { %2320 = vmatpush.bf16.msra.mxu2 %v9767_v23  ;;  %2333 = vmatpush.bf16.msra.mxu3 %v9768_v6  ;;  %v9784_v6 = vld [vmem:[#allocation25_spill] sm:$0xff] }
 0x224   : > { %2295 = vmatpush.bf16.msra.mxu0 %v9769_v63  ;;  %2308 = vmatpush.bf16.msra.mxu1 %v9770_v13  ;;  %v9783_v13 = vld [vmem:[#allocation19_spill] sm:$0xff] }
 0x225   : > { %2321 = vmatpush.bf16.msra.mxu2 %v9771_v49  ;;  %2334 = vmatpush.bf16.msra.mxu3 %v9772_v46 }
 0x283   : > { %v1521_v3 = vpop.f32.mrf.mxu0  ;;  %v1534_v15 = vpop.f32.mrf.mxu1 }
 0x284   : > { %v1568_v20 = vrot.slane %v1521_v3, 7  ;;  %v1572_v61 = vrot.slane %v1521_v3, 1  ;;  %v1576_v29 = vrot.slane %v1521_v3, 2  ;;  %v1600_v10 = vadd.f32 %v1521_v3, %v9773_v17 }
 0x285   : > { %v1569_v24 = vrot.slane %v1534_v15, 7  ;;  %v1573_v7 = vrot.slane %v1534_v15, 1  ;;  %v1577_v50 = vrot.slane %v1534_v15, 2  ;;  %v1601_v14 = vadd.f32 %v1534_v15, %v9774_v55 }
 0x286   : > { %v1596_v33 = vadd.f32 %v1568_v20, %v9775_v51  ;;  %v1604_v54 = vadd.f32 %v1572_v61, %v9776_v9  ;;  %v1608_v39 = vadd.f32 %v1576_v29, %v9777_v1  ;;  %v4853_v35 = vmul.f32 -1.442695, %v1600_v10  ;;  %v9785_v51 = vld [vmem:[#allocation35_spill] sm:$0xff] }
 0x287   : > { %v1597_v18 = vadd.f32 %v1569_v24, %v9778_v25  ;;  %v1605_v52 = vadd.f32 %v1573_v7, %v9779_v48  ;;  %v1609_v43 = vadd.f32 %v1577_v50, %v9780_v45  ;;  %v4857_v2 = vmul.f32 -1.442695, %v1601_v14  ;;  %v9782_v25 = vld [vmem:[#allocation18_spill] sm:$0xff] }
 0x288   : > { %v4852_v4 = vmul.f32 -1.442695, %v1596_v33  ;;  %5227 = vpow2.f32 %v4853_v35  ;;  %v4854_v11 = vmul.f32 -1.442695, %v1604_v54  ;;  %v4855_v3 = vmul.f32 -1.442695, %v1608_v39 }
 0x289   : > { %v4856_v17 = vmul.f32 -1.442695, %v1597_v18  ;;  %5229 = vpow2.f32 %v4857_v2  ;;  %v4858_v15 = vmul.f32 -1.442695, %v1605_v52  ;;  %v4859_v29 = vmul.f32 -1.442695, %v1609_v43 }
 0x28a   : > { %5231 = vpow2.f32 %v4852_v4  ;;  %v1547_v20 = vpop.f32.mrf.mxu2  ;;  %v6927_v61 = vpop.f32.mrf.mxu3 }
 0x28b   : > { %5233 = vpow2.f32 %v4854_v11  ;;  %v1523_v10 = vpop.f32.mrf.mxu0  ;;  %v1536_v24 = vpop.f32.mrf.mxu1  ;;  %v1579_v55 = vrot.slane %v6927_v61, 2  ;;  %v6977_v63 = vadd.f32 %v1547_v20, %v9783_v13 }
 0x28c   : > { %5235 = vpow2.f32 %v4855_v3  ;;  %v1570_v10 = vrot.slane %v1547_v20, 7 }
 0x28d   : > { %5237 = vpow2.f32 %v4856_v17 }
 0x28e   : > { %v5228_v7 = vpop.eup %5227  ;;  %5239 = vpow2.f32 %v4858_v15 }
 0x28f   : > { %v5230_v50 = vpop.eup %5229  ;;  %v6929_v14 = vadd.f32 1.0, %v5228_v7  ;;  %5241 = vpow2.f32 %v4859_v29  ;;  %v1571_v7 = vrot.slane %v6927_v61, 7 }
 0x290   : > { %v5232_v33 = vpop.eup %5231  ;;  %v6936_v52 = vadd.f32 1.0, %v5230_v50 }
 0x291   : > { %v5234_v54 = vpop.eup %5233  ;;  %v6931_v39 = vadd.f32 1.0, %v5232_v33  ;;  %5243 = vrcp.f32 %v6929_v14  ;;  %v1599_v1 = vadd.f32 %v1571_v7, %v9782_v25  ;;  %v1652_v25 = vand.u32 2147483647, %v6929_v14 }
 0x292   : > { %v5236_v35 = vpop.eup %5235  ;;  %v6934_v18 = vadd.f32 1.0, %v5234_v54  ;;  %v1549_v43 = vpop.f32.mrf.mxu2  ;;  %v1730_v49 = vand.u32 2147483648, %v6936_v52  ;;  %vm1648_vm6 = vweird.f32 %v6929_v14  ;;  %v1654_v44 = vand.u32 2147483648, %v6929_v14 }
 0x293   : > { %v1562_v2 = vpop.f32.mrf.mxu3  ;;  %v5238_v17 = vpop.eup %5237  ;;  %5245 = vrcp.f32 %v6931_v39  ;;  %v6939_v11 = vadd.f32 1.0, %v5236_v35  ;;  %v1574_v35 = vrot.slane %v1547_v20, 1  ;;  %v7001_v13 = vmul.f32 -1.442695, %v1599_v1 }
 0x294   : > { %v5240_v4 = vpop.eup %5239  ;;  %5247 = vrcp.f32 %v6934_v18  ;;  %v6942_v3 = vadd.f32 1.0, %v5238_v17  ;;  %v1578_v2 = vrot.slane %v1547_v20, 2  ;;  %v9781_v17 = vld [vmem:[#allocation17_spill] sm:$0xff]  ;;  %v1637_v20 = vand.u32 2147483647, %v6931_v39 }
 0x295   : > { %v5242_v15 = vpop.eup %5241  ;;  %v6944_v29 = vadd.f32 1.0, %v5240_v4  ;;  %5249 = vrcp.f32 %v6936_v52  ;;  %v1598_v4 = vadd.f32 %v1570_v10, %v9781_v17  ;;  %v6980_v23 = vadd.f32 %v1574_v35, %v9784_v6  ;;  %v9788_v35 = vld [vmem:[#allocation37_spill] sm:$0xff] }
 0x296   : > { %v6946_v24 = vadd.f32 1.0, %v5242_v15  ;;  %5251 = vrcp.f32 %v6942_v3  ;;  %v1575_v15 = vrot.slane %v6927_v61, 1  ;;  %v6990_v10 = vadd.f32 %v6927_v61, %v9786_v28 }
 0x297   : > { %v6950_v50 = vpop.eup %5243  ;;  %5253 = vrcp.f32 %v6939_v11  ;;  %v6999_v6 = vadd.f32 %v1579_v55, %v9788_v35  ;;  %vm1633_vm14 = vweird.f32 %v6931_v39  ;;  %v1639_v1 = vand.u32 2147483648, %v6931_v39 }
 0x298   : > { %v1644_v54 = vmul.f32 %v6950_v50, %v6929_v14  ;;  %5255 = vrcp.f32 %v6944_v29  ;;  %v1715_v35 = vand.u32 2147483648, %v6942_v3  ;;  %vm7021_vm5 = vcmp.eq.f32.partialorder %v1652_v25, 8.507059e+37 }
 0x299   : > { %v6957_v43 = vpop.eup %5245  ;;  %5257 = vrcp.f32 %v6946_v24  ;;  %v1745_v60 = vand.u32 2147483648, %v6944_v29  ;;  %vm7029_vm8 = vcmp.eq.f32.partialorder %v1637_v20, 8.507059e+37  ;;  %vm1649_vm9 = vweird.f32 %v6950_v50 }
 0x29a   : > { %v6962_v45 = vpop.eup %5247  ;;  %v1629_v33 = vmul.f32 %v6957_v43, %v6931_v39  ;;  %v1645_v48 = vsub.f32 1.0, %v1644_v54  ;;  %v6985_v54 = vadd.f32 %v1578_v2, %v9785_v51  ;;  %5259 = vtanh.f32 %v1598_v4  ;;  %vm7056_vm7 = vmor %vm1648_vm6, %vm1649_vm9 }
 0x29b   : > { %v1659_v9 = vmul.f32 %v6962_v45, %v6934_v18  ;;  %v6973_v17 = vpop.eup %5249  ;;  %v7012_v4 = vor.u32 1.1754944e-38, %v1730_v49  ;;  %vm1634_vm11 = vweird.f32 %v6957_v43  ;;  %v1640_v20 = vor.u32 1.1754944e-38, %v1639_v1 }
 0x29c   : > { %v1630_v46 = vsub.f32 1.0, %v1629_v33  ;;  %v6982_v7 = vpop.eup %5251  ;;  %v9787_v33 = vld [vmem:[#allocation26_spill] sm:$0xff]  ;;  %v1646_v61 = vmul.f32 %v6950_v50, %v1645_v48  ;;  %v1720_v48 = vmul.f32 %v6973_v17, %v6936_v52  ;;  %v7043_v31 = vor.u32 1.1754944e-38, %v1715_v35  ;;  %vm7065_vm2 = vmor %vm1633_vm14, %vm1634_vm11 }
 0x29d   : > { %v6993_v57 = vadd.f32 %v1575_v15, %v9787_v33  ;;  %v6995_v27 = vpop.eup %5253  ;;  %v1660_v51 = vsub.f32 1.0, %v1659_v9  ;;  %v1705_v33 = vmul.f32 %v6982_v7, %v6942_v3  ;;  %vm1724_vm12 = vweird.f32 %v6936_v52 }
 0x29e   : > { %v7003_v2 = vpop.eup %5255  ;;  %v1631_v55 = vmul.f32 %v6957_v43, %v1630_v46  ;;  %v1674_v9 = vmul.f32 %v6995_v27, %v6939_v11  ;;  %v1760_v46 = vand.u32 2147483648, %v6946_v24  ;;  %v1647_v25 = vadd.f32 %v6950_v50, %v1646_v61 }
 0x29f   : > { %v7008_v15 = vpop.eup %5257  ;;  %v1735_v49 = vmul.f32 %v7003_v2, %v6944_v29  ;;  %v1661_v21 = vmul.f32 %v6962_v45, %v1660_v51  ;;  %v1706_v62 = vsub.f32 1.0, %v1705_v33  ;;  %v1721_v22 = vsub.f32 1.0, %v1720_v48 }
 0x2a0   : > { %v1750_v19 = vmul.f32 %v7008_v15, %v6946_v24  ;;  %v7039_v26 = vpop.eup %5259  ;;  %v1632_v40 = vadd.f32 %v6957_v43, %v1631_v55  ;;  %v1675_v32 = vsub.f32 1.0, %v1674_v9  ;;  %vm1725_vm15 = vweird.f32 %v6973_v17 }
 0x2a1   : > { %vm1709_vm4 = vweird.f32 %v6942_v3  ;;  %v1736_v61 = vsub.f32 1.0, %v1735_v49  ;;  %v7048_v51 = vor.u32 1.1754944e-38, %v1745_v60  ;;  %v7050_v16 = vor.u32 1.1754944e-38, %v1760_v46 }
 0x2a2   : > { %v1655_v35 = vor.u32 1.1754944e-38, %v1654_v44  ;;  %vm1739_vm10 = vweird.f32 %v6944_v29  ;;  %v1751_v55 = vsub.f32 1.0, %v1750_v19  ;;  %v1651_v14 = vsel %vm7056_vm7, %v6950_v50, %v1647_v25 }
 0x2a3   : > { %v1662_v1 = vadd.f32 %v6962_v45, %v1661_v21  ;;  %vm1664_vm3 = vweird.f32 %v6962_v45  ;;  %v1707_v44 = vmul.f32 %v6982_v7, %v1706_v62  ;;  %v1636_v19 = vsel %vm7065_vm2, %v6957_v43, %v1632_v40 }
 0x2a4   : > { %v1667_v39 = vand.u32 2147483647, %v6934_v18  ;;  %v1669_v9 = vand.u32 2147483648, %v6934_v18  ;;  %vm1710_vm13 = vweird.f32 %v6982_v7  ;;  %v1722_v48 = vmul.f32 %v6973_v17, %v1721_v22 }
 0x2a5   : > { %vm1754_vm14 = vweird.f32 %v6946_v24  ;;  %vm1663_vm6 = vweird.f32 %v6934_v18  ;;  %v1676_v21 = vmul.f32 %v6995_v27, %v1675_v32  ;;  %v1737_v62 = vmul.f32 %v7003_v2, %v1736_v61 }
 0x2a6   : > { %vm1740_vm9 = vweird.f32 %v7003_v2  ;;  %vm1755_vm11 = vweird.f32 %v7008_v15  ;;  %v1656_v40 = vsel %vm7021_vm5, %v1655_v35, %v1651_v14  ;;  %vm7090_vm7 = vmor %vm1663_vm6, %vm1664_vm3  ;;  %v1752_v22 = vmul.f32 %v7008_v15, %v1751_v55 }
 0x2a7   : > { %v1641_v18 = vsel %vm7029_vm8, %v1640_v20, %v1636_v19  ;;  %v1666_v32 = vsel %vm7090_vm7, %v6962_v45, %v1662_v1  ;;  %vm1678_vm2 = vweird.f32 %v6939_v11  ;;  %vm7101_vm1 = vcmp.eq.f32.partialorder %v1667_v39, 8.507059e+37  ;;  %vm7115_vm8 = vmor %vm1724_vm12, %vm1725_vm15 }
 0x2a8   : > { %v1670_v28 = vor.u32 1.1754944e-38, %v1669_v9  ;;  %vm1679_vm5 = vweird.f32 %v6995_v27  ;;  %v1708_v49 = vadd.f32 %v6982_v7, %v1707_v44  ;;  %v1677_v46 = vadd.f32 %v6995_v27, %v1676_v21  ;;  %vm7127_vm3 = vmor %vm1709_vm4, %vm1710_vm13 }
 0x2a9   : > { %v1713_v58 = vand.u32 2147483647, %v6942_v3  ;;  %v1723_v25 = vadd.f32 %v6973_v17, %v1722_v48  ;;  %5261 = vtanh.f32 %v6977_v63  ;;  %v1728_v20 = vand.u32 2147483647, %v6936_v52  ;;  %vm7139_vm12 = vmor %vm1739_vm10, %vm1740_vm9 }
 0x2aa   : > { %v1738_v61 = vadd.f32 %v7003_v2, %v1737_v62  ;;  %5263 = vpow2.f32 %v7001_v13  ;;  %v4861_v33 = vmul.f32 -1.442695, %v6990_v10  ;;  %v1753_v35 = vadd.f32 %v7008_v15, %v1752_v22  ;;  %vm7152_vm15 = vmor %vm1678_vm2, %vm1679_vm5 }
 0x2ab   : > { %5265 = vtanh.f32 %v6980_v23  ;;  %v4862_v52 = vmul.f32 -1.442695, %v6993_v57  ;;  %v4863_v55 = vmul.f32 -1.442695, %v6999_v6  ;;  %v1684_v3 = vand.u32 2147483648, %v6939_v11  ;;  %vm7166_vm4 = vmor %vm1754_vm14, %vm1755_vm11 }
 0x2ac   : > { %v1712_v10 = vsel %vm7127_vm3, %v6982_v7, %v1708_v49  ;;  %v1743_v23 = vand.u32 2147483647, %v6944_v29  ;;  %5267 = vpow2.f32 %v4861_v33  ;;  %v1682_v6 = vand.u32 2147483647, %v6939_v11 }
 0x2ad   : > { %v1727_v60 = vsel %vm7115_vm8, %v6973_v17, %v1723_v25  ;;  %v1758_v14 = vand.u32 2147483647, %v6946_v24  ;;  %5269 = vtanh.f32 %v6985_v54  ;;  %v1681_v11 = vsel %vm7152_vm15, %v6995_v27, %v1677_v46 }
 0x2ae   : > { %vm1714_vm10 = vcmp.eq.f32.partialorder %v1713_v58, 8.507059e+37  ;;  %v1742_v17 = vsel %vm7139_vm12, %v7003_v2, %v1738_v61  ;;  %5271 = vpow2.f32 %v4862_v52  ;;  %vm1729_vm13 = vcmp.eq.f32.partialorder %v1728_v20, 8.507059e+37 }
 0x2af   : > { %v5262_v7 = vpop.eup %5261  ;;  %v1717_v54 = vsel %vm1714_vm10, %v7043_v31, %v1712_v10  ;;  %v1757_v24 = vsel %vm7166_vm4, %v7008_v15, %v1753_v35  ;;  %5273 = vpow2.f32 %v4863_v55  ;;  %v1671_v44 = vsel %vm7101_vm1, %v1670_v28, %v1666_v32 }
 0x2b0   : > { %v5264_v1 = vpop.eup %5263  ;;  %v1685_v27 = vor.u32 1.1754944e-38, %v1684_v3  ;;  %v1732_v19 = vsel %vm1729_vm13, %v7012_v4, %v1727_v60  ;;  %vm1744_vm14 = vcmp.eq.f32.partialorder %v1743_v23, 8.507059e+37  ;;  %vm1683_vm6 = vcmp.eq.f32.partialorder %v1682_v6, 8.507059e+37 }
 0x2b1   : > { %v5266_v39 = vpop.eup %5265  ;;  %v1747_v2 = vsel %vm1744_vm14, %v7048_v51, %v1742_v17  ;;  %vm1759_vm9 = vcmp.eq.f32.partialorder %v1758_v14, 8.507059e+37  ;;  %v7184_v31 = vadd.f32 1.0, %v5264_v1  ;;  %v9811_v21 = vrot.slane %v6832_v8, 7  ;;  %v9825_v1 = vld [vmem:[#allocation28_spill] sm:$0xff] }
 0x2b2   : > { %v5268_v9 = vpop.eup %5267  ;;  %v1686_v48 = vsel %vm1683_vm6, %v1685_v27, %v1681_v11  ;;  %v1762_v15 = vsel %vm1759_vm9, %v7050_v16, %v1757_v24  ;;  %v1860_v50 = vmul.f32 %v7039_v26, %v1641_v18  ;;  %v1851_v4 = vrot.slane %v6843_v38, 7 }
 0x2b3   : > { %v1856_v62 = vmul.f32 %v9811_v21, %v1717_v54  ;;  %v5270_v22 = vpop.eup %5269  ;;  %v9812_v32 = vrot.slane %v6837_v5, 7  ;;  %v1861_v28 = vmul.f32 %v5262_v7, %v1656_v40  ;;  %v7193_v51 = vadd.f32 1.0, %v5268_v9 }
 0x2b4   : > { %v5272_v49 = vpop.eup %5271  ;;  %v9813_v46 = vrot.slane %v6840_v36, 7  ;;  %v1862_v25 = vmul.f32 %v5266_v39, %v1671_v44  ;;  %v1859_v45 = vmul.f32 %v1851_v4, %v1762_v15  ;;  %v1863_v8 = vmul.f32 %v5270_v22, %v1686_v48 }
 0x2b5   : > { %v1857_v43 = vmul.f32 %v9812_v32, %v1732_v19  ;;  %v5274_v16 = vpop.eup %5273  ;;  %v7197_v20 = vadd.f32 1.0, %v5272_v49  ;;  %5275 = vrcp.f32 %v7184_v31  ;;  %v7200_v26 = vadd.f32 %v1860_v50, %v1856_v62 }
 0x2b6   : > { %v1858_v58 = vmul.f32 %v9813_v46, %v1747_v2  ;;  %v7202_v38 = vadd.f32 1.0, %v5274_v16  ;;  %5277 = vrcp.f32 %v7193_v51  ;;  %v7211_v40 = vadd.f32 %v1863_v8, %v1859_v45 }
 0x2b7   : > { %v7205_v5 = vadd.f32 %v1861_v28, %v1857_v43  ;;  %5279 = vrcp.f32 %v7197_v20  ;;  %v1795_v18 = vand.u32 2147483648, %v7184_v31  ;;  %v1808_v61 = vand.u32 2147483647, %v7193_v51 }
 0x2b8   : > { %v7208_v36 = vadd.f32 %v1862_v25, %v1858_v58  ;;  %5281 = vrcp.f32 %v7202_v38  ;;  %v1810_v63 = vand.u32 2147483648, %v7193_v51  ;;  %vm1789_vm1 = vweird.f32 %v7184_v31 }
 0x2b9   : > { %5283 = vtanh.f32 %v7200_v26  ;;  %v1793_v55 = vand.u32 2147483647, %v7184_v31  ;;  %v1796_v3 = vor.u32 1.1754944e-38, %v1795_v18  ;;  %vm1804_vm11 = vweird.f32 %v7193_v51 }
 0x2ba   : > { %5285 = vtanh.f32 %v7205_v5  ;;  %vm7225_vm7 = vcmp.eq.f32.partialorder %v1808_v61, 8.507059e+37  ;;  %vm1819_vm2 = vweird.f32 %v7197_v20  ;;  %v1811_v29 = vor.u32 1.1754944e-38, %v1810_v63 }
 0x2bb   : > { %v5276_v33 = vpop.eup %5275  ;;  %5287 = vtanh.f32 %v7208_v36  ;;  %v1825_v11 = vand.u32 2147483648, %v7197_v20  ;;  %vm7233_vm8 = vcmp.eq.f32.partialorder %v1793_v55, 8.507059e+37  ;;  %v1823_v39 = vand.u32 2147483647, %v7197_v20 }
 0x2bc   : > { %v5278_v35 = vpop.eup %5277  ;;  %v1785_v52 = vmul.f32 %v5276_v33, %v7184_v31  ;;  %5289 = vtanh.f32 %v7211_v40  ;;  %vm1790_vm5 = vweird.f32 %v5276_v33  ;;  %v1840_v15 = vand.u32 2147483648, %v7202_v38 }
 0x2bd   : > { %v5280_v13 = vpop.eup %5279  ;;  %v1800_v10 = vmul.f32 %v5278_v35, %v7193_v51  ;;  %vm1805_vm3 = vweird.f32 %v5278_v35  ;;  %vm1791_vm15 = vmor %vm1789_vm1, %vm1790_vm5  ;;  %v1838_v22 = vand.u32 2147483647, %v7202_v38  ;;  %v1826_v43 = vor.u32 1.1754944e-38, %v1825_v11  ;;  %v9820_v11 = vld [vmem:[#allocation21_spill] sm:$0xff] }
 0x2be   : > { %v5282_v23 = vpop.eup %5281  ;;  %v1786_v57 = vsub.f32 1.0, %v1785_v52  ;;  %v1815_v60 = vmul.f32 %v5280_v13, %v7197_v20  ;;  %vm1820_vm12 = vweird.f32 %v5280_v13  ;;  %vm1806_vm10 = vmor %vm1804_vm11, %vm1805_vm3  ;;  %vm1834_vm13 = vweird.f32 %v7202_v38 }
 0x2bf   : > { %v1801_v14 = vsub.f32 1.0, %v1800_v10  ;;  %v1830_v17 = vmul.f32 %v5282_v23, %v7202_v38  ;;  %v5284_v7 = vpop.eup %5283  ;;  %vm1835_vm4 = vweird.f32 %v5282_v23  ;;  %vm1821_vm14 = vmor %vm1819_vm2, %vm1820_vm12  ;;  %vm1824_vm6 = vcmp.eq.f32.partialorder %v1823_v39, 8.507059e+37  ;;  %v9829_v39 = vld [vmem:[#allocation32_spill] sm:$0xff] }
 0x2c0   : > { %v1787_v54 = vmul.f32 %v5276_v33, %v1786_v57  ;;  %v1816_v24 = vsub.f32 1.0, %v1815_v60  ;;  %v5286_v44 = vpop.eup %5285  ;;  %vm1836_vm9 = vmor %vm1834_vm13, %vm1835_vm4  ;;  %v1841_v58 = vor.u32 1.1754944e-38, %v1840_v15  ;;  %vm1839_vm1 = vcmp.eq.f32.partialorder %v1838_v22, 8.507059e+37  ;;  %v9833_v15 = vld [vmem:[#allocation38_spill] sm:$0xff] }
 0x2c1   : > { %v1802_v27 = vmul.f32 %v5278_v35, %v1801_v14  ;;  %v1831_v19 = vsub.f32 1.0, %v1830_v17  ;;  %v5288_v2 = vpop.eup %5287  ;;  %vm9818_vm11 = vcmask 1042434   ;;  %v9821_v17 = vld [vmem:[#allocation22_spill] sm:$0xff] }
 0x2c2   : > { %v1817_v9 = vmul.f32 %v5280_v13, %v1816_v24  ;;  %v1788_v48 = vadd.f32 %v5276_v33, %v1787_v54  ;;  %v5290_v21 = vpop.eup %5289  ;;  %v9823_v54 = vld [vmem:[#allocation24_spill] sm:$0xff]  ;;  %v9824_v24 = vld [vmem:[#allocation27_spill] sm:$0xff]  ;;  %v9837_v22 = vld [vmem:[#allocation42_spill] sm:$0xff] }
 0x2c3   : > { %v1803_v62 = vadd.f32 %v5278_v35, %v1802_v27  ;;  %v1832_v50 = vmul.f32 %v5282_v23, %v1831_v19  ;;  %v9827_v27 = vld [vmem:[#allocation30_spill] sm:$0xff]  ;;  %v9828_v19 = vld [vmem:[#allocation31_spill] sm:$0xff] }
 0x2c4   : > { %v1792_v4 = vsel %vm1791_vm15, %v5276_v33, %v1788_v48  ;;  %v1818_v32 = vadd.f32 %v5280_v13, %v1817_v9  ;;  %v9831_v9 = vld [vmem:[#allocation34_spill] sm:$0xff]  ;;  %v9832_v48 = vld [vmem:[#allocation36_spill] sm:$0xff] }
 0x2c5   : > { %v1797_v28 = vsel %vm7233_vm8, %v1796_v3, %v1792_v4  ;;  %v1807_v49 = vsel %vm1806_vm10, %v5278_v35, %v1803_v62  ;;  %v1833_v31 = vadd.f32 %v5282_v23, %v1832_v50  ;;  %v9835_v62 = vld [vmem:[#allocation40_spill] sm:$0xff]  ;;  %v9836_v50 = vld [vmem:[#allocation41_spill] sm:$0xff]  ;;  %v9838_v4 = vld [vmem:[#allocation43_spill] sm:$0xff] }
 0x2c6   : > { %v1812_v46 = vsel %vm7225_vm7, %v1811_v29, %v1807_v49  ;;  %v1822_v51 = vsel %vm1821_vm14, %v5280_v13, %v1818_v32  ;;  %v1872_v25 = vmul.f32 %v5284_v7, %v1797_v28  ;;  %vm9819_vm7 = vcmask 1043459   ;;  %v9822_v7 = vld [vmem:[#allocation23_spill] sm:$0xff]  ;;  %v9839_v32 = vld [vmem:[#allocation44_spill] sm:$0xff] }
 0x2c7   : > { %v1827_v16 = vsel %vm1824_vm6, %v1826_v43, %v1822_v51  ;;  %v1837_v45 = vsel %vm1836_vm9, %v5282_v23, %v1833_v31  ;;  %v1873_v8 = vmul.f32 %v5286_v44, %v1812_v46  ;;  %v9826_v44 = vld [vmem:[#allocation29_spill] sm:$0xff] }
 0x2c8   : > { %v1842_v38 = vsel %vm1839_vm1, %v1841_v58, %v1837_v45  ;;  %v1874_v18 = vmul.f32 %v5288_v2, %v1827_v16  ;;  %1876 = vst [vmem:[#allocation2 + $0x10] sm:$0x2] %v1872_v25  ;;  %v1880_v61 = vpack.c.bf16 %v1872_v25, %v1872_v25  ;;  %v9830_v2 = vld [vmem:[#allocation33_spill] sm:$0xff] }
 0x2c9   : > { %v1875_v33 = vmul.f32 %v5290_v21, %v1842_v38  ;;  %1877 = vst [vmem:[#allocation2] sm:$0x2] %v1873_v8  ;;  %v1881_v20 = vpack.c.bf16 %v1873_v8, %v1873_v8  ;;  %v9834_v21 = vld [vmem:[#allocation39_spill] sm:$0xff]  ;;  %v9840_v43 = vld [vmem:[#allocation45_spill] sm:$0xff]  ;;  %v9842_v38 = vld [vmem:[#allocation14_spill] sm:$0xff] }
 0x2ca   : > { %1878 = vst [vmem:[#allocation2 + $0x18] sm:$0x2] %v1874_v18  ;;  %v1882_v63 = vpack.c.bf16 %v1874_v18, %v1874_v18  ;;  %v1888_v35 = vunpack.c.l.b16 %v1880_v61  ;;  %v9841_v58 = vld [vmem:[#allocation13_spill] sm:$0xff]  ;;  %v9843_v61 = vld [vmem:[#allocation11_spill] sm:$0xff] }
 0x2cb   : > { %1879 = vst [vmem:[#allocation2 + $0x8] sm:$0x2] %v1875_v33  ;;  %v1883_v52 = vpack.c.bf16 %v1875_v33, %v1875_v33  ;;  %v1889_v55 = vunpack.c.l.b16 %v1881_v20  ;;  %v9844_v20 = vld [vmem:[#allocation46_spill] sm:$0xff] }
 0x2cc   : > { %v1890_v13 = vunpack.c.l.b16 %v1882_v63  ;;  %v1892_v3 = vrot.slane %v1888_v35, 1  ;;  %v9845_v35 = vld [vmem:[#allocation15_spill] sm:$0xff] }
 0x2cd   : > { %v1891_v10 = vunpack.c.l.b16 %v1883_v52 }
 0x2ce   : > { %v1893_v23 = vsel %vm842_vm0, %v1889_v55, %v1892_v3  ;;  %v1894_v57 = vrot.slane %v1890_v13, 7  ;;  %v9846_v13 = vld [vmem:[#allocation12_spill] sm:$0xff] }
 0x2cf   : > { %v1896_v6 = vrot.slane %v1891_v10, 6  ;;  %v9847_v10 = vld [vmem:[#allocation47_spill] sm:$0xff] }
 0x2d0   : > { %v1895_v60 = vsel %vm9818_vm11, %v1894_v57, %v1893_v23  ;;  %v9848_v57 = vld [vmem:[#allocation16_spill] sm:$0xff] }
 0x2d1   : > { %v1897_v14 = vsel %vm9819_vm7, %v1896_v6, %v1895_v60 }
 0x2d2   : > { %v1898_v29 = vpack.c.b16 %v1897_v14, %v1897_v14 }
 0x2d4   : > { %1908 = vmatmul.bf16.vlgmr.msrb.gmra.mxu0 %v1898_v29  ;;  %1921 = vmatmul.bf16.vlgmr.msrb.gmra.mxu1 %v1898_v29 }
 0x2d5   : > { %1934 = vmatmul.bf16.vlgmr.msrb.gmra.mxu2 %v1898_v29  ;;  %1947 = vmatmul.bf16.vlgmr.msrb.gmra.mxu3 %v1898_v29 }
 0x2d6   : > { %2676 = vmatpush.bf16.msrb.mxu0 %v6138_v30  ;;  %2689 = vmatpush.bf16.msrb.mxu1 %v6150_v34 }
 0x2d7   : > { %2702 = vmatpush.bf16.msrb.mxu2 %v6158_v37  ;;  %2715 = vmatpush.bf16.msrb.mxu3 %v6170_v41 }
 0x2da   : > { %2677 = vmatpush.bf16.msrb.mxu0 %v6172_v42  ;;  %2690 = vmatpush.bf16.msrb.mxu1 %v6184_v47 }
 0x2db   : > { %2703 = vmatpush.bf16.msrb.mxu2 %v6200_v53  ;;  %2716 = vmatpush.bf16.msrb.mxu3 %v6205_v56 }
 0x2de   : > { %2678 = vmatpush.bf16.msrb.mxu0 %v6214_v59  ;;  %2691 = vmatpush.bf16.msrb.mxu1 %v6223_v0 }
 0x2df   : > { %2704 = vmatpush.bf16.msrb.mxu2 %v6238_v12  ;;  %2717 = vmatpush.bf16.msrb.mxu3 %v9820_v11 }
 0x2e2   : > { %2679 = vmatpush.bf16.msrb.mxu0 %v9821_v17  ;;  %2692 = vmatpush.bf16.msrb.mxu1 %v9822_v7 }
 0x2e3   : > { %2705 = vmatpush.bf16.msrb.mxu2 %v9823_v54  ;;  %2718 = vmatpush.bf16.msrb.mxu3 %v9824_v24 }
 0x2e6   : > { %2680 = vmatpush.bf16.msrb.mxu0 %v9825_v1  ;;  %2693 = vmatpush.bf16.msrb.mxu1 %v9826_v44 }
 0x2e7   : > { %2706 = vmatpush.bf16.msrb.mxu2 %v9827_v27  ;;  %2719 = vmatpush.bf16.msrb.mxu3 %v9828_v19 }
 0x2ea   : > { %2681 = vmatpush.bf16.msrb.mxu0 %v9829_v39  ;;  %2694 = vmatpush.bf16.msrb.mxu1 %v9830_v2 }
 0x2eb   : > { %2707 = vmatpush.bf16.msrb.mxu2 %v9831_v9  ;;  %2720 = vmatpush.bf16.msrb.mxu3 %v9832_v48 }
 0x2ee   : > { %2682 = vmatpush.bf16.msrb.mxu0 %v9833_v15  ;;  %2695 = vmatpush.bf16.msrb.mxu1 %v9834_v21  ;;  %v9853_v21 = vld [vmem:[#allocation35_spill] sm:$0xff] }
 0x2ef   : > { %2708 = vmatpush.bf16.msrb.mxu2 %v9835_v62  ;;  %2721 = vmatpush.bf16.msrb.mxu3 %v9836_v50 }
 0x2f2   : > { %2683 = vmatpush.bf16.msrb.mxu0 %v9837_v22  ;;  %2696 = vmatpush.bf16.msrb.mxu1 %v9838_v4  ;;  %v9852_v4 = vld [vmem:[#allocation25_spill] sm:$0xff] }
 0x2f3   : > { %2709 = vmatpush.bf16.msrb.mxu2 %v9839_v32  ;;  %2722 = vmatpush.bf16.msrb.mxu3 %v9840_v43  ;;  %v9851_v43 = vld [vmem:[#allocation19_spill] sm:$0xff] }
 0x351   : > { %v1909_v28 = vpop.f32.mrf.mxu0  ;;  %v1922_v49 = vpop.f32.mrf.mxu1 }
 0x352   : > { %v1956_v31 = vrot.slane %v1909_v28, 6  ;;  %v1960_v46 = vrot.slane %v1909_v28, 7  ;;  %v1964_v51 = vrot.slane %v1909_v28, 1  ;;  %v1992_v25 = vadd.f32 %v1909_v28, %v9841_v58 }
 0x353   : > { %v1957_v16 = vrot.slane %v1922_v49, 6  ;;  %v1961_v45 = vrot.slane %v1922_v49, 7  ;;  %v1965_v8 = vrot.slane %v1922_v49, 1  ;;  %v1993_v18 = vadd.f32 %v1922_v49, %v9842_v38  ;;  %v9849_v38 = vld [vmem:[#allocation17_spill] sm:$0xff] }
 0x354   : > { %v1984_v33 = vadd.f32 %v1956_v31, %v9843_v61  ;;  %v1988_v63 = vadd.f32 %v1960_v46, %v9844_v20  ;;  %v1996_v52 = vadd.f32 %v1964_v51, %v9845_v35  ;;  %v4866_v55 = vmul.f32 -1.442695, %v1992_v25  ;;  %v9850_v61 = vld [vmem:[#allocation18_spill] sm:$0xff] }
 0x355   : > { %v1985_v3 = vadd.f32 %v1957_v16, %v9846_v13  ;;  %v1989_v23 = vadd.f32 %v1961_v45, %v9847_v10  ;;  %v1997_v6 = vadd.f32 %v1965_v8, %v9848_v57  ;;  %v4870_v60 = vmul.f32 -1.442695, %v1993_v18 }
 0x356   : > { %v4864_v14 = vmul.f32 -1.442695, %v1984_v33  ;;  %v4865_v29 = vmul.f32 -1.442695, %v1988_v63  ;;  %5291 = vpow2.f32 %v4866_v55  ;;  %v4867_v28 = vmul.f32 -1.442695, %v1996_v52 }
 0x357   : > { %v4868_v58 = vmul.f32 -1.442695, %v1985_v3  ;;  %5293 = vpow2.f32 %v4870_v60  ;;  %v4869_v49 = vmul.f32 -1.442695, %v1989_v23  ;;  %v4871_v51 = vmul.f32 -1.442695, %v1997_v6 }
 0x358   : > { %5295 = vpow2.f32 %v4864_v14  ;;  %v1935_v31 = vpop.f32.mrf.mxu2  ;;  %v7295_v46 = vpop.f32.mrf.mxu3 }
 0x359   : > { %5297 = vpow2.f32 %v4865_v29  ;;  %v1911_v25 = vpop.f32.mrf.mxu0  ;;  %v1924_v16 = vpop.f32.mrf.mxu1  ;;  %v1967_v20 = vrot.slane %v7295_v46, 1  ;;  %v7346_v22 = vadd.f32 %v1935_v31, %v9852_v4  ;;  %v9855_v4 = vld [vmem:[#allocation26_spill] sm:$0xff] }
 0x35a   : > { %5299 = vpow2.f32 %v4867_v28  ;;  %v1958_v16 = vrot.slane %v1935_v31, 6 }
 0x35b   : > { %5301 = vpow2.f32 %v4868_v58 }
 0x35c   : > { %v5292_v45 = vpop.eup %5291  ;;  %5303 = vpow2.f32 %v4869_v49  ;;  %v1986_v10 = vadd.f32 %v1958_v16, %v9849_v38  ;;  %v7364_v16 = vadd.f32 %v7295_v46, %v9855_v4 }
 0x35d   : > { %v5294_v8 = vpop.eup %5293  ;;  %v7297_v18 = vadd.f32 1.0, %v5292_v45  ;;  %5305 = vpow2.f32 %v4871_v51  ;;  %v1959_v45 = vrot.slane %v7295_v46, 6 }
 0x35e   : > { %v5296_v33 = vpop.eup %5295  ;;  %v7312_v51 = vadd.f32 1.0, %v5294_v8  ;;  %v1966_v8 = vrot.slane %v1935_v31, 1 }
 0x35f   : > { %v5298_v63 = vpop.eup %5297  ;;  %v7299_v52 = vadd.f32 1.0, %v5296_v33  ;;  %5307 = vrcp.f32 %v7297_v18  ;;  %v1987_v57 = vadd.f32 %v1959_v45, %v9850_v61  ;;  %v9854_v45 = vld [vmem:[#allocation20_spill] sm:$0xff]  ;;  %vm2051_vm8 = vweird.f32 %v7297_v18 }
 0x360   : > { %v5300_v55 = vpop.eup %5299  ;;  %v7301_v3 = vadd.f32 1.0, %v5298_v63  ;;  %v1937_v23 = vpop.f32.mrf.mxu2  ;;  %v1962_v63 = vrot.slane %v1935_v31, 7  ;;  %v2133_v62 = vand.u32 2147483648, %v7312_v51  ;;  %v7353_v15 = vadd.f32 %v1966_v8, %v9853_v21  ;;  %v9856_v21 = vld [vmem:[#allocation37_spill] sm:$0xff] }
 0x361   : > { %v1950_v6 = vpop.f32.mrf.mxu3  ;;  %v5302_v60 = vpop.eup %5301  ;;  %v7304_v14 = vadd.f32 1.0, %v5300_v55  ;;  %5309 = vrcp.f32 %v7299_v52  ;;  %v2027_v31 = vand.u32 2147483648, %v7299_v52  ;;  %v7370_v48 = vadd.f32 %v1967_v20, %v9856_v21 }
 0x362   : > { %v5304_v58 = vpop.eup %5303  ;;  %5311 = vrcp.f32 %v7301_v3  ;;  %v7308_v29 = vadd.f32 1.0, %v5302_v60  ;;  %v1963_v6 = vrot.slane %v7295_v46, 7  ;;  %v7343_v32 = vadd.f32 %v1962_v63, %v9851_v43 }
 0x363   : > { %v5306_v28 = vpop.eup %5305  ;;  %v7310_v49 = vadd.f32 1.0, %v5304_v58  ;;  %5313 = vrcp.f32 %v7304_v14  ;;  %v2025_v63 = vand.u32 2147483647, %v7299_v52  ;;  %vm2021_vm2 = vweird.f32 %v7299_v52 }
 0x364   : > { %v7315_v25 = vadd.f32 1.0, %v5306_v28  ;;  %5315 = vrcp.f32 %v7308_v29  ;;  %v7356_v61 = vadd.f32 %v1963_v6, %v9854_v45  ;;  %v7372_v6 = vmul.f32 -1.442695, %v1987_v57 }
 0x365   : > { %v7319_v33 = vpop.eup %5307  ;;  %5317 = vrcp.f32 %v7310_v49  ;;  %v7385_v8 = vor.u32 1.1754944e-38, %v2133_v62  ;;  %vm2036_vm5 = vweird.f32 %v7301_v3  ;;  %v2103_v57 = vand.u32 2147483648, %v7308_v29 }
 0x366   : > { %5319 = vrcp.f32 %v7312_v51  ;;  %v2047_v23 = vmul.f32 %v7319_v33, %v7297_v18  ;;  %vm7393_vm3 = vcmp.eq.f32.partialorder %v2025_v63, 8.507059e+37  ;;  %v2028_v21 = vor.u32 1.1754944e-38, %v2027_v31 }
 0x367   : > { %v7322_v55 = vpop.eup %5309  ;;  %5321 = vrcp.f32 %v7315_v25  ;;  %v2148_v2 = vand.u32 2147483648, %v7315_v25  ;;  %vm2127_vm4 = vweird.f32 %v7312_v51  ;;  %v2040_v24 = vand.u32 2147483647, %v7301_v3 }
 0x368   : > { %v7327_v60 = vpop.eup %5311  ;;  %v2017_v28 = vmul.f32 %v7322_v55, %v7299_v52  ;;  %5323 = vtanh.f32 %v1986_v10  ;;  %v2048_v43 = vsub.f32 1.0, %v2047_v23  ;;  %vm2022_vm12 = vweird.f32 %v7322_v55 }
 0x369   : > { %v2032_v13 = vmul.f32 %v7327_v60, %v7301_v3  ;;  %v7340_v35 = vpop.eup %5313  ;;  %vm2037_vm15 = vweird.f32 %v7327_v60  ;;  %v2042_v54 = vand.u32 2147483648, %v7301_v3  ;;  %vm2097_vm10 = vweird.f32 %v7308_v29  ;;  %vm7420_vm14 = vmor %vm2021_vm2, %vm2022_vm12 }
 0x36a   : > { %v2018_v58 = vsub.f32 1.0, %v2017_v28  ;;  %v7349_v38 = vpop.eup %5315  ;;  %v2062_v23 = vmul.f32 %v7340_v35, %v7304_v14  ;;  %v2049_v39 = vmul.f32 %v7319_v33, %v2048_v43  ;;  %v7411_v43 = vor.u32 1.1754944e-38, %v2103_v57  ;;  %vm7431_vm9 = vmor %vm2036_vm5, %vm2037_vm15 }
 0x36b   : > { %v2033_v50 = vsub.f32 1.0, %v2032_v13  ;;  %v7358_v28 = vpop.eup %5317  ;;  %v2093_v9 = vmul.f32 %v7349_v38, %v7308_v29  ;;  %vm2112_vm6 = vweird.f32 %v7310_v49  ;;  %vm2052_vm1 = vweird.f32 %v7319_v33 }
 0x36c   : > { %v7366_v13 = vpop.eup %5319  ;;  %v2019_v10 = vmul.f32 %v7322_v55, %v2018_v58  ;;  %v2108_v20 = vmul.f32 %v7358_v28, %v7310_v49  ;;  %v2118_v58 = vand.u32 2147483648, %v7310_v49  ;;  %v2063_v1 = vsub.f32 1.0, %v2062_v23  ;;  %vm7454_vm15 = vmor %vm2051_vm8, %vm2052_vm1 }
 0x36d   : > { %v7374_v45 = vpop.eup %5321  ;;  %v2034_v46 = vmul.f32 %v7327_v60, %v2033_v50  ;;  %v2123_v4 = vmul.f32 %v7366_v13, %v7312_v51  ;;  %v2094_v27 = vsub.f32 1.0, %v2093_v9  ;;  %vm2128_vm13 = vweird.f32 %v7366_v13 }
 0x36e   : > { %v2138_v62 = vmul.f32 %v7374_v45, %v7315_v25  ;;  %v7402_v19 = vpop.eup %5323  ;;  %v2020_v44 = vadd.f32 %v7322_v55, %v2019_v10  ;;  %v2109_v31 = vsub.f32 1.0, %v2108_v20  ;;  %v7413_v7 = vor.u32 1.1754944e-38, %v2118_v58 }
 0x36f   : > { %v2035_v63 = vadd.f32 %v7327_v60, %v2034_v46  ;;  %v2124_v9 = vsub.f32 1.0, %v2123_v4  ;;  %v7425_v23 = vor.u32 1.1754944e-38, %v2148_v2  ;;  %v2050_v20 = vadd.f32 %v7319_v33, %v2049_v39 }
 0x370   : > { %v2139_v46 = vsub.f32 1.0, %v2138_v62  ;;  %v2095_v52 = vmul.f32 %v7349_v38, %v2094_v27  ;;  %v2024_v57 = vsel %vm7420_vm14, %v7322_v55, %v2020_v44  ;;  %v2057_v3 = vand.u32 2147483648, %v7297_v18 }
 0x371   : > { %v2039_v2 = vsel %vm7431_vm9, %v7327_v60, %v2035_v63  ;;  %v2110_v58 = vmul.f32 %v7358_v28, %v2109_v31  ;;  %vm2142_vm11 = vweird.f32 %v7315_v25  ;;  %vm2041_vm7 = vcmp.eq.f32.partialorder %v2040_v24, 8.507059e+37 }
 0x372   : > { %v2043_v39 = vor.u32 1.1754944e-38, %v2042_v54  ;;  %v2064_v62 = vmul.f32 %v7340_v35, %v2063_v1  ;;  %vm2098_vm2 = vweird.f32 %v7349_v38  ;;  %vm2113_vm5 = vweird.f32 %v7358_v28 }
 0x373   : > { %v2125_v44 = vmul.f32 %v7366_v13, %v2124_v9  ;;  %vm2143_vm12 = vweird.f32 %v7374_v45  ;;  %v2140_v55 = vmul.f32 %v7374_v45, %v2139_v46  ;;  %v2029_v54 = vsel %vm7393_vm3, %v2028_v21, %v2024_v57  ;;  %vm7481_vm3 = vmor %vm2127_vm4, %vm2128_vm13 }
 0x374   : > { %v2044_v24 = vsel %vm2041_vm7, %v2043_v39, %v2039_v2  ;;  %v2054_v1 = vsel %vm7454_vm15, %v7319_v33, %v2050_v20  ;;  %v9865_v60 = vand.u32 2147483647, %v7297_v18  ;;  %v2058_v31 = vor.u32 1.1754944e-38, %v2057_v3  ;;  %vm7493_vm1 = vmor %vm2097_vm10, %vm2098_vm2 }
 0x375   : > { %vm2066_vm8 = vweird.f32 %v7304_v14  ;;  %vm2067_vm9 = vweird.f32 %v7340_v35  ;;  %v2096_v9 = vadd.f32 %v7349_v38, %v2095_v52  ;;  %v2065_v21 = vadd.f32 %v7340_v35, %v2064_v62  ;;  %vm7505_vm4 = vmor %vm2112_vm6, %vm2113_vm5 }
 0x376   : > { %vm7466_vm14 = vcmp.eq.f32.partialorder %v9865_v60, 8.507059e+37  ;;  %v2101_v50 = vand.u32 2147483647, %v7308_v29  ;;  %v2111_v10 = vadd.f32 %v7358_v28, %v2110_v58  ;;  %5325 = vtanh.f32 %v7343_v32  ;;  %vm7518_vm10 = vmor %vm2066_vm8, %vm2067_vm9 }
 0x377   : > { %v2116_v33 = vand.u32 2147483647, %v7310_v49  ;;  %v2126_v46 = vadd.f32 %v7366_v13, %v2125_v44  ;;  %5327 = vpow2.f32 %v7372_v6  ;;  %v4873_v4 = vmul.f32 -1.442695, %v7356_v61  ;;  %vm7532_vm13 = vmor %vm2142_vm11, %vm2143_vm12 }
 0x378   : > { %v2141_v20 = vadd.f32 %v7374_v45, %v2140_v55  ;;  %5329 = vtanh.f32 %v7346_v22  ;;  %v4874_v52 = vmul.f32 -1.442695, %v7364_v16  ;;  %v4875_v57 = vmul.f32 -1.442695, %v7370_v48 }
 0x379   : > { %v2072_v29 = vand.u32 2147483648, %v7304_v14  ;;  %v2100_v6 = vsel %vm7493_vm1, %v7349_v38, %v2096_v9  ;;  %v2131_v22 = vand.u32 2147483647, %v7312_v51  ;;  %5331 = vpow2.f32 %v4873_v4 }
 0x37a   : > { %v2070_v49 = vand.u32 2147483647, %v7304_v14  ;;  %v2115_v16 = vsel %vm7505_vm4, %v7358_v28, %v2111_v10  ;;  %v2146_v2 = vand.u32 2147483647, %v7315_v25  ;;  %5333 = vtanh.f32 %v7353_v15 }
 0x37b   : > { %v2069_v14 = vsel %vm7518_vm10, %v7340_v35, %v2065_v21  ;;  %vm2102_vm6 = vcmp.eq.f32.partialorder %v2101_v50, 8.507059e+37  ;;  %v2130_v51 = vsel %vm7481_vm3, %v7366_v13, %v2126_v46  ;;  %5335 = vpow2.f32 %v4874_v52 }
 0x37c   : > { %v5326_v28 = vpop.eup %5325  ;;  %v2105_v15 = vsel %vm2102_vm6, %v7411_v43, %v2100_v6  ;;  %vm2117_vm7 = vcmp.eq.f32.partialorder %v2116_v33, 8.507059e+37  ;;  %v2145_v25 = vsel %vm7532_vm13, %v7374_v45, %v2141_v20  ;;  %5337 = vpow2.f32 %v4875_v57 }
 0x37d   : > { %v5328_v3 = vpop.eup %5327  ;;  %v2059_v58 = vsel %vm7466_vm14, %v2058_v31, %v2054_v1  ;;  %v2073_v35 = vor.u32 1.1754944e-38, %v2072_v29  ;;  %v2120_v39 = vsel %vm2117_vm7, %v7413_v7, %v2115_v16  ;;  %vm2132_vm11 = vcmp.eq.f32.partialorder %v2131_v22, 8.507059e+37 }
 0x37e   : > { %v5330_v62 = vpop.eup %5329  ;;  %vm2071_vm2 = vcmp.eq.f32.partialorder %v2070_v49, 8.507059e+37  ;;  %v2135_v13 = vsel %vm2132_vm11, %v7385_v8, %v2130_v51  ;;  %vm2147_vm5 = vcmp.eq.f32.partialorder %v2146_v2, 8.507059e+37  ;;  %v7550_v43 = vadd.f32 1.0, %v5328_v3 }
 0x37f   : > { %v5332_v44 = vpop.eup %5331  ;;  %v2074_v27 = vsel %vm2071_vm2, %v2073_v35, %v2069_v14  ;;  %v2150_v45 = vsel %vm2147_vm5, %v7425_v23, %v2145_v25  ;;  %v9878_v55 = vrot.slane %v7200_v26, 7  ;;  %v2248_v1 = vmul.f32 %v7402_v19, %v2029_v54  ;;  %v9890_v35 = vld [vmem:[#allocation28_spill] sm:$0xff] }
 0x380   : > { %v5334_v63 = vpop.eup %5333  ;;  %v2239_v7 = vrot.slane %v7211_v40, 7  ;;  %v9879_v31 = vrot.slane %v7205_v5, 7  ;;  %v2249_v21 = vmul.f32 %v5326_v28, %v2044_v24  ;;  %v7559_v8 = vadd.f32 1.0, %v5332_v44 }
 0x381   : > { %v2244_v60 = vmul.f32 %v9878_v55, %v2105_v15  ;;  %v5336_v50 = vpop.eup %5335  ;;  %v9880_v10 = vrot.slane %v7208_v36, 7  ;;  %v2250_v33 = vmul.f32 %v5330_v62, %v2059_v58  ;;  %v2251_v26 = vmul.f32 %v5334_v63, %v2074_v27 }
 0x382   : > { %v2245_v9 = vmul.f32 %v9879_v31, %v2120_v39  ;;  %v5338_v23 = vpop.eup %5337  ;;  %v2247_v46 = vmul.f32 %v2239_v7, %v2150_v45  ;;  %v7563_v4 = vadd.f32 1.0, %v5336_v50  ;;  %5339 = vrcp.f32 %v7550_v43 }
 0x383   : > { %v2246_v18 = vmul.f32 %v9880_v10, %v2135_v13  ;;  %v7566_v19 = vadd.f32 %v2248_v1, %v2244_v60  ;;  %v7568_v40 = vadd.f32 1.0, %v5338_v23  ;;  %5341 = vrcp.f32 %v7559_v8 }
 0x384   : > { %v7571_v5 = vadd.f32 %v2249_v21, %v2245_v9  ;;  %5343 = vrcp.f32 %v7563_v4  ;;  %v7577_v54 = vadd.f32 %v2251_v26, %v2247_v46  ;;  %v2183_v24 = vand.u32 2147483648, %v7550_v43 }
 0x385   : > { %v7574_v36 = vadd.f32 %v2250_v33, %v2246_v18  ;;  %5345 = vrcp.f32 %v7568_v40  ;;  %v2181_v20 = vand.u32 2147483647, %v7550_v43  ;;  %v2198_v52 = vand.u32 2147483648, %v7559_v8 }
 0x386   : > { %5347 = vtanh.f32 %v7566_v19  ;;  %vm2177_vm12 = vweird.f32 %v7550_v43  ;;  %v2196_v29 = vand.u32 2147483647, %v7559_v8  ;;  %v2184_v22 = vor.u32 1.1754944e-38, %v2183_v24 }
 0x387   : > { %5349 = vtanh.f32 %v7571_v5  ;;  %vm2192_vm15 = vweird.f32 %v7559_v8  ;;  %vm2207_vm14 = vweird.f32 %v7563_v4  ;;  %v2213_v38 = vand.u32 2147483648, %v7563_v4 }
 0x388   : > { %v5340_v32 = vpop.eup %5339  ;;  %5351 = vtanh.f32 %v7574_v36  ;;  %v2199_v51 = vor.u32 1.1754944e-38, %v2198_v52  ;;  %vm7595_vm8 = vcmp.eq.f32.partialorder %v2181_v20, 8.507059e+37  ;;  %vm7599_vm3 = vcmp.eq.f32.partialorder %v2196_v29, 8.507059e+37 }
 0x389   : > { %v5342_v57 = vpop.eup %5341  ;;  %v2173_v61 = vmul.f32 %v5340_v32, %v7550_v43  ;;  %5353 = vtanh.f32 %v7577_v54  ;;  %vm2178_vm9 = vweird.f32 %v5340_v32  ;;  %v2211_v44 = vand.u32 2147483647, %v7563_v4 }
 0x38a   : > { %v5344_v6 = vpop.eup %5343  ;;  %v2188_v48 = vmul.f32 %v5342_v57, %v7559_v8  ;;  %vm2193_vm1 = vweird.f32 %v5342_v57  ;;  %v2228_v60 = vand.u32 2147483648, %v7568_v40  ;;  %vm2179_vm10 = vmor %vm2177_vm12, %vm2178_vm9  ;;  %v2226_v31 = vand.u32 2147483647, %v7568_v40 }
 0x38b   : > { %v5346_v49 = vpop.eup %5345  ;;  %v2174_v16 = vsub.f32 1.0, %v2173_v61  ;;  %v2203_v2 = vmul.f32 %v5344_v6, %v7563_v4  ;;  %vm2208_vm4 = vweird.f32 %v5344_v6  ;;  %vm2194_vm6 = vmor %vm2192_vm15, %vm2193_vm1  ;;  %v2214_v9 = vor.u32 1.1754944e-38, %v2213_v38 }
 0x38c   : > { %v2189_v14 = vsub.f32 1.0, %v2188_v48  ;;  %v2218_v28 = vmul.f32 %v5346_v49, %v7568_v40  ;;  %v5348_v25 = vpop.eup %5347  ;;  %vm2223_vm13 = vweird.f32 %v5346_v49  ;;  %vm2222_vm7 = vweird.f32 %v7568_v40  ;;  %vm2209_vm11 = vmor %vm2207_vm14, %vm2208_vm4 }
 0x38d   : > { %v2175_v3 = vmul.f32 %v5340_v32, %v2174_v16  ;;  %v2204_v58 = vsub.f32 1.0, %v2203_v2  ;;  %v5350_v39 = vpop.eup %5349  ;;  %vm2212_vm2 = vcmp.eq.f32.partialorder %v2211_v44, 8.507059e+37  ;;  %vm2224_vm5 = vmor %vm2222_vm7, %vm2223_vm13  ;;  %v2229_v8 = vor.u32 1.1754944e-38, %v2228_v60  ;;  %v9894_v44 = vld [vmem:[#allocation32_spill] sm:$0xff]  ;;  %v9898_v60 = vld [vmem:[#allocation38_spill] sm:$0xff] }
 0x38e   : > { %v2190_v62 = vmul.f32 %v5342_v57, %v2189_v14  ;;  %v2219_v13 = vsub.f32 1.0, %v2218_v28  ;;  %v5352_v27 = vpop.eup %5351  ;;  %vm2227_vm12 = vcmp.eq.f32.partialorder %v2226_v31, 8.507059e+37  ;;  %vm9885_vm15 = vcmask 1042434   ;;  %v9902_v31 = vld [vmem:[#allocation42_spill] sm:$0xff] }
 0x38f   : > { %v2205_v45 = vmul.f32 %v5344_v6, %v2204_v58  ;;  %v2176_v55 = vadd.f32 %v5340_v32, %v2175_v3  ;;  %v5354_v1 = vpop.eup %5353  ;;  %vm9886_vm14 = vcmask 1043459   ;;  %v9888_v3 = vld [vmem:[#allocation24_spill] sm:$0xff]  ;;  %v9889_v58 = vld [vmem:[#allocation27_spill] sm:$0xff] }
 0x390   : > { %v2191_v63 = vadd.f32 %v5342_v57, %v2190_v62  ;;  %v2220_v7 = vmul.f32 %v5346_v49, %v2219_v13  ;;  %v9892_v62 = vld [vmem:[#allocation30_spill] sm:$0xff]  ;;  %v9893_v13 = vld [vmem:[#allocation31_spill] sm:$0xff] }
 0x391   : > { %v2180_v21 = vsel %vm2179_vm10, %v5340_v32, %v2176_v55  ;;  %v2206_v50 = vadd.f32 %v5344_v6, %v2205_v45  ;;  %v9896_v45 = vld [vmem:[#allocation34_spill] sm:$0xff]  ;;  %v9897_v55 = vld [vmem:[#allocation36_spill] sm:$0xff] }
 0x392   : > { %v2185_v43 = vsel %vm7595_vm8, %v2184_v22, %v2180_v21  ;;  %v2195_v10 = vsel %vm2194_vm6, %v5342_v57, %v2191_v63  ;;  %v2221_v18 = vadd.f32 %v5346_v49, %v2220_v7  ;;  %v9900_v63 = vld [vmem:[#allocation40_spill] sm:$0xff]  ;;  %v9901_v7 = vld [vmem:[#allocation41_spill] sm:$0xff] }
 0x393   : > { %v2200_v33 = vsel %vm7599_vm3, %v2199_v51, %v2195_v10  ;;  %v2210_v23 = vsel %vm2209_vm11, %v5344_v6, %v2206_v50  ;;  %v2260_v46 = vmul.f32 %v5348_v25, %v2185_v43  ;;  %v9887_v25 = vld [vmem:[#allocation23_spill] sm:$0xff]  ;;  %v9904_v21 = vld [vmem:[#allocation44_spill] sm:$0xff]  ;;  %v9905_v50 = vld [vmem:[#allocation45_spill] sm:$0xff] }
 0x394   : > { %v2215_v26 = vsel %vm2212_vm2, %v2214_v9, %v2210_v23  ;;  %v2225_v24 = vsel %vm2224_vm5, %v5346_v49, %v2221_v18  ;;  %v2261_v40 = vmul.f32 %v5350_v39, %v2200_v33  ;;  %v9891_v39 = vld [vmem:[#allocation29_spill] sm:$0xff]  ;;  %v9903_v9 = vld [vmem:[#allocation43_spill] sm:$0xff] }
 0x395   : > { %v2230_v32 = vsel %vm2227_vm12, %v2229_v8, %v2225_v24  ;;  %v2262_v4 = vmul.f32 %v5352_v27, %v2215_v26  ;;  %2264 = vst [vmem:[#allocation2 + $0x10] sm:$0x4] %v2260_v46  ;;  %v2268_v20 = vpack.c.bf16 %v2260_v46, %v2260_v46  ;;  %v9895_v27 = vld [vmem:[#allocation33_spill] sm:$0xff]  ;;  %v9906_v8 = vld [vmem:[#allocation15_spill] sm:$0xff] }
 0x396   : > { %v2263_v52 = vmul.f32 %v5354_v1, %v2230_v32  ;;  %2265 = vst [vmem:[#allocation2] sm:$0x4] %v2261_v40  ;;  %v2269_v57 = vpack.c.bf16 %v2261_v40, %v2261_v40  ;;  %v9899_v1 = vld [vmem:[#allocation39_spill] sm:$0xff]  ;;  %v9907_v32 = vld [vmem:[#allocation16_spill] sm:$0xff] }
 0x397   : > { %2266 = vst [vmem:[#allocation2 + $0x18] sm:$0x4] %v2262_v4  ;;  %v2270_v61 = vpack.c.bf16 %v2262_v4, %v2262_v4  ;;  %v2276_v29 = vunpack.c.l.b16 %v2268_v20  ;;  %v9908_v20 = vld [vmem:[#allocation11_spill] sm:$0xff] }
 0x398   : > { %2267 = vst [vmem:[#allocation2 + $0x8] sm:$0x4] %v2263_v52  ;;  %v2271_v22 = vpack.c.bf16 %v2263_v52, %v2263_v52  ;;  %v2277_v6 = vunpack.c.l.b16 %v2269_v57  ;;  %v9909_v57 = vld [vmem:[#allocation46_spill] sm:$0xff] }
 0x399   : > { %v2280_v48 = vrot.slane %v2276_v29, 2  ;;  %v2278_v38 = vunpack.c.l.b16 %v2270_v61  ;;  %v9910_v29 = vld [vmem:[#allocation13_spill] sm:$0xff] }
 0x39a   : > { %v2279_v16 = vunpack.c.l.b16 %v2271_v22  ;;  %v2281_v2 = vrot.slane %v2277_v6, 1 }
 0x39c   : > { %v2282_v49 = vsel %vm842_vm0, %v2281_v2, %v2280_v48  ;;  %v2284_v14 = vrot.slane %v2279_v16, 7  ;;  %v9911_v48 = vld [vmem:[#allocation12_spill] sm:$0xff]  ;;  %v9912_v2 = vld [vmem:[#allocation47_spill] sm:$0xff] }
 0x39d   : > { %v2283_v51 = vsel %vm9885_vm15, %v2278_v38, %v2282_v49  ;;  %v9913_v49 = vld [vmem:[#allocation14_spill] sm:$0xff] }
 0x39e   : > { %v2285_v28 = vsel %vm9886_vm14, %v2284_v14, %v2283_v51 }
 0x39f   : > { %v2286_v15 = vpack.c.b16 %v2285_v28, %v2285_v28 }
 0x3a1   : > { %2296 = vmatmul.bf16.vlgmr.msra.gmra.mxu0 %v2286_v15  ;;  %2309 = vmatmul.bf16.vlgmr.msra.gmra.mxu1 %v2286_v15 }
 0x3a2   : > { %2322 = vmatmul.bf16.vlgmr.msra.gmra.mxu2 %v2286_v15  ;;  %2335 = vmatmul.bf16.vlgmr.msra.gmra.mxu3 %v2286_v15 }
 0x3a3   : > { %3069 = vmatpush.bf16.msra.mxu0 %v6138_v30  ;;  %3082 = vmatpush.bf16.msra.mxu1 %v6150_v34 }
 0x3a4   : > { %3095 = vmatpush.bf16.msra.mxu2 %v6158_v37  ;;  %3108 = vmatpush.bf16.msra.mxu3 %v6170_v41 }
 0x3a7   : > { %3070 = vmatpush.bf16.msra.mxu0 %v6172_v42  ;;  %3083 = vmatpush.bf16.msra.mxu1 %v6184_v47 }
 0x3a8   : > { %3096 = vmatpush.bf16.msra.mxu2 %v6200_v53  ;;  %3109 = vmatpush.bf16.msra.mxu3 %v6205_v56 }
 0x3ab   : > { %3071 = vmatpush.bf16.msra.mxu0 %v6214_v59  ;;  %3084 = vmatpush.bf16.msra.mxu1 %v6223_v0 }
 0x3ac   : > { %3097 = vmatpush.bf16.msra.mxu2 %v6238_v12  ;;  %3110 = vmatpush.bf16.msra.mxu3 %v9820_v11 }
 0x3af   : > { %3072 = vmatpush.bf16.msra.mxu0 %v9821_v17  ;;  %3085 = vmatpush.bf16.msra.mxu1 %v9887_v25 }
 0x3b0   : > { %3098 = vmatpush.bf16.msra.mxu2 %v9888_v3  ;;  %3111 = vmatpush.bf16.msra.mxu3 %v9889_v58 }
 0x3b3   : > { %3073 = vmatpush.bf16.msra.mxu0 %v9890_v35  ;;  %3086 = vmatpush.bf16.msra.mxu1 %v9891_v39 }
 0x3b4   : > { %3099 = vmatpush.bf16.msra.mxu2 %v9892_v62  ;;  %3112 = vmatpush.bf16.msra.mxu3 %v9893_v13 }
 0x3b7   : > { %3074 = vmatpush.bf16.msra.mxu0 %v9894_v44  ;;  %3087 = vmatpush.bf16.msra.mxu1 %v9895_v27 }
 0x3b8   : > { %3100 = vmatpush.bf16.msra.mxu2 %v9896_v45  ;;  %3113 = vmatpush.bf16.msra.mxu3 %v9897_v55 }
 0x3bb   : > { %3075 = vmatpush.bf16.msra.mxu0 %v9898_v60  ;;  %3088 = vmatpush.bf16.msra.mxu1 %v9899_v1 }
 0x3bc   : > { %3101 = vmatpush.bf16.msra.mxu2 %v9900_v63  ;;  %3114 = vmatpush.bf16.msra.mxu3 %v9901_v7 }
 0x3bf   : > { %3076 = vmatpush.bf16.msra.mxu0 %v9902_v31  ;;  %3089 = vmatpush.bf16.msra.mxu1 %v9903_v9 }
 0x3c0   : > { %3102 = vmatpush.bf16.msra.mxu2 %v9904_v21  ;;  %3115 = vmatpush.bf16.msra.mxu3 %v9905_v50  ;;  %v9916_v50 = vld [vmem:[#allocation18_spill] sm:$0xff] }
 0x41e   : > { %v2297_v43 = vpop.f32.mrf.mxu0  ;;  %v2310_v10 = vpop.f32.mrf.mxu1 }
 0x41f   : > { %v2344_v18 = vrot.slane %v2297_v43, 5  ;;  %v2348_v33 = vrot.slane %v2297_v43, 6  ;;  %v2352_v23 = vrot.slane %v2297_v43, 7  ;;  %v2384_v46 = vadd.f32 %v2297_v43, %v9906_v8 }
 0x420   : > { %v2345_v26 = vrot.slane %v2310_v10, 5  ;;  %v2349_v24 = vrot.slane %v2310_v10, 6  ;;  %v2353_v40 = vrot.slane %v2310_v10, 7  ;;  %v2385_v4 = vadd.f32 %v2310_v10, %v9907_v32 }
 0x421   : > { %v2372_v52 = vadd.f32 %v2344_v18, %v9908_v20  ;;  %v2376_v61 = vadd.f32 %v2348_v33, %v9909_v57  ;;  %v2380_v22 = vadd.f32 %v2352_v23, %v9910_v29  ;;  %v4879_v6 = vmul.f32 -1.442695, %v2384_v46  ;;  %v9915_v57 = vld [vmem:[#allocation35_spill] sm:$0xff] }
 0x422   : > { %v2373_v16 = vadd.f32 %v2345_v26, %v9911_v48  ;;  %v2377_v38 = vadd.f32 %v2349_v24, %v9912_v2  ;;  %v2381_v14 = vadd.f32 %v2353_v40, %v9913_v49  ;;  %v4883_v51 = vmul.f32 -1.442695, %v2385_v4  ;;  %v9919_v48 = vld [vmem:[#allocation20_spill] sm:$0xff] }
 0x423   : > { %v4876_v28 = vmul.f32 -1.442695, %v2372_v52  ;;  %v4877_v15 = vmul.f32 -1.442695, %v2376_v61  ;;  %v4878_v43 = vmul.f32 -1.442695, %v2380_v22  ;;  %5355 = vpow2.f32 %v4879_v6 }
 0x424   : > { %v4880_v8 = vmul.f32 -1.442695, %v2373_v16  ;;  %5357 = vpow2.f32 %v4883_v51  ;;  %v4881_v10 = vmul.f32 -1.442695, %v2377_v38  ;;  %v4882_v23 = vmul.f32 -1.442695, %v2381_v14 }
 0x425   : > { %5359 = vpow2.f32 %v4876_v28  ;;  %v2323_v18 = vpop.f32.mrf.mxu2  ;;  %v7660_v33 = vpop.f32.mrf.mxu3 }
 0x426   : > { %5361 = vpow2.f32 %v4877_v15  ;;  %v2299_v46 = vpop.f32.mrf.mxu0  ;;  %v2312_v26 = vpop.f32.mrf.mxu1  ;;  %v2355_v49 = vrot.slane %v7660_v33, 7  ;;  %v7704_v20 = vadd.f32 %v2323_v18, %v9915_v57 }
 0x427   : > { %5363 = vpow2.f32 %v4878_v43  ;;  %v2346_v46 = vrot.slane %v2323_v18, 5 }
 0x428   : > { %5365 = vpow2.f32 %v4880_v8 }
 0x429   : > { %v5356_v24 = vpop.eup %5355  ;;  %5367 = vpow2.f32 %v4881_v10 }
 0x42a   : > { %v5358_v40 = vpop.eup %5357  ;;  %v7662_v4 = vadd.f32 1.0, %v5356_v24  ;;  %5369 = vpow2.f32 %v4882_v23  ;;  %v2347_v24 = vrot.slane %v7660_v33, 5 }
 0x42b   : > { %v5360_v52 = vpop.eup %5359  ;;  %v7664_v61 = vadd.f32 1.0, %v5358_v40 }
 0x42c   : > { %v5362_v22 = vpop.eup %5361  ;;  %v7666_v6 = vadd.f32 1.0, %v5360_v52  ;;  %5371 = vrcp.f32 %v7662_v4  ;;  %v2350_v52 = vrot.slane %v2323_v18, 6  ;;  %v2375_v21 = vadd.f32 %v2347_v24, %v9916_v50  ;;  %v9920_v50 = vld [vmem:[#allocation37_spill] sm:$0xff] }
 0x42d   : > { %v5364_v16 = vpop.eup %5363  ;;  %v7669_v38 = vadd.f32 1.0, %v5362_v22  ;;  %5373 = vrcp.f32 %v7664_v61  ;;  %v2325_v8 = vpop.f32.mrf.mxu2  ;;  %v2354_v22 = vrot.slane %v2323_v18, 7  ;;  %v2536_v57 = vand.u32 2147483648, %v7664_v61 }
 0x42e   : > { %v2338_v14 = vpop.f32.mrf.mxu3  ;;  %v5366_v51 = vpop.eup %5365  ;;  %v7672_v28 = vadd.f32 1.0, %v5364_v16  ;;  %5375 = vrcp.f32 %v7666_v6  ;;  %v2351_v16 = vrot.slane %v7660_v33, 6  ;;  %v7727_v1 = vadd.f32 %v7660_v33, %v9920_v50 }
 0x42f   : > { %v5368_v15 = vpop.eup %5367  ;;  %5377 = vrcp.f32 %v7669_v38  ;;  %v7676_v43 = vadd.f32 1.0, %v5366_v51  ;;  %v2415_v60 = vand.u32 2147483648, %v7666_v6  ;;  %v7741_v33 = vmul.f32 -1.442695, %v2375_v21 }
 0x430   : > { %v5370_v10 = vpop.eup %5369  ;;  %5379 = vrcp.f32 %v7672_v28  ;;  %v7679_v23 = vadd.f32 1.0, %v5368_v15  ;;  %v7718_v7 = vadd.f32 %v2351_v16, %v9919_v48  ;;  %v9921_v16 = vld [vmem:[#allocation26_spill] sm:$0xff]  ;;  %vm2409_vm8 = vweird.f32 %v7666_v6 }
 0x431   : > { %v7681_v26 = vadd.f32 1.0, %v5370_v10  ;;  %5381 = vrcp.f32 %v7676_v43  ;;  %v9914_v10 = vld [vmem:[#allocation17_spill] sm:$0xff]  ;;  %v7751_v45 = vor.u32 1.1754944e-38, %v2536_v57  ;;  %v2491_v21 = vand.u32 2147483648, %v7676_v43 }
 0x432   : > { %v7685_v40 = vpop.eup %5371  ;;  %5383 = vrcp.f32 %v7679_v23  ;;  %v2374_v32 = vadd.f32 %v2346_v46, %v9914_v10  ;;  %v9917_v46 = vld [vmem:[#allocation19_spill] sm:$0xff]  ;;  %v9918_v10 = vld [vmem:[#allocation25_spill] sm:$0xff]  ;;  %vm2424_vm3 = vweird.f32 %v7669_v38  ;;  %v2416_v57 = vor.u32 1.1754944e-38, %v2415_v60 }
 0x433   : > { %v7689_v8 = vpop.eup %5373  ;;  %5385 = vrcp.f32 %v7681_v26  ;;  %v7712_v51 = vadd.f32 %v2350_v52, %v9917_v46  ;;  %v7715_v31 = vadd.f32 %v2354_v22, %v9918_v10  ;;  %v2413_v22 = vand.u32 2147483647, %v7666_v6 }
 0x434   : > { %v7692_v14 = vpop.eup %5375  ;;  %5387 = vtanh.f32 %v2374_v32  ;;  %v7733_v10 = vadd.f32 %v2355_v49, %v9921_v16  ;;  %v2450_v49 = vmul.f32 %v7685_v40, %v7662_v4  ;;  %v2521_v13 = vand.u32 2147483648, %v7681_v26 }
 0x435   : > { %v7698_v2 = vpop.eup %5377  ;;  %v2405_v29 = vmul.f32 %v7692_v14, %v7666_v6  ;;  %vm7758_vm9 = vcmp.eq.f32.partialorder %v2413_v22, 8.507059e+37  ;;  %v2428_v62 = vand.u32 2147483647, %v7669_v38  ;;  %vm2410_vm1 = vweird.f32 %v7692_v14 }
 0x436   : > { %v7707_v9 = vpop.eup %5379  ;;  %v2420_v15 = vmul.f32 %v7698_v2, %v7669_v38  ;;  %v2451_v58 = vsub.f32 1.0, %v2450_v49  ;;  %vm2485_vm4 = vweird.f32 %v7676_v43  ;;  %vm2425_vm10 = vweird.f32 %v7698_v2  ;;  %vm7789_vm2 = vmor %vm2409_vm8, %vm2410_vm1 }
 0x437   : > { %v7720_v63 = vpop.eup %5381  ;;  %v2406_v18 = vsub.f32 1.0, %v2405_v29  ;;  %v2435_v24 = vmul.f32 %v7707_v9, %v7672_v28  ;;  %v7773_v60 = vor.u32 1.1754944e-38, %v2491_v21  ;;  %vm2500_vm13 = vweird.f32 %v7679_v23  ;;  %vm7805_vm12 = vmor %vm2424_vm3, %vm2425_vm10 }
 0x438   : > { %v7729_v52 = vpop.eup %5383  ;;  %v2421_v46 = vsub.f32 1.0, %v2420_v15  ;;  %v2481_v29 = vmul.f32 %v7720_v63, %v7676_v43  ;;  %v2526_v15 = vmul.f32 %v7689_v8, %v7664_v61  ;;  %vm2486_vm6 = vweird.f32 %v7720_v63 }
 0x439   : > { %v7735_v48 = vpop.eup %5385  ;;  %v2436_v50 = vsub.f32 1.0, %v2435_v24  ;;  %v2407_v32 = vmul.f32 %v7692_v14, %v2406_v18  ;;  %v2496_v16 = vmul.f32 %v7729_v52, %v7679_v23  ;;  %v2506_v24 = vand.u32 2147483648, %v7679_v23 }
 0x43a   : > { %v2422_v55 = vmul.f32 %v7698_v2, %v2421_v46  ;;  %v2511_v27 = vmul.f32 %v7735_v48, %v7681_v26  ;;  %v2482_v44 = vsub.f32 1.0, %v2481_v29  ;;  %v7765_v46 = vpop.eup %5387  ;;  %v2527_v39 = vsub.f32 1.0, %v2526_v15 }
 0x43b   : > { %v2408_v35 = vadd.f32 %v7692_v14, %v2407_v32  ;;  %v2437_v22 = vmul.f32 %v7707_v9, %v2436_v50  ;;  %v2497_v3 = vsub.f32 1.0, %v2496_v16  ;;  %v7776_v25 = vor.u32 1.1754944e-38, %v2506_v24 }
 0x43c   : > { %v2423_v29 = vadd.f32 %v7698_v2, %v2422_v55  ;;  %v2512_v15 = vsub.f32 1.0, %v2511_v27  ;;  %v2430_v32 = vand.u32 2147483648, %v7669_v38  ;;  %v2483_v17 = vmul.f32 %v7720_v63, %v2482_v44 }
 0x43d   : > { %vm2515_vm7 = vweird.f32 %v7681_v26  ;;  %v7782_v50 = vor.u32 1.1754944e-38, %v2521_v13  ;;  %vm2531_vm11 = vweird.f32 %v7689_v8  ;;  %vm7793_vm5 = vcmp.eq.f32.partialorder %v2428_v62, 8.507059e+37 }
 0x43e   : > { %v2528_v44 = vmul.f32 %v7689_v8, %v2527_v39  ;;  %v2412_v13 = vsel %vm7789_vm2, %v7692_v14, %v2408_v35  ;;  %v7810_v16 = vadd.f32 %v7707_v9, %v2437_v22  ;;  %vm2440_vm15 = vweird.f32 %v7707_v9 }
 0x43f   : > { %vm2454_vm14 = vweird.f32 %v7662_v4  ;;  %v2498_v39 = vmul.f32 %v7729_v52, %v2497_v3  ;;  %vm2530_vm8 = vweird.f32 %v7664_v61  ;;  %v2427_v35 = vsel %vm7805_vm12, %v7698_v2, %v2423_v29 }
 0x440   : > { %v2445_v62 = vand.u32 2147483648, %v7672_v28  ;;  %v2452_v38 = vmul.f32 %v7685_v40, %v2451_v58  ;;  %vm2501_vm3 = vweird.f32 %v7729_v52  ;;  %v2513_v14 = vmul.f32 %v7735_v48, %v2512_v15 }
 0x441   : > { %v2431_v49 = vor.u32 1.1754944e-38, %v2430_v32  ;;  %vm2439_vm1 = vweird.f32 %v7672_v28  ;;  %vm2516_vm10 = vweird.f32 %v7735_v48  ;;  %v2417_v3 = vsel %vm7758_vm9, %v2416_v57, %v2412_v13  ;;  %vm7848_vm9 = vmor %vm2485_vm4, %vm2486_vm6 }
 0x442   : > { %vm7827_vm2 = vmor %vm2439_vm1, %vm2440_vm15  ;;  %v2443_v2 = vand.u32 2147483647, %v7672_v28  ;;  %v2484_v58 = vadd.f32 %v7720_v63, %v2483_v17  ;;  %vm2455_vm12 = vweird.f32 %v7685_v40  ;;  %v2460_v18 = vand.u32 2147483648, %v7662_v4 }
 0x443   : > { %v2432_v24 = vsel %vm7793_vm5, %v2431_v49, %v2427_v35  ;;  %v2442_v22 = vsel %vm7827_vm2, %v7707_v9, %v7810_v16  ;;  %v2446_v57 = vor.u32 1.1754944e-38, %v2445_v62  ;;  %v2453_v29 = vadd.f32 %v7685_v40, %v2452_v38  ;;  %vm7860_vm5 = vmor %vm2500_vm13, %vm2501_vm3 }
 0x444   : > { %v2499_v15 = vadd.f32 %v7729_v52, %v2498_v39  ;;  %5389 = vtanh.f32 %v7712_v51  ;;  %v2489_v9 = vand.u32 2147483647, %v7676_v43  ;;  %v2514_v28 = vadd.f32 %v7735_v48, %v2513_v14  ;;  %vm7874_vm4 = vmor %vm2515_vm7, %vm2516_vm10 }
 0x445   : > { %5391 = vtanh.f32 %v7715_v31  ;;  %v4885_v32 = vmul.f32 -1.442695, %v7718_v7  ;;  %v2488_v55 = vsel %vm7848_vm9, %v7720_v63, %v2484_v58  ;;  %v2504_v43 = vand.u32 2147483647, %v7679_v23  ;;  %vm7885_vm13 = vmor %vm2454_vm14, %vm2455_vm12 }
 0x446   : > { %v2529_v27 = vadd.f32 %v7689_v8, %v2528_v44  ;;  %5393 = vpow2.f32 %v7741_v33  ;;  %v2519_v31 = vand.u32 2147483647, %v7681_v26  ;;  %v4886_v13 = vmul.f32 -1.442695, %v7733_v10  ;;  %vm7898_vm6 = vmor %vm2530_vm8, %vm2531_vm11 }
 0x447   : > { %5395 = vpow2.f32 %v4885_v32  ;;  %v4887_v63 = vmul.f32 -1.442695, %v7727_v1  ;;  %v2461_v33 = vor.u32 1.1754944e-38, %v2460_v18  ;;  %v2503_v44 = vsel %vm7860_vm5, %v7729_v52, %v2499_v15 }
 0x448   : > { %v2534_v26 = vand.u32 2147483647, %v7664_v61  ;;  %5397 = vtanh.f32 %v7704_v20  ;;  %v2457_v10 = vsel %vm7885_vm13, %v7685_v40, %v2453_v29  ;;  %vm2490_vm7 = vcmp.eq.f32.partialorder %v2489_v9, 8.507059e+37 }
 0x449   : > { %v2518_v52 = vsel %vm7874_vm4, %v7735_v48, %v2514_v28  ;;  %5399 = vpow2.f32 %v4886_v13  ;;  %v2493_v20 = vsel %vm2490_vm7, %v7773_v60, %v2488_v55  ;;  %vm2505_vm15 = vcmp.eq.f32.partialorder %v2504_v43, 8.507059e+37 }
 0x44a   : > { %v5390_v6 = vpop.eup %5389  ;;  %v2533_v61 = vsel %vm7898_vm6, %v7689_v8, %v2529_v27  ;;  %5401 = vpow2.f32 %v4887_v63  ;;  %vm2444_vm11 = vcmp.eq.f32.partialorder %v2443_v2, 8.507059e+37  ;;  %v9942_v39 = vand.u32 2147483647, %v7662_v4 }
 0x44b   : > { %v5392_v16 = vpop.eup %5391  ;;  %v2508_v40 = vsel %vm2505_vm15, %v7776_v25, %v2503_v44  ;;  %vm2520_vm8 = vcmp.eq.f32.partialorder %v2519_v31, 8.507059e+37  ;;  %v2447_v48 = vsel %vm2444_vm11, %v2446_v57, %v2442_v22  ;;  %vm2535_vm3 = vcmp.eq.f32.partialorder %v2534_v26, 8.507059e+37 }
 0x44c   : > { %vm2459_vm14 = vcmp.eq.f32.partialorder %v9942_v39, 8.507059e+37  ;;  %v5394_v35 = vpop.eup %5393  ;;  %v2523_v38 = vsel %vm2520_vm8, %v7782_v50, %v2518_v52  ;;  %v2538_v14 = vsel %vm2535_vm3, %v7751_v45, %v2533_v61  ;;  %v9943_v8 = vrot.slane %v7566_v19, 7 }
 0x44d   : > { %v2462_v62 = vsel %vm2459_vm14, %v2461_v33, %v2457_v10  ;;  %v5396_v60 = vpop.eup %5395  ;;  %v2636_v21 = vmul.f32 %v7765_v46, %v2417_v3  ;;  %v7920_v2 = vadd.f32 1.0, %v5394_v35  ;;  %v2627_v25 = vrot.slane %v7577_v54, 7 }
 0x44e   : > { %v2632_v49 = vmul.f32 %v9943_v8, %v2493_v20  ;;  %v5398_v4 = vpop.eup %5397  ;;  %v9944_v58 = vrot.slane %v7571_v5, 7  ;;  %v2637_v18 = vmul.f32 %v5390_v6, %v2432_v24  ;;  %v7925_v57 = vadd.f32 1.0, %v5396_v60  ;;  %v9951_v6 = vld [vmem:[#allocation23_spill] sm:$0xff] }
 0x44f   : > { %v5400_v50 = vpop.eup %5399  ;;  %v9945_v29 = vrot.slane %v7574_v36, 7  ;;  %v2638_v15 = vmul.f32 %v5392_v16, %v2447_v48  ;;  %v2635_v17 = vmul.f32 %v2627_v25, %v2538_v14  ;;  %v2639_v9 = vmul.f32 %v5398_v4, %v2462_v62 }
 0x450   : > { %v2633_v22 = vmul.f32 %v9944_v58, %v2508_v40  ;;  %v5402_v19 = vpop.eup %5401  ;;  %v7929_v46 = vadd.f32 1.0, %v5400_v50  ;;  %v7931_v3 = vadd.f32 %v2636_v21, %v2632_v49  ;;  %5403 = vrcp.f32 %v7920_v2 }
 0x451   : > { %v2634_v45 = vmul.f32 %v9945_v29, %v2523_v38  ;;  %v7933_v28 = vadd.f32 1.0, %v5402_v19  ;;  %5405 = vrcp.f32 %v7925_v57  ;;  %v7942_v36 = vadd.f32 %v2639_v9, %v2635_v17 }
 0x452   : > { %v7936_v5 = vadd.f32 %v2637_v18, %v2633_v22  ;;  %5407 = vrcp.f32 %v7929_v46  ;;  %v2571_v24 = vand.u32 2147483648, %v7920_v2  ;;  %v2569_v51 = vand.u32 2147483647, %v7920_v2 }
 0x453   : > { %v7939_v54 = vadd.f32 %v2638_v15, %v2634_v45  ;;  %5409 = vrcp.f32 %v7933_v28  ;;  %vm2565_vm1 = vweird.f32 %v7920_v2  ;;  %v2586_v27 = vand.u32 2147483648, %v7925_v57 }
 0x454   : > { %5411 = vtanh.f32 %v7931_v3  ;;  %v2572_v31 = vor.u32 1.1754944e-38, %v2571_v24  ;;  %vm2580_vm10 = vweird.f32 %v7925_v57  ;;  %v2584_v63 = vand.u32 2147483647, %v7925_v57 }
 0x455   : > { %5413 = vtanh.f32 %v7936_v5  ;;  %vm2595_vm2 = vweird.f32 %v7929_v46  ;;  %v2601_v26 = vand.u32 2147483648, %v7929_v46  ;;  %vm2610_vm12 = vweird.f32 %v7933_v28 }
 0x456   : > { %v5404_v32 = vpop.eup %5403  ;;  %5415 = vtanh.f32 %v7939_v54  ;;  %vm7962_vm9 = vcmp.eq.f32.partialorder %v2569_v51, 8.507059e+37  ;;  %v2587_v16 = vor.u32 1.1754944e-38, %v2586_v27  ;;  %v2599_v62 = vand.u32 2147483647, %v7929_v46 }
 0x457   : > { %v5406_v55 = vpop.eup %5405  ;;  %5417 = vtanh.f32 %v7942_v36  ;;  %v2561_v43 = vmul.f32 %v5404_v32, %v7920_v2  ;;  %vm2566_vm5 = vweird.f32 %v5404_v32  ;;  %v2616_v8 = vand.u32 2147483648, %v7933_v28 }
 0x458   : > { %v5408_v7 = vpop.eup %5407  ;;  %v2576_v13 = vmul.f32 %v5406_v55, %v7925_v57  ;;  %vm2581_vm4 = vweird.f32 %v5406_v55  ;;  %vm2567_vm6 = vmor %vm2565_vm1, %vm2566_vm5  ;;  %v2614_v4 = vand.u32 2147483647, %v7933_v28  ;;  %vm2585_vm11 = vcmp.eq.f32.partialorder %v2584_v63, 8.507059e+37 }
 0x459   : > { %v5410_v23 = vpop.eup %5409  ;;  %v2562_v33 = vsub.f32 1.0, %v2561_v43  ;;  %v2591_v44 = vmul.f32 %v5408_v7, %v7929_v46  ;;  %vm2596_vm13 = vweird.f32 %v5408_v7  ;;  %vm2582_vm15 = vmor %vm2580_vm10, %vm2581_vm4  ;;  %v2602_v22 = vor.u32 1.1754944e-38, %v2601_v26 }
 0x45a   : > { %v5412_v1 = vpop.eup %5411  ;;  %v2577_v10 = vsub.f32 1.0, %v2576_v13  ;;  %v2606_v52 = vmul.f32 %v5410_v23, %v7933_v28  ;;  %vm2611_vm7 = vweird.f32 %v5410_v23  ;;  %vm2597_vm14 = vmor %vm2595_vm2, %vm2596_vm13  ;;  %vm2600_vm8 = vcmp.eq.f32.partialorder %v2599_v62, 8.507059e+37  ;;  %v9959_v62 = vld [vmem:[#allocation33_spill] sm:$0xff] }
 0x45b   : > { %v5414_v20 = vpop.eup %5413  ;;  %v2563_v61 = vmul.f32 %v5404_v32, %v2562_v33  ;;  %v2592_v39 = vsub.f32 1.0, %v2591_v44  ;;  %vm2612_vm3 = vmor %vm2610_vm12, %vm2611_vm7  ;;  %v2617_v57 = vor.u32 1.1754944e-38, %v2616_v8  ;;  %vm2615_vm1 = vcmp.eq.f32.partialorder %v2614_v4, 8.507059e+37  ;;  %v9963_v8 = vld [vmem:[#allocation39_spill] sm:$0xff]  ;;  %v9966_v4 = vld [vmem:[#allocation42_spill] sm:$0xff] }
 0x45c   : > { %v5416_v40 = vpop.eup %5415  ;;  %v2578_v35 = vmul.f32 %v5406_v55, %v2577_v10  ;;  %v2607_v48 = vsub.f32 1.0, %v2606_v52  ;;  %vm9948_vm10 = vcmask 1042434   ;;  %vm9949_vm2 = vcmask 1043459   ;;  %v9950_v52 = vld [vmem:[#allocation22_spill] sm:$0xff] }
 0x45d   : > { %v5418_v38 = vpop.eup %5417  ;;  %v2593_v60 = vmul.f32 %v5408_v7, %v2592_v39  ;;  %v2564_v14 = vadd.f32 %v5404_v32, %v2563_v61  ;;  %v9953_v61 = vld [vmem:[#allocation27_spill] sm:$0xff]  ;;  %v9955_v39 = vld [vmem:[#allocation29_spill] sm:$0xff] }
 0x45e   : > { %v2608_v49 = vmul.f32 %v5410_v23, %v2607_v48  ;;  %v2579_v21 = vadd.f32 %v5406_v55, %v2578_v35  ;;  %v9957_v35 = vld [vmem:[#allocation31_spill] sm:$0xff]  ;;  %v9958_v48 = vld [vmem:[#allocation32_spill] sm:$0xff] }
 0x45f   : > { %v2568_v25 = vsel %vm2567_vm6, %v5404_v32, %v2564_v14  ;;  %v2594_v58 = vadd.f32 %v5408_v7, %v2593_v60  ;;  %v9961_v60 = vld [vmem:[#allocation36_spill] sm:$0xff]  ;;  %v9962_v14 = vld [vmem:[#allocation38_spill] sm:$0xff] }
 0x460   : > { %v2573_v18 = vsel %vm7962_vm9, %v2572_v31, %v2568_v25  ;;  %v2583_v50 = vsel %vm2582_vm15, %v5406_v55, %v2579_v21  ;;  %v2609_v2 = vadd.f32 %v5410_v23, %v2608_v49  ;;  %v9964_v49 = vld [vmem:[#allocation40_spill] sm:$0xff]  ;;  %v9965_v21 = vld [vmem:[#allocation41_spill] sm:$0xff]  ;;  %v9967_v25 = vld [vmem:[#allocation43_spill] sm:$0xff] }
 0x461   : > { %v2588_v29 = vsel %vm2585_vm11, %v2587_v16, %v2583_v50  ;;  %v2598_v45 = vsel %vm2597_vm14, %v5408_v7, %v2594_v58  ;;  %v2648_v15 = vmul.f32 %v5412_v1, %v2573_v18  ;;  %v9954_v16 = vld [vmem:[#allocation28_spill] sm:$0xff] }
 0x462   : > { %v2603_v19 = vsel %vm2600_vm8, %v2602_v22, %v2598_v45  ;;  %v2613_v17 = vsel %vm2612_vm3, %v5410_v23, %v2609_v2  ;;  %v2649_v9 = vmul.f32 %v5414_v20, %v2588_v29  ;;  %v9952_v20 = vld [vmem:[#allocation24_spill] sm:$0xff]  ;;  %v9969_v22 = vld [vmem:[#allocation45_spill] sm:$0xff] }
 0x463   : > { %v2618_v24 = vsel %vm2615_vm1, %v2617_v57, %v2613_v17  ;;  %v2650_v32 = vmul.f32 %v5416_v40, %v2603_v19  ;;  %2652 = vst [vmem:[#allocation2 + $0x10] sm:$0x8] %v2648_v15  ;;  %v2656_v51 = vpack.c.bf16 %v2648_v15, %v2648_v15  ;;  %v9956_v40 = vld [vmem:[#allocation30_spill] sm:$0xff]  ;;  %v9968_v58 = vld [vmem:[#allocation44_spill] sm:$0xff] }
 0x464   : > { %v2651_v55 = vmul.f32 %v5418_v38, %v2618_v24  ;;  %2653 = vst [vmem:[#allocation2] sm:$0x8] %v2649_v9  ;;  %v2657_v46 = vpack.c.bf16 %v2649_v9, %v2649_v9  ;;  %v9960_v38 = vld [vmem:[#allocation34_spill] sm:$0xff]  ;;  %v9970_v24 = vld [vmem:[#allocation11_spill] sm:$0xff] }
 0x465   : > { %2654 = vst [vmem:[#allocation2 + $0x18] sm:$0x8] %v2650_v32  ;;  %v2658_v43 = vpack.c.bf16 %v2650_v32, %v2650_v32  ;;  %v2664_v27 = vunpack.c.l.b16 %v2656_v51  ;;  %v9971_v51 = vld [vmem:[#allocation46_spill] sm:$0xff] }
 0x466   : > { %2655 = vst [vmem:[#allocation2 + $0x8] sm:$0x8] %v2651_v55  ;;  %v2659_v7 = vpack.c.bf16 %v2651_v55, %v2651_v55  ;;  %v2665_v28 = vunpack.c.l.b16 %v2657_v46  ;;  %v9972_v46 = vld [vmem:[#allocation13_spill] sm:$0xff] }
 0x467   : > { %v2666_v31 = vunpack.c.l.b16 %v2658_v43  ;;  %v2668_v13 = vrot.slane %v2664_v27, 3  ;;  %v9973_v27 = vld [vmem:[#allocation15_spill] sm:$0xff] }
 0x468   : > { %v2669_v63 = vrot.slane %v2665_v28, 2  ;;  %v2667_v23 = vunpack.c.l.b16 %v2659_v7  ;;  %v9974_v28 = vld [vmem:[#allocation12_spill] sm:$0xff] }
 0x469   : > { %v2671_v33 = vrot.slane %v2666_v31, 1 }
 0x46a   : > { %v2670_v44 = vsel %vm842_vm0, %v2669_v63, %v2668_v13  ;;  %v9975_v13 = vld [vmem:[#allocation47_spill] sm:$0xff] }
 0x46b   : > { %v2672_v26 = vsel %vm9948_vm10, %v2671_v33, %v2670_v44 }
 0x46c   : > { %v2673_v1 = vsel %vm9949_vm2, %v2667_v23, %v2672_v26  ;;  %v9976_v26 = vld [vmem:[#allocation14_spill] sm:$0xff] }
 0x46d   : > { %v2674_v10 = vpack.c.b16 %v2673_v1, %v2673_v1 }
 0x46f   : > { %2684 = vmatmul.bf16.vlgmr.msrb.gmra.mxu0 %v2674_v10  ;;  %2697 = vmatmul.bf16.vlgmr.msrb.gmra.mxu1 %v2674_v10 }
 0x470   : > { %2710 = vmatmul.bf16.vlgmr.msrb.gmra.mxu2 %v2674_v10  ;;  %2723 = vmatmul.bf16.vlgmr.msrb.gmra.mxu3 %v2674_v10 }
 0x471   : > { %3462 = vmatpush.bf16.msrb.mxu0 %v6138_v30  ;;  %3475 = vmatpush.bf16.msrb.mxu1 %v6150_v34 }
 0x472   : > { %3488 = vmatpush.bf16.msrb.mxu2 %v6158_v37  ;;  %3501 = vmatpush.bf16.msrb.mxu3 %v6170_v41 }
 0x475   : > { %3463 = vmatpush.bf16.msrb.mxu0 %v6172_v42  ;;  %3476 = vmatpush.bf16.msrb.mxu1 %v6184_v47 }
 0x476   : > { %3489 = vmatpush.bf16.msrb.mxu2 %v6200_v53  ;;  %3502 = vmatpush.bf16.msrb.mxu3 %v6205_v56 }
 0x479   : > { %3464 = vmatpush.bf16.msrb.mxu0 %v6214_v59  ;;  %3477 = vmatpush.bf16.msrb.mxu1 %v6223_v0 }
 0x47a   : > { %3490 = vmatpush.bf16.msrb.mxu2 %v6238_v12  ;;  %3503 = vmatpush.bf16.msrb.mxu3 %v9820_v11 }
 0x47d   : > { %3465 = vmatpush.bf16.msrb.mxu0 %v9950_v52  ;;  %3478 = vmatpush.bf16.msrb.mxu1 %v9951_v6 }
 0x47e   : > { %3491 = vmatpush.bf16.msrb.mxu2 %v9952_v20  ;;  %3504 = vmatpush.bf16.msrb.mxu3 %v9953_v61 }
 0x481   : > { %3466 = vmatpush.bf16.msrb.mxu0 %v9954_v16  ;;  %3479 = vmatpush.bf16.msrb.mxu1 %v9955_v39 }
 0x482   : > { %3492 = vmatpush.bf16.msrb.mxu2 %v9956_v40  ;;  %3505 = vmatpush.bf16.msrb.mxu3 %v9957_v35 }
 0x485   : > { %3467 = vmatpush.bf16.msrb.mxu0 %v9958_v48  ;;  %3480 = vmatpush.bf16.msrb.mxu1 %v9959_v62 }
 0x486   : > { %3493 = vmatpush.bf16.msrb.mxu2 %v9960_v38  ;;  %3506 = vmatpush.bf16.msrb.mxu3 %v9961_v60 }
 0x489   : > { %3468 = vmatpush.bf16.msrb.mxu0 %v9962_v14  ;;  %3481 = vmatpush.bf16.msrb.mxu1 %v9963_v8  ;;  %v9985_v14 = vld [vmem:[#allocation35_spill] sm:$0xff] }
 0x48a   : > { %3494 = vmatpush.bf16.msrb.mxu2 %v9964_v49  ;;  %3507 = vmatpush.bf16.msrb.mxu3 %v9965_v21 }
 0x48d   : > { %3469 = vmatpush.bf16.msrb.mxu0 %v9966_v4  ;;  %3482 = vmatpush.bf16.msrb.mxu1 %v9967_v25  ;;  %v9982_v25 = vld [vmem:[#allocation37_spill] sm:$0xff] }
 0x48e   : > { %3495 = vmatpush.bf16.msrb.mxu2 %v9968_v58  ;;  %3508 = vmatpush.bf16.msrb.mxu3 %v9969_v22  ;;  %v9981_v22 = vld [vmem:[#allocation26_spill] sm:$0xff] }
 0x4ec   : > { %v2685_v18 = vpop.f32.mrf.mxu0  ;;  %v2698_v50 = vpop.f32.mrf.mxu1 }
 0x4ed   : > { %v2732_v2 = vrot.slane %v2685_v18, 4  ;;  %v2736_v29 = vrot.slane %v2685_v18, 5  ;;  %v2740_v45 = vrot.slane %v2685_v18, 6  ;;  %v2744_v57 = vrot.slane %v2685_v18, 7  ;;  %v9977_v18 = vld [vmem:[#allocation16_spill] sm:$0xff] }
 0x4ee   : > { %v2733_v15 = vrot.slane %v2698_v50, 4  ;;  %v2737_v19 = vrot.slane %v2698_v50, 5  ;;  %v2741_v17 = vrot.slane %v2698_v50, 6  ;;  %v2745_v9 = vrot.slane %v2698_v50, 7 }
 0x4ef   : > { %v2764_v32 = vadd.f32 %v2732_v2, %v9970_v24  ;;  %v2768_v55 = vadd.f32 %v2736_v29, %v9971_v51  ;;  %v2772_v43 = vadd.f32 %v2740_v45, %v9972_v46  ;;  %v2776_v7 = vadd.f32 %v2744_v57, %v9973_v27 }
 0x4f0   : > { %v2765_v31 = vadd.f32 %v2733_v15, %v9974_v28  ;;  %v2769_v63 = vadd.f32 %v2737_v19, %v9975_v13  ;;  %v2773_v1 = vadd.f32 %v2741_v17, %v9976_v26  ;;  %v2777_v50 = vadd.f32 %v2745_v9, %v9977_v18  ;;  %v9979_v26 = vld [vmem:[#allocation18_spill] sm:$0xff]  ;;  %v9980_v28 = vld [vmem:[#allocation20_spill] sm:$0xff] }
 0x4f1   : > { %v4888_v33 = vmul.f32 -1.442695, %v2764_v32  ;;  %v4889_v23 = vmul.f32 -1.442695, %v2768_v55  ;;  %v4890_v44 = vmul.f32 -1.442695, %v2772_v43 }
 0x4f2   : > { %v4891_v10 = vmul.f32 -1.442695, %v2776_v7  ;;  %v4892_v2 = vmul.f32 -1.442695, %v2765_v31  ;;  %v4893_v45 = vmul.f32 -1.442695, %v2769_v63 }
 0x4f3   : > { %5419 = vpow2.f32 %v4888_v33  ;;  %v8022_v24 = vpop.f32.mrf.mxu2  ;;  %v2724_v29 = vpop.f32.mrf.mxu3  ;;  %v4894_v15 = vmul.f32 -1.442695, %v2773_v1  ;;  %v4895_v19 = vmul.f32 -1.442695, %v2777_v50 }
 0x4f4   : > { %5421 = vpow2.f32 %v4889_v23  ;;  %v2687_v57 = vpop.f32.mrf.mxu0  ;;  %v2700_v27 = vpop.f32.mrf.mxu1 }
 0x4f5   : > { %5423 = vpow2.f32 %v4890_v44 }
 0x4f6   : > { %5425 = vpow2.f32 %v4891_v10 }
 0x4f7   : > { %5427 = vpow2.f32 %v4892_v2  ;;  %v2734_v2 = vrot.slane %v8022_v24, 4 }
 0x4f8   : > { %5429 = vpow2.f32 %v4893_v45 }
 0x4f9   : > { %v5420_v32 = vpop.eup %5419  ;;  %5431 = vpow2.f32 %v4894_v15  ;;  %v2735_v15 = vrot.slane %v2724_v29, 4 }
 0x4fa   : > { %v5422_v17 = vpop.eup %5421  ;;  %v8024_v55 = vadd.f32 1.0, %v5420_v32  ;;  %5433 = vpow2.f32 %v4895_v19  ;;  %v2739_v19 = vrot.slane %v2724_v29, 5 }
 0x4fb   : > { %v5424_v9 = vpop.eup %5423  ;;  %v8026_v43 = vadd.f32 1.0, %v5422_v17  ;;  %v2713_v7 = vpop.f32.mrf.mxu2  ;;  %v2743_v17 = vrot.slane %v2724_v29, 6  ;;  %v2767_v13 = vadd.f32 %v2735_v15, %v9979_v26  ;;  %v9983_v26 = vld [vmem:[#allocation19_spill] sm:$0xff] }
 0x4fc   : > { %v2726_v31 = vpop.f32.mrf.mxu3  ;;  %v5426_v63 = vpop.eup %5425  ;;  %v8028_v33 = vadd.f32 1.0, %v5424_v9  ;;  %5435 = vrcp.f32 %v8024_v55  ;;  %v2747_v9 = vrot.slane %v2724_v29, 7  ;;  %v2771_v46 = vadd.f32 %v2739_v19, %v9980_v28  ;;  %v9984_v28 = vld [vmem:[#allocation25_spill] sm:$0xff] }
 0x4fd   : > { %v5428_v27 = vpop.eup %5427  ;;  %v8031_v23 = vadd.f32 1.0, %v5426_v63  ;;  %5437 = vrcp.f32 %v8026_v43  ;;  %v2738_v31 = vrot.slane %v8022_v24, 5  ;;  %v2742_v63 = vrot.slane %v8022_v24, 6 }
 0x4fe   : > { %v5430_v44 = vpop.eup %5429  ;;  %v8034_v1 = vadd.f32 1.0, %v5428_v27  ;;  %5439 = vrcp.f32 %v8028_v33  ;;  %v2775_v58 = vadd.f32 %v2743_v17, %v9981_v22  ;;  %v2779_v4 = vadd.f32 %v2747_v9, %v9982_v25 }
 0x4ff   : > { %v5432_v10 = vpop.eup %5431  ;;  %v8037_v50 = vadd.f32 1.0, %v5430_v44  ;;  %5441 = vrcp.f32 %v8031_v23  ;;  %v8073_v19 = vadd.f32 %v2738_v31, %v9983_v26  ;;  %v8076_v8 = vadd.f32 %v2742_v63, %v9984_v28 }
 0x500   : > { %v5434_v45 = vpop.eup %5433  ;;  %v8040_v57 = vadd.f32 1.0, %v5432_v10  ;;  %5443 = vrcp.f32 %v8034_v1  ;;  %v2746_v10 = vrot.slane %v8022_v24, 7  ;;  %vm2801_vm12 = vweird.f32 %v8024_v55 }
 0x501   : > { %v8043_v32 = vadd.f32 1.0, %v5434_v45  ;;  %5445 = vrcp.f32 %v8037_v50  ;;  %v9978_v45 = vld [vmem:[#allocation17_spill] sm:$0xff]  ;;  %v2805_v31 = vand.u32 2147483647, %v8024_v55  ;;  %v8093_v63 = vmul.f32 -1.442695, %v2775_v58 }
 0x502   : > { %v8045_v7 = vpop.eup %5435  ;;  %v2766_v18 = vadd.f32 %v2734_v2, %v9978_v45  ;;  %5447 = vrcp.f32 %v8040_v57  ;;  %v8079_v17 = vadd.f32 %v2746_v10, %v9985_v14  ;;  %v8095_v10 = vmul.f32 -1.442695, %v2779_v4 }
 0x503   : > { %v8050_v27 = vpop.eup %5437  ;;  %v2797_v44 = vmul.f32 %v8045_v7, %v8024_v55  ;;  %5449 = vrcp.f32 %v8043_v32  ;;  %vm2816_vm9 = vweird.f32 %v8026_v43  ;;  %v2883_v58 = vand.u32 2147483648, %v8034_v1 }
 0x504   : > { %v2812_v29 = vmul.f32 %v8050_v27, %v8026_v43  ;;  %v8062_v51 = vpop.eup %5439  ;;  %5451 = vtanh.f32 %v2766_v18  ;;  %v2807_v18 = vand.u32 2147483648, %v8024_v55  ;;  %v2820_v4 = vand.u32 2147483647, %v8026_v43 }
 0x505   : > { %v2798_v45 = vsub.f32 1.0, %v2797_v44  ;;  %v8069_v49 = vpop.eup %5441  ;;  %v2827_v2 = vmul.f32 %v8062_v51, %v8028_v33  ;;  %v8085_v44 = vmul.f32 -1.442695, %v2767_v13  ;;  %v2822_v26 = vand.u32 2147483648, %v8026_v43 }
 0x506   : > { %v2813_v21 = vsub.f32 1.0, %v2812_v29  ;;  %v8081_v9 = vpop.eup %5443  ;;  %v8087_v29 = vmul.f32 -1.442695, %v2771_v46  ;;  %v2898_v22 = vand.u32 2147483648, %v8037_v50  ;;  %v2842_v60 = vmul.f32 %v8069_v49, %v8031_v23 }
 0x507   : > { %v8089_v15 = vpop.eup %5445  ;;  %v2799_v14 = vmul.f32 %v8045_v7, %v2798_v45  ;;  %v2873_v28 = vmul.f32 %v8081_v9, %v8034_v1  ;;  %v2828_v25 = vsub.f32 1.0, %v2827_v2  ;;  %v2928_v62 = vand.u32 2147483648, %v8043_v32 }
 0x508   : > { %v8097_v24 = vpop.eup %5447  ;;  %v2814_v13 = vmul.f32 %v8050_v27, %v2813_v21  ;;  %v2888_v45 = vmul.f32 %v8089_v15, %v8037_v50  ;;  %v2913_v21 = vand.u32 2147483648, %v8040_v57  ;;  %vm2802_vm5 = vweird.f32 %v8045_v7 }
 0x509   : > { %v8103_v46 = vpop.eup %5449  ;;  %v2903_v38 = vmul.f32 %v8097_v24, %v8040_v57  ;;  %v2800_v35 = vadd.f32 %v8045_v7, %v2799_v14  ;;  %vm2817_vm4 = vweird.f32 %v8050_v27  ;;  %v2874_v39 = vsub.f32 1.0, %v2873_v28  ;;  %vm8140_vm7 = vmor %vm2801_vm12, %vm2802_vm5 }
 0x50a   : > { %v8120_v48 = vpop.eup %5451  ;;  %v2918_v2 = vmul.f32 %v8103_v46, %v8043_v32  ;;  %v2815_v40 = vadd.f32 %v8050_v27, %v2814_v13  ;;  %v8127_v16 = vor.u32 1.1754944e-38, %v2883_v58  ;;  %vm8129_vm13 = vcmp.eq.f32.partialorder %v2805_v31, 8.507059e+37  ;;  %vm8152_vm11 = vmor %vm2816_vm9, %vm2817_vm4 }
 0x50b   : > { %v2808_v20 = vor.u32 1.1754944e-38, %v2807_v18  ;;  %vm2877_vm6 = vweird.f32 %v8034_v1  ;;  %v2889_v6 = vsub.f32 1.0, %v2888_v45  ;;  %v8134_v52 = vor.u32 1.1754944e-38, %v2898_v22 }
 0x50c   : > { %v8136_v11 = vor.u32 1.1754944e-38, %v2913_v21  ;;  %v2829_v28 = vmul.f32 %v8062_v51, %v2828_v25  ;;  %v2843_v31 = vsub.f32 1.0, %v2842_v60  ;;  %vm2892_vm15 = vweird.f32 %v8037_v50 }
 0x50d   : > { %v2904_v13 = vsub.f32 1.0, %v2903_v38  ;;  %v8146_v18 = vor.u32 1.1754944e-38, %v2928_v62  ;;  %vm8156_vm14 = vcmp.eq.f32.partialorder %v2820_v4, 8.507059e+37  ;;  %vm2907_vm8 = vweird.f32 %v8040_v57 }
 0x50e   : > { %v2919_v60 = vsub.f32 1.0, %v2918_v2  ;;  %v2804_v62 = vsel %vm8140_vm7, %v8045_v7, %v2800_v35  ;;  %v2819_v38 = vsel %vm8152_vm11, %v8050_v27, %v2815_v40  ;;  %v2823_v25 = vor.u32 1.1754944e-38, %v2822_v26 }
 0x50f   : > { %v2875_v43 = vmul.f32 %v8081_v9, %v2874_v39  ;;  %vm2878_vm3 = vweird.f32 %v8081_v9  ;;  %vm2893_vm1 = vweird.f32 %v8089_v15  ;;  %vm2908_vm10 = vweird.f32 %v8097_v24 }
 0x510   : > { %v2890_v58 = vmul.f32 %v8089_v15, %v2889_v6  ;;  %vm2922_vm2 = vweird.f32 %v8043_v32  ;;  %vm2923_vm12 = vweird.f32 %v8103_v46  ;;  %v2830_v35 = vadd.f32 %v8062_v51, %v2829_v28  ;;  %vm8206_vm11 = vmor %vm2877_vm6, %vm2878_vm3 }
 0x511   : > { %vm2832_vm9 = vweird.f32 %v8062_v51  ;;  %v2905_v40 = vmul.f32 %v8097_v24, %v2904_v13  ;;  %v2809_v39 = vsel %vm8129_vm13, %v2808_v20, %v2804_v62  ;;  %v8181_v26 = vsel %vm8156_vm14, %v2823_v25, %v2819_v38  ;;  %vm8218_vm14 = vmor %vm2892_vm15, %vm2893_vm1 }
 0x512   : > { %v2844_v7 = vmul.f32 %v8069_v49, %v2843_v31  ;;  %v2920_v6 = vmul.f32 %v8103_v46, %v2919_v60  ;;  %vm2831_vm5 = vweird.f32 %v8028_v33  ;;  %v2835_v27 = vand.u32 2147483647, %v8028_v33  ;;  %vm8230_vm6 = vmor %vm2907_vm8, %vm2908_vm10 }
 0x513   : > { %v2837_v4 = vand.u32 2147483648, %v8028_v33  ;;  %vm8188_vm4 = vmor %vm2831_vm5, %vm2832_vm9  ;;  %vm2846_vm13 = vweird.f32 %v8031_v23  ;;  %vm2847_vm7 = vweird.f32 %v8069_v49  ;;  %v2876_v20 = vadd.f32 %v8081_v9, %v2875_v43 }
 0x514   : > { %5453 = vtanh.f32 %v8073_v19  ;;  %v2834_v61 = vsel %vm8188_vm4, %v8062_v51, %v2830_v35  ;;  %v2850_v21 = vand.u32 2147483647, %v8031_v23  ;;  %v2891_v33 = vadd.f32 %v8089_v15, %v2890_v58  ;;  %vm8247_vm8 = vmor %vm2846_vm13, %vm2847_vm7 }
 0x515   : > { %5455 = vtanh.f32 %v8076_v8  ;;  %v2845_v19 = vadd.f32 %v8069_v49, %v2844_v7  ;;  %v2881_v14 = vand.u32 2147483647, %v8034_v1  ;;  %v2906_v51 = vadd.f32 %v8097_v24, %v2905_v40  ;;  %vm8260_vm3 = vmor %vm2922_vm2, %vm2923_vm12 }
 0x516   : > { %5457 = vpow2.f32 %v8085_v44  ;;  %v2852_v28 = vand.u32 2147483648, %v8031_v23  ;;  %v2896_v31 = vand.u32 2147483647, %v8037_v50  ;;  %v2921_v13 = vadd.f32 %v8103_v46, %v2920_v6 }
 0x517   : > { %5459 = vpow2.f32 %v8087_v29  ;;  %vm8234_vm15 = vcmp.eq.f32.partialorder %v2835_v27, 8.507059e+37  ;;  %v2880_v50 = vsel %vm8206_vm11, %v8081_v9, %v2876_v20  ;;  %v2911_v22 = vand.u32 2147483647, %v8040_v57 }
 0x518   : > { %5461 = vtanh.f32 %v8079_v17  ;;  %v2838_v29 = vor.u32 1.1754944e-38, %v2837_v4  ;;  %v2895_v60 = vsel %vm8218_vm14, %v8089_v15, %v2891_v33  ;;  %v2926_v62 = vand.u32 2147483647, %v8043_v32 }
 0x519   : > { %5463 = vpow2.f32 %v8093_v63  ;;  %v2849_v23 = vsel %vm8247_vm8, %v8069_v49, %v2845_v19  ;;  %vm2882_vm1 = vcmp.eq.f32.partialorder %v2881_v14, 8.507059e+37  ;;  %v2910_v15 = vsel %vm8230_vm6, %v8097_v24, %v2906_v51 }
 0x51a   : > { %v5454_v57 = vpop.eup %5453  ;;  %5465 = vpow2.f32 %v8095_v10  ;;  %v2853_v63 = vor.u32 1.1754944e-38, %v2852_v28  ;;  %v2885_v38 = vsel %vm2882_vm1, %v8127_v16, %v2880_v50  ;;  %vm2897_vm10 = vcmp.eq.f32.partialorder %v2896_v31, 8.507059e+37 }
 0x51b   : > { %v5456_v9 = vpop.eup %5455  ;;  %v2925_v32 = vsel %vm8260_vm3, %v8103_v46, %v2921_v13  ;;  %v2839_v49 = vsel %vm8234_vm15, %v2838_v29, %v2834_v61  ;;  %vm2851_vm2 = vcmp.eq.f32.partialorder %v2850_v21, 8.507059e+37  ;;  %v2900_v43 = vsel %vm2897_vm10, %v8134_v52, %v2895_v60 }
 0x51c   : > { %v5458_v25 = vpop.eup %5457  ;;  %vm2912_vm12 = vcmp.eq.f32.partialorder %v2911_v22, 8.507059e+37  ;;  %v2854_v58 = vsel %vm2851_vm2, %v2853_v63, %v2849_v23  ;;  %vm2927_vm9 = vcmp.eq.f32.partialorder %v2926_v62, 8.507059e+37  ;;  %v10008_v46 = vrot.slane %v7931_v3, 7  ;;  %v10028_v23 = vld [vmem:[#allocation34_spill] sm:$0xff] }
 0x51d   : > { %v5460_v24 = vpop.eup %5459  ;;  %v2915_v10 = vsel %vm2912_vm12, %v8136_v11, %v2910_v15  ;;  %v8279_v35 = vadd.f32 1.0, %v5458_v25  ;;  %v2930_v40 = vsel %vm2927_vm9, %v8146_v18, %v2925_v32  ;;  %v3028_v6 = vmul.f32 %v8120_v48, %v2809_v39 }
 0x51e   : > { %v5462_v16 = vpop.eup %5461  ;;  %v3024_v7 = vmul.f32 %v10008_v46, %v2885_v38  ;;  %v8285_v27 = vadd.f32 1.0, %v5460_v24  ;;  %v3019_v52 = vrot.slane %v7942_v36, 7  ;;  %v10009_v45 = vrot.slane %v7936_v5, 7 }
 0x51f   : > { %v5464_v4 = vpop.eup %5463  ;;  %v3029_v11 = vmul.f32 %v5454_v57, %v8181_v26  ;;  %v10010_v21 = vrot.slane %v7939_v54, 7  ;;  %v3030_v18 = vmul.f32 %v5456_v9, %v2839_v49  ;;  %v3031_v19 = vmul.f32 %v5462_v16, %v2854_v58 }
 0x520   : > { %v3025_v20 = vmul.f32 %v10009_v45, %v2900_v43  ;;  %v5466_v61 = vpop.eup %5465  ;;  %v8293_v2 = vadd.f32 1.0, %v5464_v4  ;;  %v3027_v3 = vmul.f32 %v3019_v52, %v2930_v40  ;;  %5467 = vrcp.f32 %v8279_v35 }
 0x521   : > { %v3026_v33 = vmul.f32 %v10010_v21, %v2915_v10  ;;  %v8295_v48 = vadd.f32 1.0, %v5466_v61  ;;  %v8298_v39 = vadd.f32 %v3028_v6, %v3024_v7  ;;  %5469 = vrcp.f32 %v8285_v27 }
 0x522   : > { %v8301_v5 = vadd.f32 %v3029_v11, %v3025_v20  ;;  %5471 = vrcp.f32 %v8293_v2  ;;  %v8307_v54 = vadd.f32 %v3031_v19, %v3027_v3  ;;  %v2963_v26 = vand.u32 2147483648, %v8279_v35 }
 0x523   : > { %v8304_v36 = vadd.f32 %v3030_v18, %v3026_v33  ;;  %5473 = vrcp.f32 %v8295_v48  ;;  %v2961_v51 = vand.u32 2147483647, %v8279_v35  ;;  %v2976_v8 = vand.u32 2147483647, %v8285_v27 }
 0x524   : > { %5475 = vtanh.f32 %v8298_v39  ;;  %vm2957_vm5 = vweird.f32 %v8279_v35  ;;  %v2978_v13 = vand.u32 2147483648, %v8285_v27  ;;  %v2964_v44 = vor.u32 1.1754944e-38, %v2963_v26 }
 0x525   : > { %5477 = vtanh.f32 %v8301_v5  ;;  %vm2972_vm4 = vweird.f32 %v8285_v27  ;;  %vm2987_vm13 = vweird.f32 %v8293_v2  ;;  %v2993_v60 = vand.u32 2147483648, %v8293_v2 }
 0x526   : > { %v5468_v14 = vpop.eup %5467  ;;  %5479 = vtanh.f32 %v8304_v36  ;;  %vm8325_vm7 = vcmp.eq.f32.partialorder %v2961_v51, 8.507059e+37  ;;  %vm8329_vm11 = vcmp.eq.f32.partialorder %v2976_v8, 8.507059e+37  ;;  %v2979_v63 = vor.u32 1.1754944e-38, %v2978_v13 }
 0x527   : > { %v5470_v28 = vpop.eup %5469  ;;  %v2953_v31 = vmul.f32 %v5468_v14, %v8279_v35  ;;  %5481 = vtanh.f32 %v8307_v54  ;;  %vm2958_vm14 = vweird.f32 %v5468_v14  ;;  %v2991_v43 = vand.u32 2147483647, %v8293_v2 }
 0x528   : > { %v5472_v1 = vpop.eup %5471  ;;  %v2968_v50 = vmul.f32 %v5470_v28, %v8285_v27  ;;  %vm2973_vm6 = vweird.f32 %v5470_v28  ;;  %v3008_v16 = vand.u32 2147483648, %v8295_v48  ;;  %vm2959_vm8 = vmor %vm2957_vm5, %vm2958_vm14  ;;  %v3006_v6 = vand.u32 2147483647, %v8295_v48 }
 0x529   : > { %v5474_v22 = vpop.eup %5473  ;;  %v2954_v29 = vsub.f32 1.0, %v2953_v31  ;;  %v2983_v55 = vmul.f32 %v5472_v1, %v8293_v2  ;;  %vm2988_vm15 = vweird.f32 %v5472_v1  ;;  %vm2974_vm1 = vmor %vm2972_vm4, %vm2973_vm6  ;;  %v2994_v45 = vor.u32 1.1754944e-38, %v2993_v60 }
 0x52a   : > { %v2969_v62 = vsub.f32 1.0, %v2968_v50  ;;  %v2998_v57 = vmul.f32 %v5474_v22, %v8295_v48  ;;  %v5476_v15 = vpop.eup %5475  ;;  %vm3003_vm3 = vweird.f32 %v5474_v22  ;;  %vm3002_vm10 = vweird.f32 %v8295_v48  ;;  %vm2989_vm2 = vmor %vm2987_vm13, %vm2988_vm15 }
 0x52b   : > { %v2955_v9 = vmul.f32 %v5468_v14, %v2954_v29  ;;  %v2984_v38 = vsub.f32 1.0, %v2983_v55  ;;  %v5478_v32 = vpop.eup %5477  ;;  %vm2992_vm12 = vcmp.eq.f32.partialorder %v2991_v43, 8.507059e+37  ;;  %vm3004_vm9 = vmor %vm3002_vm10, %vm3003_vm3  ;;  %v3009_v21 = vor.u32 1.1754944e-38, %v3008_v16  ;;  %v10036_v43 = vld [vmem:[#allocation44_spill] sm:$0xff] }
 0x52c   : > { %v2970_v25 = vmul.f32 %v5470_v28, %v2969_v62  ;;  %v2999_v49 = vsub.f32 1.0, %v2998_v57  ;;  %v5480_v24 = vpop.eup %5479  ;;  %vm3007_vm5 = vcmp.eq.f32.partialorder %v3006_v6, 8.507059e+37  ;;  %vm10015_vm4 = vcmask 1042434  }
 0x52d   : > { %v2985_v58 = vmul.f32 %v5472_v1, %v2984_v38  ;;  %v2956_v10 = vadd.f32 %v5468_v14, %v2955_v9  ;;  %v5482_v40 = vpop.eup %5481  ;;  %vm10016_vm13 = vcmask 1043459   ;;  %v10030_v9 = vld [vmem:[#allocation38_spill] sm:$0xff]  ;;  %v10032_v38 = vld [vmem:[#allocation40_spill] sm:$0xff] }
 0x52e   : > { %v2971_v46 = vadd.f32 %v5470_v28, %v2970_v25  ;;  %v3000_v7 = vmul.f32 %v5474_v22, %v2999_v49  ;;  %v10034_v25 = vld [vmem:[#allocation42_spill] sm:$0xff]  ;;  %v10035_v49 = vld [vmem:[#allocation43_spill] sm:$0xff] }
 0x52f   : > { %v2960_v4 = vsel %vm2959_vm8, %v5468_v14, %v2956_v10  ;;  %v2986_v52 = vadd.f32 %v5472_v1, %v2985_v58 }
 0x530   : > { %v2965_v20 = vsel %vm8325_vm7, %v2964_v44, %v2960_v4  ;;  %v2975_v11 = vsel %vm2974_vm1, %v5470_v28, %v2971_v46  ;;  %v3001_v35 = vadd.f32 %v5474_v22, %v3000_v7 }
 0x531   : > { %v2980_v61 = vsel %vm8329_vm11, %v2979_v63, %v2975_v11  ;;  %v2990_v27 = vsel %vm2989_vm2, %v5472_v1, %v2986_v52  ;;  %v3040_v33 = vmul.f32 %v5476_v15, %v2965_v20  ;;  %v10029_v15 = vld [vmem:[#allocation36_spill] sm:$0xff]  ;;  %v10031_v63 = vld [vmem:[#allocation39_spill] sm:$0xff] }
 0x532   : > { %v2995_v18 = vsel %vm2992_vm12, %v2994_v45, %v2990_v27  ;;  %v3005_v3 = vsel %vm3004_vm9, %v5474_v22, %v3001_v35  ;;  %v3041_v19 = vmul.f32 %v5478_v32, %v2980_v61  ;;  %v10033_v32 = vld [vmem:[#allocation41_spill] sm:$0xff]  ;;  %v10038_v20 = vld [vmem:[#allocation11_spill] sm:$0xff]  ;;  %v10039_v35 = vld [vmem:[#allocation46_spill] sm:$0xff] }
 0x533   : > { %v3010_v48 = vsel %vm3007_vm5, %v3009_v21, %v3005_v3  ;;  %v3042_v26 = vmul.f32 %v5480_v24, %v2995_v18  ;;  %3044 = vst [vmem:[#allocation2 + $0x10] sm:$0x10] %v3040_v33  ;;  %v3048_v14 = vpack.c.bf16 %v3040_v33, %v3040_v33  ;;  %v10037_v24 = vld [vmem:[#allocation45_spill] sm:$0xff]  ;;  %v10041_v33 = vld [vmem:[#allocation15_spill] sm:$0xff]  ;;  %v10042_v3 = vld [vmem:[#allocation12_spill] sm:$0xff] }
 0x534   : > { %v3043_v51 = vmul.f32 %v5482_v40, %v3010_v48  ;;  %3045 = vst [vmem:[#allocation2] sm:$0x10] %v3041_v19  ;;  %v3049_v2 = vpack.c.bf16 %v3041_v19, %v3041_v19  ;;  %v10040_v27 = vld [vmem:[#allocation13_spill] sm:$0xff]  ;;  %v10043_v48 = vld [vmem:[#allocation47_spill] sm:$0xff] }
 0x535   : > { %3046 = vst [vmem:[#allocation2 + $0x18] sm:$0x10] %v3042_v26  ;;  %v3050_v8 = vpack.c.bf16 %v3042_v26, %v3042_v26  ;;  %v3056_v28 = vunpack.c.l.b16 %v3048_v14 }
 0x536   : > { %3047 = vst [vmem:[#allocation2 + $0x8] sm:$0x10] %v3043_v51  ;;  %v3051_v31 = vpack.c.bf16 %v3043_v51, %v3043_v51  ;;  %v3057_v13 = vunpack.c.l.b16 %v3049_v2 }
 0x537   : > { %v3058_v1 = vunpack.c.l.b16 %v3050_v8  ;;  %v3060_v44 = vrot.slane %v3056_v28, 4  ;;  %v10044_v8 = vld [vmem:[#allocation14_spill] sm:$0xff] }
 0x538   : > { %v3059_v50 = vunpack.c.l.b16 %v3051_v31  ;;  %v3061_v29 = vrot.slane %v3057_v13, 3  ;;  %v10045_v13 = vld [vmem:[#allocation16_spill] sm:$0xff] }
 0x539   : > { %v3063_v22 = vrot.slane %v3058_v1, 2 }
 0x53a   : > { %v3062_v55 = vsel %vm842_vm0, %v3061_v29, %v3060_v44  ;;  %v3065_v60 = vrot.slane %v3059_v50, 1 }
 0x53b   : > { %v3064_v62 = vsel %vm10015_vm4, %v3063_v22, %v3062_v55 }
 0x53c   : > { %v3066_v57 = vsel %vm10016_vm13, %v3065_v60, %v3064_v62 }
 0x53d   : > { %v3067_v17 = vpack.c.b16 %v3066_v57, %v3066_v57 }
 0x53f   : > { %3077 = vmatmul.bf16.vlgmr.msra.gmra.mxu0 %v3067_v17  ;;  %3090 = vmatmul.bf16.vlgmr.msra.gmra.mxu1 %v3067_v17 }
 0x540   : > { %3103 = vmatmul.bf16.vlgmr.msra.gmra.mxu2 %v3067_v17  ;;  %3116 = vmatmul.bf16.vlgmr.msra.gmra.mxu3 %v3067_v17 }
 0x541   : > { %3855 = vmatpush.bf16.msra.mxu0 %v6138_v30  ;;  %3868 = vmatpush.bf16.msra.mxu1 %v6150_v34  ;;  %v10017_v30 = vld [vmem:[#allocation21_spill] sm:$0xff]  ;;  %v10018_v34 = vld [vmem:[#allocation22_spill] sm:$0xff] }
 0x542   : > { %3881 = vmatpush.bf16.msra.mxu2 %v6158_v37  ;;  %3894 = vmatpush.bf16.msra.mxu3 %v6170_v41  ;;  %v10019_v37 = vld [vmem:[#allocation23_spill] sm:$0xff]  ;;  %v10020_v41 = vld [vmem:[#allocation24_spill] sm:$0xff] }
 0x545   : > { %3856 = vmatpush.bf16.msra.mxu0 %v6172_v42  ;;  %3869 = vmatpush.bf16.msra.mxu1 %v6184_v47  ;;  %v10021_v42 = vld [vmem:[#allocation27_spill] sm:$0xff]  ;;  %v10022_v47 = vld [vmem:[#allocation28_spill] sm:$0xff] }
 0x546   : > { %3882 = vmatpush.bf16.msra.mxu2 %v6200_v53  ;;  %3895 = vmatpush.bf16.msra.mxu3 %v6205_v56  ;;  %v10023_v53 = vld [vmem:[#allocation29_spill] sm:$0xff]  ;;  %v10024_v56 = vld [vmem:[#allocation30_spill] sm:$0xff] }
 0x549   : > { %3857 = vmatpush.bf16.msra.mxu0 %v6214_v59  ;;  %3870 = vmatpush.bf16.msra.mxu1 %v6223_v0  ;;  %v10025_v59 = vld [vmem:[#allocation31_spill] sm:$0xff]  ;;  %v10026_v0 = vld [vmem:[#allocation32_spill] sm:$0xff] }
 0x54a   : > { %3883 = vmatpush.bf16.msra.mxu2 %v6238_v12  ;;  %3896 = vmatpush.bf16.msra.mxu3 %v10017_v30  ;;  %v10027_v12 = vld [vmem:[#allocation33_spill] sm:$0xff] }
 0x54d   : > { %3858 = vmatpush.bf16.msra.mxu0 %v10018_v34  ;;  %3871 = vmatpush.bf16.msra.mxu1 %v10019_v37 }
 0x54e   : > { %3884 = vmatpush.bf16.msra.mxu2 %v10020_v41  ;;  %3897 = vmatpush.bf16.msra.mxu3 %v10021_v42 }
 0x551   : > { %3859 = vmatpush.bf16.msra.mxu0 %v10022_v47  ;;  %3872 = vmatpush.bf16.msra.mxu1 %v10023_v53 }
 0x552   : > { %3885 = vmatpush.bf16.msra.mxu2 %v10024_v56  ;;  %3898 = vmatpush.bf16.msra.mxu3 %v10025_v59 }
 0x555   : > { %3860 = vmatpush.bf16.msra.mxu0 %v10026_v0  ;;  %3873 = vmatpush.bf16.msra.mxu1 %v10027_v12 }
 0x556   : > { %3886 = vmatpush.bf16.msra.mxu2 %v10028_v23  ;;  %3899 = vmatpush.bf16.msra.mxu3 %v10029_v15 }
 0x559   : > { %3861 = vmatpush.bf16.msra.mxu0 %v10030_v9  ;;  %3874 = vmatpush.bf16.msra.mxu1 %v10031_v63 }
 0x55a   : > { %3887 = vmatpush.bf16.msra.mxu2 %v10032_v38  ;;  %3900 = vmatpush.bf16.msra.mxu3 %v10033_v32 }
 0x55d   : > { %3862 = vmatpush.bf16.msra.mxu0 %v10034_v25  ;;  %3875 = vmatpush.bf16.msra.mxu1 %v10035_v49 }
 0x55e   : > { %3888 = vmatpush.bf16.msra.mxu2 %v10036_v43  ;;  %3901 = vmatpush.bf16.msra.mxu3 %v10037_v24 }
 0x5bc   : > { %v3078_v58 = vpop.f32.mrf.mxu0  ;;  %v3091_v10 = vpop.f32.mrf.mxu1 }
 0x5bd   : > { %v3125_v16 = vrot.slane %v3078_v58, 3  ;;  %v3129_v40 = vrot.slane %v3078_v58, 4  ;;  %v3133_v46 = vrot.slane %v3078_v58, 5  ;;  %v3137_v7 = vrot.slane %v3078_v58, 6 }
 0x5be   : > { %v3126_v6 = vrot.slane %v3091_v10, 3  ;;  %v3130_v4 = vrot.slane %v3091_v10, 4  ;;  %v3134_v52 = vrot.slane %v3091_v10, 5  ;;  %v3138_v45 = vrot.slane %v3091_v10, 6 }
 0x5bf   : > { %v3157_v11 = vadd.f32 %v3125_v16, %v10038_v20  ;;  %v3161_v61 = vadd.f32 %v3129_v40, %v10039_v35  ;;  %v3165_v21 = vadd.f32 %v3133_v46, %v10040_v27  ;;  %v3169_v18 = vadd.f32 %v3137_v7, %v10041_v33 }
 0x5c0   : > { %v3158_v19 = vadd.f32 %v3126_v6, %v10042_v3  ;;  %v3162_v26 = vadd.f32 %v3130_v4, %v10043_v48  ;;  %v3166_v28 = vadd.f32 %v3134_v52, %v10044_v8  ;;  %v3170_v1 = vadd.f32 %v3138_v45, %v10045_v13  ;;  %v10046_v4 = vld [vmem:[#allocation17_spill] sm:$0xff] }
 0x5c1   : > { %v4900_v14 = vmul.f32 -1.442695, %v3157_v11  ;;  %v4901_v51 = vmul.f32 -1.442695, %v3161_v61  ;;  %v4902_v2 = vmul.f32 -1.442695, %v3165_v21 }
 0x5c2   : > { %v4903_v31 = vmul.f32 -1.442695, %v3169_v18  ;;  %v4904_v44 = vmul.f32 -1.442695, %v3158_v19  ;;  %v4905_v22 = vmul.f32 -1.442695, %v3162_v26 }
 0x5c3   : > { %5483 = vpow2.f32 %v4900_v14  ;;  %v8391_v50 = vpop.f32.mrf.mxu2  ;;  %v3117_v29 = vpop.f32.mrf.mxu3  ;;  %v4906_v62 = vmul.f32 -1.442695, %v3166_v28  ;;  %v4907_v57 = vmul.f32 -1.442695, %v3170_v1  ;;  %v10047_v11 = vld [vmem:[#allocation18_spill] sm:$0xff]  ;;  %v10048_v21 = vld [vmem:[#allocation20_spill] sm:$0xff] }
 0x5c4   : > { %5485 = vpow2.f32 %v4901_v51  ;;  %v3080_v55 = vpop.f32.mrf.mxu0  ;;  %v3093_v60 = vpop.f32.mrf.mxu1  ;;  %v3127_v63 = vrot.slane %v8391_v50, 3  ;;  %v3128_v25 = vrot.slane %v3117_v29, 3  ;;  %v3132_v49 = vrot.slane %v3117_v29, 4  ;;  %v10049_v26 = vld [vmem:[#allocation26_spill] sm:$0xff]  ;;  %v10050_v51 = vld [vmem:[#allocation37_spill] sm:$0xff] }
 0x5c5   : > { %5487 = vpow2.f32 %v4902_v2  ;;  %v3136_v24 = vrot.slane %v3117_v29, 5  ;;  %v3140_v58 = vrot.slane %v3117_v29, 6  ;;  %v3131_v16 = vrot.slane %v8391_v50, 4  ;;  %v10052_v60 = vld [vmem:[#allocation25_spill] sm:$0xff] }
 0x5c6   : > { %5489 = vpow2.f32 %v4903_v31  ;;  %v3135_v40 = vrot.slane %v8391_v50, 5  ;;  %v3139_v6 = vrot.slane %v8391_v50, 6  ;;  %v3159_v52 = vadd.f32 %v3127_v63, %v10046_v4 }
 0x5c7   : > { %5491 = vpow2.f32 %v4904_v44  ;;  %v3160_v61 = vadd.f32 %v3128_v25, %v10047_v11  ;;  %v3164_v18 = vadd.f32 %v3132_v49, %v10048_v21  ;;  %v3168_v14 = vadd.f32 %v3136_v24, %v10049_v26 }
 0x5c8   : > { %5493 = vpow2.f32 %v4905_v22  ;;  %v3172_v2 = vadd.f32 %v3140_v58, %v10050_v51  ;;  %v10051_v22 = vld [vmem:[#allocation19_spill] sm:$0xff] }
 0x5c9   : > { %v5484_v17 = vpop.eup %5483  ;;  %5495 = vpow2.f32 %v4906_v62  ;;  %v8442_v55 = vadd.f32 %v3131_v16, %v10051_v22  ;;  %v8445_v62 = vadd.f32 %v3135_v40, %v10052_v60 }
 0x5ca   : > { %v5486_v30 = vpop.eup %5485  ;;  %v8393_v34 = vadd.f32 1.0, %v5484_v17  ;;  %5497 = vpow2.f32 %v4907_v57  ;;  %v10053_v57 = vld [vmem:[#allocation35_spill] sm:$0xff] }
 0x5cb   : > { %v5488_v37 = vpop.eup %5487  ;;  %v8395_v41 = vadd.f32 1.0, %v5486_v30  ;;  %v3106_v42 = vpop.f32.mrf.mxu2  ;;  %v8448_v17 = vadd.f32 %v3139_v6, %v10053_v57 }
 0x5cc   : > { %v3119_v47 = vpop.f32.mrf.mxu3  ;;  %v5490_v53 = vpop.eup %5489  ;;  %v8397_v56 = vadd.f32 1.0, %v5488_v37  ;;  %5499 = vrcp.f32 %v8393_v34  ;;  %v8454_v42 = vmul.f32 -1.442695, %v3160_v61  ;;  %vm3194_vm7 = vweird.f32 %v8393_v34 }
 0x5cd   : > { %v5492_v59 = vpop.eup %5491  ;;  %v8400_v0 = vadd.f32 1.0, %v5490_v53  ;;  %5501 = vrcp.f32 %v8395_v41  ;;  %v8456_v47 = vmul.f32 -1.442695, %v3164_v18  ;;  %v3200_v25 = vand.u32 2147483648, %v8393_v34 }
 0x5ce   : > { %v5494_v12 = vpop.eup %5493  ;;  %v8403_v23 = vadd.f32 1.0, %v5492_v59  ;;  %5503 = vrcp.f32 %v8397_v56  ;;  %v3198_v59 = vand.u32 2147483647, %v8393_v34  ;;  %vm3209_vm11 = vweird.f32 %v8395_v41 }
 0x5cf   : > { %v5496_v15 = vpop.eup %5495  ;;  %v8406_v9 = vadd.f32 1.0, %v5494_v12  ;;  %5505 = vrcp.f32 %v8400_v0  ;;  %v8462_v12 = vmul.f32 -1.442695, %v3168_v14  ;;  %v3213_v40 = vand.u32 2147483647, %v8395_v41 }
 0x5d0   : > { %v5498_v38 = vpop.eup %5497  ;;  %v8409_v32 = vadd.f32 1.0, %v5496_v15  ;;  %5507 = vrcp.f32 %v8403_v23  ;;  %v8464_v15 = vmul.f32 -1.442695, %v3172_v2  ;;  %v3276_v16 = vand.u32 2147483648, %v8403_v23 }
 0x5d1   : > { %v8412_v43 = vadd.f32 1.0, %v5498_v38  ;;  %5509 = vrcp.f32 %v8406_v9  ;;  %vm8498_vm15 = vcmp.eq.f32.partialorder %v3198_v59, 8.507059e+37  ;;  %v3201_v60 = vor.u32 1.1754944e-38, %v3200_v25 }
 0x5d2   : > { %v8414_v10 = vpop.eup %5499  ;;  %5511 = vrcp.f32 %v8409_v32  ;;  %v3306_v61 = vand.u32 2147483648, %v8409_v32  ;;  %v8496_v28 = vor.u32 1.1754944e-38, %v3276_v16  ;;  %vm3270_vm8 = vweird.f32 %v8403_v23 }
 0x5d3   : > { %v8419_v46 = vpop.eup %5501  ;;  %v3190_v7 = vmul.f32 %v8414_v10, %v8393_v34  ;;  %5513 = vrcp.f32 %v8412_v43  ;;  %v3321_v2 = vand.u32 2147483648, %v8412_v43  ;;  %vm3195_vm14 = vweird.f32 %v8414_v10 }
 0x5d4   : > { %v3205_v45 = vmul.f32 %v8419_v46, %v8395_v41  ;;  %v8431_v19 = vpop.eup %5503  ;;  %5515 = vtanh.f32 %v3159_v52  ;;  %vm3210_vm6 = vweird.f32 %v8419_v46  ;;  %v8505_v26 = vor.u32 1.1754944e-38, %v3306_v61  ;;  %vm8509_vm3 = vmor %vm3194_vm7, %vm3195_vm14 }
 0x5d5   : > { %v3191_v1 = vsub.f32 1.0, %v3190_v7  ;;  %v8438_v50 = vpop.eup %5505  ;;  %v3220_v37 = vmul.f32 %v8431_v19, %v8397_v56  ;;  %v3215_v7 = vand.u32 2147483648, %v8395_v41  ;;  %vm3285_vm1 = vweird.f32 %v8406_v9  ;;  %vm8521_vm10 = vmor %vm3209_vm11, %vm3210_vm6 }
 0x5d6   : > { %v3206_v44 = vsub.f32 1.0, %v3205_v45  ;;  %v8450_v30 = vpop.eup %5507  ;;  %v3291_v45 = vand.u32 2147483648, %v8406_v9  ;;  %v3235_v18 = vmul.f32 %v8438_v50, %v8400_v0  ;;  %v8515_v25 = vor.u32 1.1754944e-38, %v3321_v2 }
 0x5d7   : > { %v8458_v53 = vpop.eup %5509  ;;  %v3192_v38 = vmul.f32 %v8414_v10, %v3191_v1  ;;  %v3266_v58 = vmul.f32 %v8450_v30, %v8403_v23  ;;  %v3221_v6 = vsub.f32 1.0, %v3220_v37  ;;  %vm8525_vm2 = vcmp.eq.f32.partialorder %v3213_v40, 8.507059e+37 }
 0x5d8   : > { %v8466_v63 = vpop.eup %5511  ;;  %v3207_v49 = vmul.f32 %v8419_v46, %v3206_v44  ;;  %v3281_v52 = vmul.f32 %v8458_v53, %v8406_v9  ;;  %v8503_v51 = vor.u32 1.1754944e-38, %v3291_v45  ;;  %v3236_v59 = vsub.f32 1.0, %v3235_v18 }
 0x5d9   : > { %v8472_v24 = vpop.eup %5513  ;;  %v3296_v14 = vmul.f32 %v8466_v63, %v8409_v32  ;;  %v3193_v37 = vadd.f32 %v8414_v10, %v3192_v38  ;;  %v3267_v31 = vsub.f32 1.0, %v3266_v58  ;;  %vm3300_vm12 = vweird.f32 %v8409_v32 }
 0x5da   : > { %v8489_v1 = vpop.eup %5515  ;;  %v3311_v44 = vmul.f32 %v8472_v24, %v8412_v43  ;;  %v3208_v29 = vadd.f32 %v8419_v46, %v3207_v49  ;;  %v3282_v22 = vsub.f32 1.0, %v3281_v52  ;;  %v3222_v49 = vmul.f32 %v8431_v19, %v3221_v6 }
 0x5db   : > { %v3297_v58 = vsub.f32 1.0, %v3296_v14  ;;  %v3197_v52 = vsel %vm8509_vm3, %v8414_v10, %v3193_v37  ;;  %v3216_v41 = vor.u32 1.1754944e-38, %v3215_v7  ;;  %v3268_v61 = vmul.f32 %v8450_v30, %v3267_v31 }
 0x5dc   : > { %v3312_v6 = vsub.f32 1.0, %v3311_v44  ;;  %v3212_v45 = vsel %vm8521_vm10, %v8419_v46, %v3208_v29  ;;  %vm3271_vm9 = vweird.f32 %v8450_v30  ;;  %vm3286_vm5 = vweird.f32 %v8458_v53 }
 0x5dd   : > { %vm3301_vm4 = vweird.f32 %v8466_v63  ;;  %v3283_v40 = vmul.f32 %v8458_v53, %v3282_v22  ;;  %vm3315_vm13 = vweird.f32 %v8412_v43  ;;  %vm3316_vm7 = vweird.f32 %v8472_v24  ;;  %vm8575_vm10 = vmor %vm3270_vm8, %vm3271_vm9 }
 0x5de   : > { %v3223_v10 = vadd.f32 %v8431_v19, %v3222_v49  ;;  %vm3225_vm11 = vweird.f32 %v8431_v19  ;;  %v3298_v46 = vmul.f32 %v8466_v63, %v3297_v58  ;;  %v3202_v31 = vsel %vm8498_vm15, %v3201_v60, %v3197_v52  ;;  %vm8599_vm8 = vmor %vm3300_vm12, %vm3301_vm4 }
 0x5df   : > { %v8550_v29 = vsel %vm8525_vm2, %v3216_v41, %v3212_v45  ;;  %v3237_v7 = vmul.f32 %v8438_v50, %v3236_v59  ;;  %v3313_v22 = vmul.f32 %v8472_v24, %v3312_v6  ;;  %vm3224_vm14 = vweird.f32 %v8397_v56  ;;  %vm8587_vm2 = vmor %vm3285_vm1, %vm3286_vm5 }
 0x5e0   : > { %v3228_v18 = vand.u32 2147483647, %v8397_v56  ;;  %v3230_v14 = vand.u32 2147483648, %v8397_v56  ;;  %vm8557_vm6 = vmor %vm3224_vm14, %vm3225_vm11  ;;  %vm3239_vm15 = vweird.f32 %v8400_v0  ;;  %vm3240_vm3 = vweird.f32 %v8438_v50 }
 0x5e1   : > { %v3269_v60 = vadd.f32 %v8450_v30, %v3268_v61  ;;  %5517 = vtanh.f32 %v8442_v55  ;;  %v3227_v57 = vsel %vm8557_vm6, %v8431_v19, %v3223_v10  ;;  %v3243_v44 = vand.u32 2147483647, %v8400_v0  ;;  %vm8616_vm12 = vmor %vm3239_vm15, %vm3240_vm3 }
 0x5e2   : > { %v3284_v56 = vadd.f32 %v8458_v53, %v3283_v40  ;;  %5519 = vtanh.f32 %v8445_v62  ;;  %v3238_v55 = vadd.f32 %v8438_v50, %v3237_v7  ;;  %v3274_v38 = vand.u32 2147483647, %v8403_v23  ;;  %vm8629_vm9 = vmor %vm3315_vm13, %vm3316_vm7 }
 0x5e3   : > { %v3299_v19 = vadd.f32 %v8466_v63, %v3298_v46  ;;  %5521 = vpow2.f32 %v8454_v42  ;;  %v3245_v49 = vand.u32 2147483648, %v8400_v0  ;;  %v3289_v59 = vand.u32 2147483647, %v8406_v9 }
 0x5e4   : > { %v3314_v58 = vadd.f32 %v8472_v24, %v3313_v22  ;;  %5523 = vpow2.f32 %v8456_v47  ;;  %vm8603_vm1 = vcmp.eq.f32.partialorder %v3228_v18, 8.507059e+37  ;;  %v3273_v9 = vsel %vm8575_vm10, %v8450_v30, %v3269_v60 }
 0x5e5   : > { %v3304_v16 = vand.u32 2147483647, %v8409_v32  ;;  %5525 = vtanh.f32 %v8448_v17  ;;  %v3231_v47 = vor.u32 1.1754944e-38, %v3230_v14  ;;  %v3288_v6 = vsel %vm8587_vm2, %v8458_v53, %v3284_v56 }
 0x5e6   : > { %v3319_v52 = vand.u32 2147483647, %v8412_v43  ;;  %5527 = vpow2.f32 %v8462_v12  ;;  %v3242_v0 = vsel %vm8616_vm12, %v8438_v50, %v3238_v55  ;;  %vm3275_vm5 = vcmp.eq.f32.partialorder %v3274_v38, 8.507059e+37 }
 0x5e7   : > { %v5518_v32 = vpop.eup %5517  ;;  %v3303_v30 = vsel %vm8599_vm8, %v8466_v63, %v3299_v19  ;;  %5529 = vpow2.f32 %v8464_v15  ;;  %v3246_v12 = vor.u32 1.1754944e-38, %v3245_v49  ;;  %v3278_v45 = vsel %vm3275_vm5, %v8496_v28, %v3273_v9 }
 0x5e8   : > { %v5520_v53 = vpop.eup %5519  ;;  %vm3290_vm4 = vcmp.eq.f32.partialorder %v3289_v59, 8.507059e+37  ;;  %v3318_v43 = vsel %vm8629_vm9, %v8472_v24, %v3314_v58  ;;  %v3232_v50 = vsel %vm8603_vm1, %v3231_v47, %v3227_v57  ;;  %vm3244_vm13 = vcmp.eq.f32.partialorder %v3243_v44, 8.507059e+37 }
 0x5e9   : > { %v5522_v41 = vpop.eup %5521  ;;  %v3293_v61 = vsel %vm3290_vm4, %v8503_v51, %v3288_v6  ;;  %vm3305_vm7 = vcmp.eq.f32.partialorder %v3304_v16, 8.507059e+37  ;;  %v3247_v40 = vsel %vm3244_vm13, %v3246_v12, %v3242_v0  ;;  %vm3320_vm11 = vcmp.eq.f32.partialorder %v3319_v52, 8.507059e+37 }
 0x5ea   : > { %v5524_v63 = vpop.eup %5523  ;;  %v3308_v15 = vsel %vm3305_vm7, %v8505_v26, %v3303_v30  ;;  %v8648_v10 = vadd.f32 1.0, %v5522_v41  ;;  %v3323_v46 = vsel %vm3320_vm11, %v8515_v25, %v3318_v43  ;;  %v10076_v24 = vrot.slane %v8298_v39, 7 }
 0x5eb   : > { %v5526_v28 = vpop.eup %5525  ;;  %v3421_v22 = vmul.f32 %v8489_v1, %v3202_v31  ;;  %v8654_v18 = vadd.f32 1.0, %v5524_v63  ;;  %v3412_v51 = vrot.slane %v8307_v54, 7  ;;  %v10077_v2 = vrot.slane %v8301_v5, 7 }
 0x5ec   : > { %v3417_v7 = vmul.f32 %v10076_v24, %v3278_v45  ;;  %v5528_v14 = vpop.eup %5527  ;;  %v3422_v26 = vmul.f32 %v5518_v32, %v8550_v29  ;;  %v10078_v44 = vrot.slane %v8304_v36, 7  ;;  %v3423_v25 = vmul.f32 %v5520_v53, %v3232_v50 }
 0x5ed   : > { %v3418_v60 = vmul.f32 %v10077_v2, %v3293_v61  ;;  %v5530_v57 = vpop.eup %5529  ;;  %v8662_v37 = vadd.f32 1.0, %v5528_v14  ;;  %v3420_v39 = vmul.f32 %v3412_v51, %v3323_v46  ;;  %v3424_v55 = vmul.f32 %v5526_v28, %v3247_v40 }
 0x5ee   : > { %v3419_v56 = vmul.f32 %v10078_v44, %v3308_v15  ;;  %v8664_v1 = vadd.f32 1.0, %v5530_v57  ;;  %5531 = vrcp.f32 %v8648_v10  ;;  %v8667_v31 = vadd.f32 %v3421_v22, %v3417_v7 }
 0x5ef   : > { %5533 = vrcp.f32 %v8654_v18  ;;  %v8670_v5 = vadd.f32 %v3422_v26, %v3418_v60  ;;  %v8676_v36 = vadd.f32 %v3424_v55, %v3420_v39  ;;  %v3356_v29 = vand.u32 2147483648, %v8648_v10 }
 0x5f0   : > { %5535 = vrcp.f32 %v8662_v37  ;;  %v8673_v54 = vadd.f32 %v3423_v25, %v3419_v56  ;;  %v3354_v19 = vand.u32 2147483647, %v8648_v10  ;;  %v3369_v62 = vand.u32 2147483647, %v8654_v18 }
 0x5f1   : > { %5537 = vrcp.f32 %v8664_v1  ;;  %vm3350_vm14 = vweird.f32 %v8648_v10  ;;  %v3371_v58 = vand.u32 2147483648, %v8654_v18  ;;  %v3357_v42 = vor.u32 1.1754944e-38, %v3356_v29 }
 0x5f2   : > { %5539 = vtanh.f32 %v8667_v31  ;;  %vm3365_vm6 = vweird.f32 %v8654_v18  ;;  %vm3380_vm15 = vweird.f32 %v8662_v37  ;;  %v3386_v6 = vand.u32 2147483648, %v8662_v37 }
 0x5f3   : > { %5541 = vtanh.f32 %v8670_v5  ;;  %vm8694_vm3 = vcmp.eq.f32.partialorder %v3354_v19, 8.507059e+37  ;;  %vm8698_vm10 = vcmp.eq.f32.partialorder %v3369_v62, 8.507059e+37  ;;  %v3372_v12 = vor.u32 1.1754944e-38, %v3371_v58 }
 0x5f4   : > { %v5532_v38 = vpop.eup %5531  ;;  %5543 = vtanh.f32 %v8673_v54  ;;  %v3384_v61 = vand.u32 2147483647, %v8662_v37  ;;  %v3401_v28 = vand.u32 2147483648, %v8664_v1  ;;  %v3399_v22 = vand.u32 2147483647, %v8664_v1 }
 0x5f5   : > { %v5534_v49 = vpop.eup %5533  ;;  %v3346_v59 = vmul.f32 %v5532_v38, %v8648_v10  ;;  %5545 = vtanh.f32 %v8676_v36  ;;  %vm3351_vm2 = vweird.f32 %v5532_v38  ;;  %v3387_v2 = vor.u32 1.1754944e-38, %v3386_v6 }
 0x5f6   : > { %v5536_v23 = vpop.eup %5535  ;;  %v3361_v9 = vmul.f32 %v5534_v49, %v8654_v18  ;;  %vm3366_vm8 = vweird.f32 %v5534_v49  ;;  %vm3352_vm12 = vmor %vm3350_vm14, %vm3351_vm2  ;;  %vm3395_vm4 = vweird.f32 %v8664_v1  ;;  %vm3385_vm7 = vcmp.eq.f32.partialorder %v3384_v61, 8.507059e+37 }
 0x5f7   : > { %v5538_v16 = vpop.eup %5537  ;;  %v3347_v47 = vsub.f32 1.0, %v3346_v59  ;;  %v3376_v34 = vmul.f32 %v5536_v23, %v8662_v37  ;;  %vm3381_vm1 = vweird.f32 %v5536_v23  ;;  %vm3367_vm5 = vmor %vm3365_vm6, %vm3366_vm8  ;;  %v3402_v44 = vor.u32 1.1754944e-38, %v3401_v28 }
 0x5f8   : > { %v3362_v52 = vsub.f32 1.0, %v3361_v9  ;;  %v3391_v32 = vmul.f32 %v5538_v16, %v8664_v1  ;;  %v5540_v30 = vpop.eup %5539  ;;  %vm3396_vm9 = vweird.f32 %v5538_v16  ;;  %vm3382_vm13 = vmor %vm3380_vm15, %vm3381_vm1  ;;  %vm3400_vm14 = vcmp.eq.f32.partialorder %v3399_v22, 8.507059e+37 }
 0x5f9   : > { %v3348_v53 = vmul.f32 %v5532_v38, %v3347_v47  ;;  %v3377_v45 = vsub.f32 1.0, %v3376_v34  ;;  %v5542_v43 = vpop.eup %5541  ;;  %vm3397_vm11 = vmor %vm3395_vm4, %vm3396_vm9  ;;  %vm10083_vm6 = vcmask 1042434   ;;  %vm10084_vm15 = vcmask 1043459  }
 0x5fa   : > { %v3363_v41 = vmul.f32 %v5534_v49, %v3362_v52  ;;  %v3392_v50 = vsub.f32 1.0, %v3391_v32  ;;  %v5544_v63 = vpop.eup %5543 }
 0x5fb   : > { %v3378_v40 = vmul.f32 %v5536_v23, %v3377_v45  ;;  %v3349_v15 = vadd.f32 %v5532_v38, %v3348_v53  ;;  %v5546_v46 = vpop.eup %5545 }
 0x5fc   : > { %v3364_v24 = vadd.f32 %v5534_v49, %v3363_v41  ;;  %v3393_v7 = vmul.f32 %v5538_v16, %v3392_v50 }
 0x5fd   : > { %v3353_v14 = vsel %vm3352_vm12, %v5532_v38, %v3349_v15  ;;  %v3379_v51 = vadd.f32 %v5536_v23, %v3378_v40 }
 0x5fe   : > { %v3358_v60 = vsel %vm8694_vm3, %v3357_v42, %v3353_v14  ;;  %v3368_v26 = vsel %vm3367_vm5, %v5534_v49, %v3364_v24  ;;  %v3394_v10 = vadd.f32 %v5538_v16, %v3393_v7 }
 0x5ff   : > { %v3373_v57 = vsel %vm8698_vm10, %v3372_v12, %v3368_v26  ;;  %v3383_v18 = vsel %vm3382_vm13, %v5536_v23, %v3379_v51  ;;  %v3433_v56 = vmul.f32 %v5540_v30, %v3358_v60 }
 0x600   : > { %v3388_v25 = vsel %vm3385_vm7, %v3387_v2, %v3383_v18  ;;  %v3398_v39 = vsel %vm3397_vm11, %v5538_v16, %v3394_v10  ;;  %v3434_v55 = vmul.f32 %v5542_v43, %v3373_v57 }
 0x601   : > { %v3403_v1 = vsel %vm3400_vm14, %v3402_v44, %v3398_v39  ;;  %v3435_v29 = vmul.f32 %v5544_v63, %v3388_v25  ;;  %3437 = vst [vmem:[#allocation2 + $0x10] sm:$0x20] %v3433_v56  ;;  %v3441_v38 = vpack.c.bf16 %v3433_v56, %v3433_v56 }
 0x602   : > { %v3436_v19 = vmul.f32 %v5546_v46, %v3403_v1  ;;  %3438 = vst [vmem:[#allocation2] sm:$0x20] %v3434_v55  ;;  %v3442_v37 = vpack.c.bf16 %v3434_v55, %v3434_v55 }
 0x603   : > { %3439 = vst [vmem:[#allocation2 + $0x18] sm:$0x20] %v3435_v29  ;;  %v3443_v62 = vpack.c.bf16 %v3435_v29, %v3435_v29  ;;  %v3449_v49 = vunpack.c.l.b16 %v3441_v38 }
 0x604   : > { %3440 = vst [vmem:[#allocation2 + $0x8] sm:$0x20] %v3436_v19  ;;  %v3444_v59 = vpack.c.bf16 %v3436_v19, %v3436_v19  ;;  %v3450_v58 = vunpack.c.l.b16 %v3442_v37 }
 0x605   : > { %v3451_v23 = vunpack.c.l.b16 %v3443_v62  ;;  %v3453_v42 = vrot.slane %v3449_v49, 5 }
 0x606   : > { %v3452_v9 = vunpack.c.l.b16 %v3444_v59  ;;  %v3454_v47 = vrot.slane %v3450_v58, 4 }
 0x607   : > { %v3456_v16 = vrot.slane %v3451_v23, 3 }
 0x608   : > { %v3455_v34 = vsel %vm842_vm0, %v3454_v47, %v3453_v42  ;;  %v3458_v6 = vrot.slane %v3452_v9, 2 }
 0x609   : > { %v3457_v52 = vsel %vm10083_vm6, %v3456_v16, %v3455_v34 }
 0x60a   : > { %v3459_v32 = vsel %vm10084_vm15, %v3458_v6, %v3457_v52 }
 0x60b   : > { %v3460_v17 = vpack.c.b16 %v3459_v32, %v3459_v32 }
 0x60d   : > { %3470 = vmatmul.bf16.vlgmr.msrb.gmra.mxu0 %v3460_v17  ;;  %3483 = vmatmul.bf16.vlgmr.msrb.gmra.mxu1 %v3460_v17 }
 0x60e   : > { %3496 = vmatmul.bf16.vlgmr.msrb.gmra.mxu2 %v3460_v17  ;;  %3509 = vmatmul.bf16.vlgmr.msrb.gmra.mxu3 %v3460_v17 }
 0x68a   : > { %v3471_v0 = vpop.f32.mrf.mxu0  ;;  %v3484_v30 = vpop.f32.mrf.mxu1 }
 0x68b   : > { %v3518_v53 = vrot.slane %v3471_v0, 2  ;;  %v3522_v12 = vrot.slane %v3471_v0, 3  ;;  %v3526_v45 = vrot.slane %v3471_v0, 4  ;;  %v3530_v43 = vrot.slane %v3471_v0, 5 }
 0x68c   : > { %v3519_v41 = vrot.slane %v3484_v30, 2  ;;  %v3523_v50 = vrot.slane %v3484_v30, 3  ;;  %v3527_v61 = vrot.slane %v3484_v30, 4  ;;  %v3531_v63 = vrot.slane %v3484_v30, 5 }
 0x68d   : > { %v3550_v40 = vadd.f32 %v3518_v53, %v10038_v20  ;;  %v3554_v15 = vadd.f32 %v3522_v12, %v10039_v35  ;;  %v3558_v28 = vadd.f32 %v3526_v45, %v10040_v27  ;;  %v3562_v46 = vadd.f32 %v3530_v43, %v10041_v33 }
 0x68e   : > { %v3551_v24 = vadd.f32 %v3519_v41, %v10042_v3  ;;  %v3555_v7 = vadd.f32 %v3523_v50, %v10043_v48  ;;  %v3559_v2 = vadd.f32 %v3527_v61, %v10044_v8  ;;  %v3563_v26 = vadd.f32 %v3531_v63, %v10045_v13 }
 0x68f   : > { %v4912_v22 = vmul.f32 -1.442695, %v3550_v40  ;;  %v4913_v14 = vmul.f32 -1.442695, %v3554_v15  ;;  %v4914_v51 = vmul.f32 -1.442695, %v3558_v28 }
 0x690   : > { %v4915_v60 = vmul.f32 -1.442695, %v3562_v46  ;;  %v4916_v10 = vmul.f32 -1.442695, %v3551_v24  ;;  %v4917_v44 = vmul.f32 -1.442695, %v3555_v7 }
 0x691   : > { %5547 = vpow2.f32 %v4912_v22  ;;  %v8728_v57 = vpop.f32.mrf.mxu2  ;;  %v3510_v18 = vpop.f32.mrf.mxu3  ;;  %v4918_v39 = vmul.f32 -1.442695, %v3559_v2  ;;  %v4919_v55 = vmul.f32 -1.442695, %v3563_v26  ;;  %v10085_v7 = vld [vmem:[#allocation26_spill] sm:$0xff] }
 0x692   : > { %5549 = vpow2.f32 %v4913_v14  ;;  %v3473_v56 = vpop.f32.mrf.mxu0  ;;  %v3486_v25 = vpop.f32.mrf.mxu1  ;;  %v3520_v6 = vrot.slane %v8728_v57, 2  ;;  %v3521_v17 = vrot.slane %v3510_v18, 2  ;;  %v3525_v0 = vrot.slane %v3510_v18, 3  ;;  %v10086_v14 = vld [vmem:[#allocation37_spill] sm:$0xff] }
 0x693   : > { %5551 = vpow2.f32 %v4914_v51  ;;  %v3529_v53 = vrot.slane %v3510_v18, 4  ;;  %v3533_v12 = vrot.slane %v3510_v18, 5  ;;  %v3524_v43 = vrot.slane %v8728_v57, 3  ;;  %v10088_v25 = vld [vmem:[#allocation25_spill] sm:$0xff] }
 0x694   : > { %5553 = vpow2.f32 %v4915_v60  ;;  %v3528_v41 = vrot.slane %v8728_v57, 4  ;;  %v3532_v63 = vrot.slane %v8728_v57, 5  ;;  %v3552_v40 = vadd.f32 %v3520_v6, %v10046_v4 }
 0x695   : > { %5555 = vpow2.f32 %v4916_v10  ;;  %v3553_v28 = vadd.f32 %v3521_v17, %v10047_v11  ;;  %v3557_v46 = vadd.f32 %v3525_v0, %v10048_v21  ;;  %v3561_v22 = vadd.f32 %v3529_v53, %v10085_v7 }
 0x696   : > { %5557 = vpow2.f32 %v4917_v44  ;;  %v3565_v51 = vadd.f32 %v3533_v12, %v10086_v14  ;;  %v10087_v44 = vld [vmem:[#allocation19_spill] sm:$0xff] }
 0x697   : > { %v5548_v1 = vpop.eup %5547  ;;  %5559 = vpow2.f32 %v4918_v39  ;;  %v8779_v56 = vadd.f32 %v3524_v43, %v10087_v44  ;;  %v8782_v39 = vadd.f32 %v3528_v41, %v10088_v25 }
 0x698   : > { %v5550_v29 = vpop.eup %5549  ;;  %v8730_v38 = vadd.f32 1.0, %v5548_v1  ;;  %5561 = vpow2.f32 %v4919_v55  ;;  %v10089_v55 = vld [vmem:[#allocation35_spill] sm:$0xff] }
 0x699   : > { %v5552_v19 = vpop.eup %5551  ;;  %v8732_v37 = vadd.f32 1.0, %v5550_v29  ;;  %v3499_v62 = vpop.f32.mrf.mxu2  ;;  %v8785_v1 = vadd.f32 %v3532_v63, %v10089_v55 }
 0x69a   : > { %v3512_v49 = vpop.f32.mrf.mxu3  ;;  %v5554_v59 = vpop.eup %5553  ;;  %v8734_v58 = vadd.f32 1.0, %v5552_v19  ;;  %5563 = vrcp.f32 %v8730_v38  ;;  %v8791_v62 = vmul.f32 -1.442695, %v3553_v28  ;;  %vm3587_vm3 = vweird.f32 %v8730_v38 }
 0x69b   : > { %v5556_v23 = vpop.eup %5555  ;;  %v8737_v42 = vadd.f32 1.0, %v5554_v59  ;;  %5565 = vrcp.f32 %v8732_v37  ;;  %v8793_v49 = vmul.f32 -1.442695, %v3557_v46  ;;  %v3593_v17 = vand.u32 2147483648, %v8730_v38 }
 0x69c   : > { %v5558_v9 = vpop.eup %5557  ;;  %v8740_v47 = vadd.f32 1.0, %v5556_v23  ;;  %5567 = vrcp.f32 %v8734_v58  ;;  %v3591_v23 = vand.u32 2147483647, %v8730_v38  ;;  %vm3602_vm10 = vweird.f32 %v8732_v37 }
 0x69d   : > { %v5560_v16 = vpop.eup %5559  ;;  %v8743_v34 = vadd.f32 1.0, %v5558_v9  ;;  %5569 = vrcp.f32 %v8737_v42  ;;  %v8799_v9 = vmul.f32 -1.442695, %v3561_v22  ;;  %v3606_v41 = vand.u32 2147483647, %v8732_v37 }
 0x69e   : > { %v5562_v52 = vpop.eup %5561  ;;  %v8746_v32 = vadd.f32 1.0, %v5560_v16  ;;  %5571 = vrcp.f32 %v8740_v47  ;;  %v8801_v16 = vmul.f32 -1.442695, %v3565_v51  ;;  %v3669_v43 = vand.u32 2147483648, %v8740_v47 }
 0x69f   : > { %v8749_v30 = vadd.f32 1.0, %v5562_v52  ;;  %5573 = vrcp.f32 %v8743_v34  ;;  %vm8835_vm1 = vcmp.eq.f32.partialorder %v3591_v23, 8.507059e+37  ;;  %v3594_v25 = vor.u32 1.1754944e-38, %v3593_v17 }
 0x6a0   : > { %v8751_v45 = vpop.eup %5563  ;;  %5575 = vrcp.f32 %v8746_v32  ;;  %v3699_v28 = vand.u32 2147483648, %v8746_v32  ;;  %v8833_v2 = vor.u32 1.1754944e-38, %v3669_v43  ;;  %vm3663_vm12 = vweird.f32 %v8740_v47 }
 0x6a1   : > { %v8756_v50 = vpop.eup %5565  ;;  %v3583_v61 = vmul.f32 %v8751_v45, %v8730_v38  ;;  %5577 = vrcp.f32 %v8749_v30  ;;  %v3714_v51 = vand.u32 2147483648, %v8749_v30  ;;  %vm3588_vm2 = vweird.f32 %v8751_v45 }
 0x6a2   : > { %v3598_v15 = vmul.f32 %v8756_v50, %v8732_v37  ;;  %v8768_v24 = vpop.eup %5567  ;;  %5579 = vtanh.f32 %v3552_v40  ;;  %vm3603_vm8 = vweird.f32 %v8756_v50  ;;  %v8842_v7 = vor.u32 1.1754944e-38, %v3699_v28  ;;  %vm8846_vm9 = vmor %vm3587_vm3, %vm3588_vm2 }
 0x6a3   : > { %v3584_v26 = vsub.f32 1.0, %v3583_v61  ;;  %v8775_v57 = vpop.eup %5569  ;;  %v3613_v19 = vmul.f32 %v8768_v24, %v8734_v58  ;;  %v3608_v61 = vand.u32 2147483648, %v8732_v37  ;;  %vm3678_vm5 = vweird.f32 %v8743_v34  ;;  %vm8858_vm4 = vmor %vm3602_vm10, %vm3603_vm8 }
 0x6a4   : > { %v3599_v10 = vsub.f32 1.0, %v3598_v15  ;;  %v8787_v29 = vpop.eup %5571  ;;  %v3684_v15 = vand.u32 2147483648, %v8743_v34  ;;  %v3628_v46 = vmul.f32 %v8775_v57, %v8737_v42  ;;  %v8852_v17 = vor.u32 1.1754944e-38, %v3714_v51 }
 0x6a5   : > { %v8795_v59 = vpop.eup %5573  ;;  %v3585_v52 = vmul.f32 %v8751_v45, %v3584_v26  ;;  %v3659_v12 = vmul.f32 %v8787_v29, %v8740_v47  ;;  %v3614_v63 = vsub.f32 1.0, %v3613_v19  ;;  %vm8862_vm13 = vcmp.eq.f32.partialorder %v3606_v41, 8.507059e+37 }
 0x6a6   : > { %v8803_v6 = vpop.eup %5575  ;;  %v3600_v0 = vmul.f32 %v8756_v50, %v3599_v10  ;;  %v3674_v40 = vmul.f32 %v8795_v59, %v8743_v34  ;;  %v8840_v14 = vor.u32 1.1754944e-38, %v3684_v15  ;;  %v3629_v23 = vsub.f32 1.0, %v3628_v46 }
 0x6a7   : > { %v8809_v53 = vpop.eup %5577  ;;  %v3689_v22 = vmul.f32 %v8803_v6, %v8746_v32  ;;  %v3586_v19 = vadd.f32 %v8751_v45, %v3585_v52  ;;  %v3660_v60 = vsub.f32 1.0, %v3659_v12  ;;  %vm3693_vm7 = vweird.f32 %v8746_v32 }
 0x6a8   : > { %v8826_v26 = vpop.eup %5579  ;;  %v3704_v10 = vmul.f32 %v8809_v53, %v8749_v30  ;;  %v3601_v18 = vadd.f32 %v8756_v50, %v3600_v0  ;;  %v3675_v44 = vsub.f32 1.0, %v3674_v40  ;;  %v3615_v0 = vmul.f32 %v8768_v24, %v3614_v63 }
 0x6a9   : > { %v3690_v12 = vsub.f32 1.0, %v3689_v22  ;;  %v3590_v40 = vsel %vm8846_vm9, %v8751_v45, %v3586_v19  ;;  %v3609_v37 = vor.u32 1.1754944e-38, %v3608_v61  ;;  %v3661_v28 = vmul.f32 %v8787_v29, %v3660_v60 }
 0x6aa   : > { %v3705_v63 = vsub.f32 1.0, %v3704_v10  ;;  %v3605_v15 = vsel %vm8858_vm4, %v8756_v50, %v3601_v18  ;;  %vm3664_vm11 = vweird.f32 %v8787_v29  ;;  %vm3679_vm14 = vweird.f32 %v8795_v59 }
 0x6ab   : > { %vm3694_vm6 = vweird.f32 %v8803_v6  ;;  %v3676_v41 = vmul.f32 %v8795_v59, %v3675_v44  ;;  %vm3708_vm15 = vweird.f32 %v8749_v30  ;;  %vm3709_vm3 = vweird.f32 %v8809_v53  ;;  %vm8912_vm4 = vmor %vm3663_vm12, %vm3664_vm11 }
 0x6ac   : > { %v3616_v45 = vadd.f32 %v8768_v24, %v3615_v0  ;;  %vm3618_vm10 = vweird.f32 %v8768_v24  ;;  %v3691_v50 = vmul.f32 %v8803_v6, %v3690_v12  ;;  %v3595_v60 = vsel %vm8835_vm1, %v3594_v25, %v3590_v40  ;;  %vm8936_vm12 = vmor %vm3693_vm7, %vm3694_vm6 }
 0x6ad   : > { %v8887_v18 = vsel %vm8862_vm13, %v3609_v37, %v3605_v15  ;;  %v3630_v61 = vmul.f32 %v8775_v57, %v3629_v23  ;;  %v3706_v44 = vmul.f32 %v8809_v53, %v3705_v63  ;;  %vm3617_vm2 = vweird.f32 %v8734_v58  ;;  %vm8924_vm13 = vmor %vm3678_vm5, %vm3679_vm14 }
 0x6ae   : > { %v3621_v46 = vand.u32 2147483647, %v8734_v58  ;;  %v3623_v22 = vand.u32 2147483648, %v8734_v58  ;;  %vm8894_vm8 = vmor %vm3617_vm2, %vm3618_vm10  ;;  %vm3632_vm1 = vweird.f32 %v8737_v42  ;;  %vm3633_vm9 = vweird.f32 %v8775_v57 }
 0x6af   : > { %v3662_v25 = vadd.f32 %v8787_v29, %v3661_v28  ;;  %5581 = vtanh.f32 %v8779_v56  ;;  %v3620_v55 = vsel %vm8894_vm8, %v8768_v24, %v3616_v45  ;;  %v3636_v10 = vand.u32 2147483647, %v8737_v42  ;;  %vm8953_vm7 = vmor %vm3632_vm1, %vm3633_vm9 }
 0x6b0   : > { %v3677_v58 = vadd.f32 %v8795_v59, %v3676_v41  ;;  %5583 = vtanh.f32 %v8782_v39  ;;  %v3631_v56 = vadd.f32 %v8775_v57, %v3630_v61  ;;  %v3667_v52 = vand.u32 2147483647, %v8740_v47  ;;  %vm8966_vm11 = vmor %vm3708_vm15, %vm3709_vm3 }
 0x6b1   : > { %v3692_v24 = vadd.f32 %v8803_v6, %v3691_v50  ;;  %5585 = vpow2.f32 %v8791_v62  ;;  %v3638_v0 = vand.u32 2147483648, %v8737_v42  ;;  %v3682_v23 = vand.u32 2147483647, %v8743_v34 }
 0x6b2   : > { %v3707_v12 = vadd.f32 %v8809_v53, %v3706_v44  ;;  %5587 = vpow2.f32 %v8793_v49  ;;  %vm8940_vm5 = vcmp.eq.f32.partialorder %v3621_v46, 8.507059e+37  ;;  %v3666_v34 = vsel %vm8912_vm4, %v8787_v29, %v3662_v25 }
 0x6b3   : > { %v3697_v43 = vand.u32 2147483647, %v8746_v32  ;;  %5589 = vtanh.f32 %v8785_v1  ;;  %v3624_v49 = vor.u32 1.1754944e-38, %v3623_v22  ;;  %v3681_v63 = vsel %vm8924_vm13, %v8795_v59, %v3677_v58 }
 0x6b4   : > { %v3712_v40 = vand.u32 2147483647, %v8749_v30  ;;  %5591 = vpow2.f32 %v8799_v9  ;;  %v3635_v42 = vsel %vm8953_vm7, %v8775_v57, %v3631_v56  ;;  %vm3668_vm14 = vcmp.eq.f32.partialorder %v3667_v52, 8.507059e+37 }
 0x6b5   : > { %v5582_v32 = vpop.eup %5581  ;;  %v3696_v29 = vsel %vm8936_vm12, %v8803_v6, %v3692_v24  ;;  %5593 = vpow2.f32 %v8801_v16  ;;  %v3639_v9 = vor.u32 1.1754944e-38, %v3638_v0  ;;  %v3671_v15 = vsel %vm3668_vm14, %v8833_v2, %v3666_v34 }
 0x6b6   : > { %v5584_v59 = vpop.eup %5583  ;;  %vm3683_vm6 = vcmp.eq.f32.partialorder %v3682_v23, 8.507059e+37  ;;  %v3711_v30 = vsel %vm8966_vm11, %v8809_v53, %v3707_v12  ;;  %v3625_v57 = vsel %vm8940_vm5, %v3624_v49, %v3620_v55  ;;  %vm3637_vm15 = vcmp.eq.f32.partialorder %v3636_v10, 8.507059e+37 }
 0x6b7   : > { %v5586_v37 = vpop.eup %5585  ;;  %v3686_v28 = vsel %vm3683_vm6, %v8840_v14, %v3681_v63  ;;  %vm3698_vm3 = vcmp.eq.f32.partialorder %v3697_v43, 8.507059e+37  ;;  %v3640_v41 = vsel %vm3637_vm15, %v3639_v9, %v3635_v42  ;;  %vm3713_vm10 = vcmp.eq.f32.partialorder %v3712_v40, 8.507059e+37 }
 0x6b8   : > { %v5588_v6 = vpop.eup %5587  ;;  %v3701_v16 = vsel %vm3698_vm3, %v8842_v7, %v3696_v29  ;;  %v8985_v45 = vadd.f32 1.0, %v5586_v37  ;;  %v3716_v50 = vsel %vm3713_vm10, %v8852_v17, %v3711_v30  ;;  %v10112_v53 = vrot.slane %v8667_v31, 7 }
 0x6b9   : > { %v5590_v2 = vpop.eup %5589  ;;  %v3814_v44 = vmul.f32 %v8826_v26, %v3595_v60  ;;  %v8991_v46 = vadd.f32 1.0, %v5588_v6  ;;  %v3805_v14 = vrot.slane %v8676_v36, 7  ;;  %v10113_v51 = vrot.slane %v8670_v5, 7 }
 0x6ba   : > { %v3810_v61 = vmul.f32 %v10112_v53, %v3671_v15  ;;  %v5592_v22 = vpop.eup %5591  ;;  %v3815_v7 = vmul.f32 %v5582_v32, %v8887_v18  ;;  %v10114_v10 = vrot.slane %v8673_v54, 7  ;;  %v3816_v17 = vmul.f32 %v5584_v59, %v3625_v57 }
 0x6bb   : > { %v3811_v25 = vmul.f32 %v10113_v51, %v3686_v28  ;;  %v5594_v55 = vpop.eup %5593  ;;  %v8999_v19 = vadd.f32 1.0, %v5592_v22  ;;  %v3813_v31 = vmul.f32 %v3805_v14, %v3716_v50  ;;  %v3817_v56 = vmul.f32 %v5590_v2, %v3640_v41 }
 0x6bc   : > { %v3812_v58 = vmul.f32 %v10114_v10, %v3701_v16  ;;  %v9001_v26 = vadd.f32 1.0, %v5594_v55  ;;  %5595 = vrcp.f32 %v8985_v45  ;;  %v9004_v60 = vadd.f32 %v3814_v44, %v3810_v61 }
 0x6bd   : > { %5597 = vrcp.f32 %v8991_v46  ;;  %v9007_v5 = vadd.f32 %v3815_v7, %v3811_v25  ;;  %v9013_v54 = vadd.f32 %v3817_v56, %v3813_v31  ;;  %v3749_v18 = vand.u32 2147483648, %v8985_v45 }
 0x6be   : > { %5599 = vrcp.f32 %v8999_v19  ;;  %v9010_v36 = vadd.f32 %v3816_v17, %v3812_v58  ;;  %v3747_v24 = vand.u32 2147483647, %v8985_v45  ;;  %v3762_v39 = vand.u32 2147483647, %v8991_v46 }
 0x6bf   : > { %5601 = vrcp.f32 %v9001_v26  ;;  %vm3743_vm2 = vweird.f32 %v8985_v45  ;;  %v3764_v12 = vand.u32 2147483648, %v8991_v46  ;;  %v3750_v62 = vor.u32 1.1754944e-38, %v3749_v18 }
 0x6c0   : > { %5603 = vtanh.f32 %v9004_v60  ;;  %vm3758_vm8 = vweird.f32 %v8991_v46  ;;  %vm3773_vm1 = vweird.f32 %v8999_v19  ;;  %v3779_v63 = vand.u32 2147483648, %v8999_v19 }
 0x6c1   : > { %5605 = vtanh.f32 %v9007_v5  ;;  %vm9031_vm9 = vcmp.eq.f32.partialorder %v3747_v24, 8.507059e+37  ;;  %vm9035_vm4 = vcmp.eq.f32.partialorder %v3762_v39, 8.507059e+37  ;;  %v3765_v9 = vor.u32 1.1754944e-38, %v3764_v12 }
 0x6c2   : > { %v5596_v52 = vpop.eup %5595  ;;  %5607 = vtanh.f32 %v9010_v36  ;;  %v3777_v28 = vand.u32 2147483647, %v8999_v19  ;;  %v3794_v2 = vand.u32 2147483648, %v9001_v26  ;;  %v3792_v44 = vand.u32 2147483647, %v9001_v26 }
 0x6c3   : > { %v5598_v0 = vpop.eup %5597  ;;  %v3739_v23 = vmul.f32 %v5596_v52, %v8985_v45  ;;  %5609 = vtanh.f32 %v9013_v54  ;;  %vm3744_vm13 = vweird.f32 %v5596_v52  ;;  %v3780_v51 = vor.u32 1.1754944e-38, %v3779_v63 }
 0x6c4   : > { %v5600_v47 = vpop.eup %5599  ;;  %v3754_v34 = vmul.f32 %v5598_v0, %v8991_v46  ;;  %vm3759_vm12 = vweird.f32 %v5598_v0  ;;  %vm3745_vm7 = vmor %vm3743_vm2, %vm3744_vm13  ;;  %vm3788_vm6 = vweird.f32 %v9001_v26  ;;  %vm3778_vm3 = vcmp.eq.f32.partialorder %v3777_v28, 8.507059e+37 }
 0x6c5   : > { %v5602_v43 = vpop.eup %5601  ;;  %v3740_v49 = vsub.f32 1.0, %v3739_v23  ;;  %v3769_v38 = vmul.f32 %v5600_v47, %v8999_v19  ;;  %vm3774_vm5 = vweird.f32 %v5600_v47  ;;  %vm3760_vm14 = vmor %vm3758_vm8, %vm3759_vm12  ;;  %v3795_v10 = vor.u32 1.1754944e-38, %v3794_v2 }
 0x6c6   : > { %v3755_v40 = vsub.f32 1.0, %v3754_v34  ;;  %v3784_v32 = vmul.f32 %v5602_v43, %v9001_v26  ;;  %v5604_v29 = vpop.eup %5603  ;;  %vm3789_vm11 = vweird.f32 %v5602_v43  ;;  %vm3775_vm15 = vmor %vm3773_vm1, %vm3774_vm5  ;;  %vm3793_vm2 = vcmp.eq.f32.partialorder %v3792_v44, 8.507059e+37 }
 0x6c7   : > { %v3741_v59 = vmul.f32 %v5596_v52, %v3740_v49  ;;  %v3770_v15 = vsub.f32 1.0, %v3769_v38  ;;  %v5606_v30 = vpop.eup %5605  ;;  %vm3790_vm10 = vmor %vm3788_vm6, %vm3789_vm11  ;;  %vm10119_vm8 = vcmask 1042434   ;;  %vm10120_vm1 = vcmask 1043459  }
 0x6c8   : > { %v3756_v37 = vmul.f32 %v5598_v0, %v3755_v40  ;;  %v3785_v57 = vsub.f32 1.0, %v3784_v32  ;;  %v5608_v6 = vpop.eup %5607 }
 0x6c9   : > { %v3771_v41 = vmul.f32 %v5600_v47, %v3770_v15  ;;  %v3742_v16 = vadd.f32 %v5596_v52, %v3741_v59  ;;  %v5610_v50 = vpop.eup %5609 }
 0x6ca   : > { %v3757_v53 = vadd.f32 %v5598_v0, %v3756_v37  ;;  %v3786_v61 = vmul.f32 %v5602_v43, %v3785_v57 }
 0x6cb   : > { %v3746_v22 = vsel %vm3745_vm7, %v5596_v52, %v3742_v16  ;;  %v3772_v14 = vadd.f32 %v5600_v47, %v3771_v41 }
 0x6cc   : > { %v3751_v25 = vsel %vm9031_vm9, %v3750_v62, %v3746_v22  ;;  %v3761_v7 = vsel %vm3760_vm14, %v5598_v0, %v3757_v53  ;;  %v3787_v45 = vadd.f32 %v5602_v43, %v3786_v61 }
 0x6cd   : > { %v3766_v55 = vsel %vm9035_vm4, %v3765_v9, %v3761_v7  ;;  %v3776_v46 = vsel %vm3775_vm15, %v5600_v47, %v3772_v14  ;;  %v3826_v58 = vmul.f32 %v5604_v29, %v3751_v25 }
 0x6ce   : > { %v3781_v17 = vsel %vm3778_vm3, %v3780_v51, %v3776_v46  ;;  %v3791_v31 = vsel %vm3790_vm10, %v5602_v43, %v3787_v45  ;;  %v3827_v56 = vmul.f32 %v5606_v30, %v3766_v55 }
 0x6cf   : > { %v3796_v26 = vsel %vm3793_vm2, %v3795_v10, %v3791_v31  ;;  %v3828_v18 = vmul.f32 %v5608_v6, %v3781_v17  ;;  %3830 = vst [vmem:[#allocation2 + $0x10] sm:$0x40] %v3826_v58  ;;  %v3834_v52 = vpack.c.bf16 %v3826_v58, %v3826_v58 }
 0x6d0   : > { %v3829_v24 = vmul.f32 %v5610_v50, %v3796_v26  ;;  %3831 = vst [vmem:[#allocation2] sm:$0x40] %v3827_v56  ;;  %v3835_v19 = vpack.c.bf16 %v3827_v56, %v3827_v56  ;;  %v4195_v26 = vrot.slane %v9004_v60, 7 }
 0x6d1   : > { %3832 = vst [vmem:[#allocation2 + $0x18] sm:$0x40] %v3828_v18  ;;  %v3836_v39 = vpack.c.bf16 %v3828_v18, %v3828_v18  ;;  %v3842_v0 = vunpack.c.l.b16 %v3834_v52  ;;  %v4196_v18 = vrot.slane %v9007_v5, 7 }
 0x6d2   : > { %3833 = vst [vmem:[#allocation2 + $0x8] sm:$0x40] %v3829_v24  ;;  %v3837_v23 = vpack.c.bf16 %v3829_v24, %v3829_v24  ;;  %v3843_v12 = vunpack.c.l.b16 %v3835_v19 }
 0x6d3   : > { %v3844_v47 = vunpack.c.l.b16 %v3836_v39  ;;  %v3846_v62 = vrot.slane %v3842_v0, 6 }
 0x6d4   : > { %v3845_v34 = vunpack.c.l.b16 %v3837_v23  ;;  %v3847_v49 = vrot.slane %v3843_v12, 5 }
 0x6d5   : > { %v3849_v43 = vrot.slane %v3844_v47, 4 }
 0x6d6   : > { %v3848_v38 = vsel %vm842_vm0, %v3847_v49, %v3846_v62  ;;  %v3851_v63 = vrot.slane %v3845_v34, 3 }
 0x6d7   : > { %v3850_v40 = vsel %vm10119_vm8, %v3849_v43, %v3848_v38 }
 0x6d8   : > { %v3852_v32 = vsel %vm10120_vm1, %v3851_v63, %v3850_v40 }
 0x6d9   : > { %v3853_v1 = vpack.c.b16 %v3852_v32, %v3852_v32 }
 0x6db   : > { %3863 = vmatmul.bf16.vlgmr.msra.gmra.mxu0 %v3853_v1  ;;  %3876 = vmatmul.bf16.vlgmr.msra.gmra.mxu1 %v3853_v1 }
 0x6dc   : > { %3889 = vmatmul.bf16.vlgmr.msra.gmra.mxu2 %v3853_v1  ;;  %3902 = vmatmul.bf16.vlgmr.msra.gmra.mxu3 %v3853_v1 }
 0x758   : > { %v3864_v42 = vpop.f32.mrf.mxu0  ;;  %v3877_v29 = vpop.f32.mrf.mxu1 }
 0x759   : > { %v3911_v59 = vrot.slane %v3864_v42, 1  ;;  %v3915_v9 = vrot.slane %v3864_v42, 2  ;;  %v3919_v15 = vrot.slane %v3864_v42, 3  ;;  %v3923_v30 = vrot.slane %v3864_v42, 4 }
 0x75a   : > { %v3912_v37 = vrot.slane %v3877_v29, 1  ;;  %v3916_v57 = vrot.slane %v3877_v29, 2  ;;  %v3920_v28 = vrot.slane %v3877_v29, 3  ;;  %v3924_v6 = vrot.slane %v3877_v29, 4 }
 0x75b   : > { %v3943_v41 = vadd.f32 %v3911_v59, %v10038_v20  ;;  %v3947_v16 = vadd.f32 %v3915_v9, %v10039_v35  ;;  %v3951_v2 = vadd.f32 %v3919_v15, %v10040_v27  ;;  %v3955_v50 = vadd.f32 %v3923_v30, %v10041_v33 }
 0x75c   : > { %v3944_v53 = vadd.f32 %v3912_v37, %v10042_v3  ;;  %v3948_v61 = vadd.f32 %v3916_v57, %v10043_v48  ;;  %v3952_v51 = vadd.f32 %v3920_v28, %v10044_v8  ;;  %v3956_v7 = vadd.f32 %v3924_v6, %v10045_v13 }
 0x75d   : > { %v4924_v44 = vmul.f32 -1.442695, %v3943_v41  ;;  %v4925_v22 = vmul.f32 -1.442695, %v3947_v16  ;;  %v4926_v14 = vmul.f32 -1.442695, %v3951_v2 }
 0x75e   : > { %v4927_v25 = vmul.f32 -1.442695, %v3955_v50  ;;  %v4928_v20 = vmul.f32 -1.442695, %v3944_v53  ;;  %v4929_v27 = vmul.f32 -1.442695, %v3948_v61 }
 0x75f   : > { %5611 = vpow2.f32 %v4924_v44  ;;  %v9065_v45 = vpop.f32.mrf.mxu2  ;;  %v3903_v35 = vpop.f32.mrf.mxu3  ;;  %v4930_v3 = vmul.f32 -1.442695, %v3952_v51  ;;  %v4931_v48 = vmul.f32 -1.442695, %v3956_v7  ;;  %v4197_v15 = vrot.slane %v9010_v36, 7  ;;  %v10123_v50 = vld [vmem:[#allocation19_spill] sm:$0xff] }
 0x760   : > { %5613 = vpow2.f32 %v4925_v22  ;;  %v3866_v33 = vpop.f32.mrf.mxu0  ;;  %v3879_v55 = vpop.f32.mrf.mxu1  ;;  %v3914_v39 = vrot.slane %v3903_v35, 1  ;;  %v3918_v0 = vrot.slane %v3903_v35, 2  ;;  %v3913_v47 = vrot.slane %v9065_v45, 1  ;;  %v10125_v44 = vld [vmem:[#allocation35_spill] sm:$0xff] }
 0x761   : > { %5615 = vpow2.f32 %v4926_v14  ;;  %v3917_v62 = vrot.slane %v9065_v45, 2  ;;  %v3922_v43 = vrot.slane %v3903_v35, 3  ;;  %v3926_v38 = vrot.slane %v3903_v35, 4  ;;  %v5080_v36 = vld [vmem:[%s9603_s6 + $0x34] sm:$0xf] }
 0x762   : > { %5617 = vpow2.f32 %v4927_v25  ;;  %v3921_v32 = vrot.slane %v9065_v45, 3  ;;  %v3925_v1 = vrot.slane %v9065_v45, 4  ;;  %v3946_v29 = vadd.f32 %v3914_v39, %v10047_v11  ;;  %v10121_v11 = vld [vmem:[#allocation26_spill] sm:$0xff] }
 0x763   : > { %5619 = vpow2.f32 %v4928_v20  ;;  %v3950_v59 = vadd.f32 %v3918_v0, %v10048_v21  ;;  %v4198_v30 = vrot.slane %v9013_v54, 7  ;;  %v3945_v37 = vadd.f32 %v3913_v47, %v10046_v4  ;;  %v10122_v21 = vld [vmem:[#allocation37_spill] sm:$0xff] }
 0x764   : > { %5621 = vpow2.f32 %v4929_v27  ;;  %v3954_v6 = vadd.f32 %v3922_v43, %v10121_v11  ;;  %v3958_v41 = vadd.f32 %v3926_v38, %v10122_v21  ;;  %v9115_v53 = vadd.f32 %v3917_v62, %v10123_v50  ;;  %v10124_v4 = vld [vmem:[#allocation25_spill] sm:$0xff]  ;;  %v5087_v50 = vld [vmem:[%s9603_s6 + $0x64] sm:$0xf0] }
 0x765   : > { %v5612_v46 = vpop.eup %5611  ;;  %5623 = vpow2.f32 %v4930_v3  ;;  %v9118_v61 = vadd.f32 %v3921_v32, %v10124_v4  ;;  %v9121_v22 = vadd.f32 %v3925_v1, %v10125_v44  ;;  %v9126_v7 = vmul.f32 -1.442695, %v3946_v29  ;;  %v4954_v54 = vld [vmem:[%s9603_s6 + $0x20] sm:$0xf] }
 0x766   : > { %v5614_v8 = vpop.eup %5613  ;;  %v9067_v10 = vadd.f32 1.0, %v5612_v46  ;;  %5625 = vpow2.f32 %v4931_v48  ;;  %v9128_v20 = vmul.f32 -1.442695, %v3950_v59  ;;  %v9140_v46 = vmul.f32 -1.442695, %v3954_v6 }
 0x767   : > { %v5616_v13 = vpop.eup %5615  ;;  %v9069_v58 = vadd.f32 1.0, %v5614_v8  ;;  %v3892_v17 = vpop.f32.mrf.mxu2  ;;  %v9142_v8 = vmul.f32 -1.442695, %v3958_v41 }
 0x768   : > { %v3905_v31 = vpop.f32.mrf.mxu3  ;;  %v5618_v56 = vpop.eup %5617  ;;  %v9073_v52 = vadd.f32 1.0, %v5616_v13  ;;  %5627 = vrcp.f32 %v9067_v10  ;;  %v3986_v25 = vand.u32 2147483648, %v9067_v10  ;;  %v3984_v33 = vand.u32 2147483647, %v9067_v10 }
 0x769   : > { %v5620_v24 = vpop.eup %5619  ;;  %v9076_v19 = vadd.f32 1.0, %v5618_v56  ;;  %5629 = vrcp.f32 %v9069_v58  ;;  %vm3980_vm0 = vweird.f32 %v9067_v10  ;;  %vm3995_vm9 = vweird.f32 %v9069_v58 }
 0x76a   : > { %v5622_v23 = vpop.eup %5621  ;;  %5631 = vrcp.f32 %v9073_v52  ;;  %v9080_v12 = vadd.f32 1.0, %v5620_v24  ;;  %v3999_v31 = vand.u32 2147483647, %v9069_v58  ;;  %v3987_v0 = vor.u32 1.1754944e-38, %v3986_v25 }
 0x76b   : > { %v5624_v34 = vpop.eup %5623  ;;  %5633 = vrcp.f32 %v9076_v19  ;;  %v9085_v49 = vadd.f32 1.0, %v5622_v23  ;;  %vm9157_vm4 = vcmp.eq.f32.partialorder %v3984_v33, 8.507059e+37  ;;  %v4001_v38 = vand.u32 2147483648, %v9069_v58 }
 0x76c   : > { %v5626_v63 = vpop.eup %5625  ;;  %v9087_v40 = vadd.f32 1.0, %v5624_v34  ;;  %5635 = vrcp.f32 %v9080_v12  ;;  %v4062_v48 = vand.u32 2147483648, %v9080_v12  ;;  %vm4056_vm13 = vweird.f32 %v9080_v12 }
 0x76d   : > { %v9092_v42 = vadd.f32 1.0, %v5626_v63  ;;  %5637 = vrcp.f32 %v9085_v49  ;;  %v4077_v62 = vand.u32 2147483648, %v9085_v49  ;;  %vm9183_vm7 = vcmp.eq.f32.partialorder %v3999_v31, 8.507059e+37 }
 0x76e   : > { %v9097_v9 = vpop.eup %5627  ;;  %5639 = vrcp.f32 %v9087_v40  ;;  %v4092_v34 = vand.u32 2147483648, %v9087_v40  ;;  %v9165_v32 = vor.u32 1.1754944e-38, %v4062_v48  ;;  %vm4071_vm14 = vweird.f32 %v9085_v49  ;;  %v9465_v48 = vld [vmem:[%s9603_s6 + $0x4] sm:$0xf] }
 0x76f   : > { %v9103_v57 = vpop.eup %5629  ;;  %v3976_v28 = vmul.f32 %v9097_v9, %v9067_v10  ;;  %5641 = vrcp.f32 %v9092_v42  ;;  %v4107_v1 = vand.u32 2147483648, %v9092_v42  ;;  %vm3981_vm12 = vweird.f32 %v9097_v9 }
 0x770   : > { %v9110_v16 = vpop.eup %5631  ;;  %v3991_v2 = vmul.f32 %v9103_v57, %v9069_v58  ;;  %5643 = vtanh.f32 %v3945_v37  ;;  %vm3996_vm5 = vweird.f32 %v9103_v57  ;;  %v9179_v41 = vor.u32 1.1754944e-38, %v4077_v62  ;;  %vm9194_vm6 = vmor %vm3980_vm0, %vm3981_vm12 }
 0x771   : > { %v9123_v14 = vpop.eup %5633  ;;  %v3977_v51 = vsub.f32 1.0, %v3976_v28  ;;  %v4006_v27 = vmul.f32 %v9110_v16, %v9073_v52  ;;  %vm9206_vm3 = vmor %vm3995_vm9, %vm3996_vm5  ;;  %vm4086_vm10 = vweird.f32 %v9087_v40  ;;  %vm4101_vm8 = vweird.f32 %v9092_v42 }
 0x772   : > { %v9130_v45 = vpop.eup %5635  ;;  %v3992_v35 = vsub.f32 1.0, %v3991_v2  ;;  %v4021_v63 = vmul.f32 %v9123_v14, %v9076_v19  ;;  %v9181_v2 = vor.u32 1.1754944e-38, %v4092_v34  ;;  %vm4011_vm1 = vweird.f32 %v9110_v16 }
 0x773   : > { %v9135_v55 = vpop.eup %5637  ;;  %v4052_v3 = vmul.f32 %v9130_v45, %v9080_v12  ;;  %v3978_v17 = vmul.f32 %v9097_v9, %v3977_v51  ;;  %v4007_v47 = vsub.f32 1.0, %v4006_v27  ;;  %vm4057_vm11 = vweird.f32 %v9130_v45 }
 0x774   : > { %v9144_v13 = vpop.eup %5639  ;;  %v4067_v39 = vmul.f32 %v9135_v55, %v9085_v49  ;;  %v3993_v23 = vmul.f32 %v9103_v57, %v3992_v35  ;;  %v4022_v44 = vsub.f32 1.0, %v4021_v63  ;;  %v9190_v51 = vor.u32 1.1754944e-38, %v4107_v1  ;;  %vm9233_vm9 = vmor %vm4056_vm13, %vm4057_vm11  ;;  %v5088_v1 = vld [vmem:[%s9603_s6 + $0x74] sm:$0xf] }
 0x775   : > { %v9150_v56 = vpop.eup %5641  ;;  %v4053_v24 = vsub.f32 1.0, %v4052_v3  ;;  %v4082_v59 = vmul.f32 %v9144_v13, %v9087_v40  ;;  %v3979_v28 = vadd.f32 %v9097_v9, %v3978_v17  ;;  %v4008_v4 = vmul.f32 %v9110_v16, %v4007_v47  ;;  %v4970_v47 = vld [vmem:[%s9603_s6 + $0x40] sm:$0xf] }
 0x776   : > { %v9168_v29 = vpop.eup %5643  ;;  %v4097_v37 = vmul.f32 %v9150_v56, %v9092_v42  ;;  %v4068_v6 = vsub.f32 1.0, %v4067_v39  ;;  %v3994_v21 = vadd.f32 %v9103_v57, %v3993_v23  ;;  %v4002_v35 = vor.u32 1.1754944e-38, %v4001_v38 }
 0x777   : > { %v4054_v11 = vmul.f32 %v9130_v45, %v4053_v24  ;;  %vm4072_vm15 = vweird.f32 %v9135_v55  ;;  %v4083_v27 = vsub.f32 1.0, %v4082_v59  ;;  %v3983_v3 = vsel %vm9194_vm6, %v9097_v9, %v3979_v28 }
 0x778   : > { %v4098_v33 = vsub.f32 1.0, %v4097_v37  ;;  %v4069_v10 = vmul.f32 %v9135_v55, %v4068_v6  ;;  %vm4087_vm2 = vweird.f32 %v9144_v13  ;;  %v3998_v17 = vsel %vm9206_vm3, %v9103_v57, %v3994_v21  ;;  %vm9288_vm6 = vmor %vm4071_vm14, %vm4072_vm15 }
 0x779   : > { %v4055_v9 = vadd.f32 %v9130_v45, %v4054_v11  ;;  %v9219_v58 = vadd.f32 %v9110_v16, %v4008_v4  ;;  %v4014_v31 = vand.u32 2147483647, %v9073_v52  ;;  %v4016_v24 = vand.u32 2147483648, %v9073_v52  ;;  %v4996_v11 = vld [vmem:[%s9603_s6 + $0x78] sm:$0xf0]  ;;  %vm9311_vm14 = vmor %vm4086_vm10, %vm4087_vm2 }
 0x77a   : > { %vm4102_vm0 = vweird.f32 %v9150_v56  ;;  %v3988_v39 = vsel %vm9157_vm4, %v3987_v0, %v3983_v3  ;;  %v4023_v57 = vmul.f32 %v9123_v14, %v4022_v44  ;;  %v4060_v23 = vand.u32 2147483647, %v9080_v12  ;;  %v4994_v0 = vld [vmem:[%s9603_s6 + $0x70] sm:$0xf]  ;;  %v5086_v3 = vld [vmem:[%s9603_s6 + $0x64] sm:$0xf] }
 0x77b   : > { %v4084_v62 = vmul.f32 %v9144_v13, %v4083_v27  ;;  %v4099_v34 = vmul.f32 %v9150_v56, %v4098_v33  ;;  %v9241_v43 = vsel %vm9183_vm7, %v4002_v35, %v3998_v17  ;;  %vm4010_vm4 = vweird.f32 %v9073_v52  ;;  %v5089_v52 = vld [vmem:[%s9603_s6 + $0x74] sm:$0xf0]  ;;  %vm9321_vm15 = vmor %vm4101_vm8, %vm4102_vm0  ;;  %v4978_v17 = vld [vmem:[%s9603_s6 + $0x50] sm:$0xf] }
 0x77c   : > { %vm9247_vm12 = vmor %vm4010_vm4, %vm4011_vm1  ;;  %vm4025_vm13 = vweird.f32 %v9076_v19  ;;  %vm4026_vm5 = vweird.f32 %v9123_v14  ;;  %v4059_v38 = vsel %vm9233_vm9, %v9130_v45, %v4055_v9  ;;  %v4070_v63 = vadd.f32 %v9135_v55, %v4069_v10  ;;  %v5085_v9 = vld [vmem:[%s9603_s6 + $0x54] sm:$0xf0] }
 0x77d   : > { %v4013_v59 = vsel %vm9247_vm12, %v9110_v16, %v9219_v58  ;;  %vm9267_vm7 = vcmp.eq.f32.partialorder %v4014_v31, 8.507059e+37  ;;  %v4017_v45 = vor.u32 1.1754944e-38, %v4016_v24  ;;  %v4029_v28 = vand.u32 2147483647, %v9076_v19  ;;  %v4986_v16 = vld [vmem:[%s9603_s6 + $0x60] sm:$0xf]  ;;  %vm9340_vm3 = vmor %vm4025_vm13, %vm4026_vm5 }
 0x77e   : > { %v4024_v6 = vadd.f32 %v9123_v14, %v4023_v57  ;;  %v4031_v21 = vand.u32 2147483648, %v9076_v19  ;;  %vm4061_vm11 = vcmp.eq.f32.partialorder %v4060_v23, 8.507059e+37  ;;  %5645 = vtanh.f32 %v9115_v53 }
 0x77f   : > { %v4064_v44 = vsel %vm4061_vm11, %v9165_v32, %v4059_v38  ;;  %v4085_v53 = vadd.f32 %v9144_v13, %v4084_v62  ;;  %5647 = vtanh.f32 %v9118_v61  ;;  %v4995_v25 = vor.u32 %v5089_v52, %v4994_v0  ;;  %v4988_v32 = vld [vmem:[%s9603_s6 + $0x68] sm:$0xf0]  ;;  %v9449_v61 = vld [vmem:[%s9603_s6 + $0x18] sm:$0xf0] }
 0x780   : > { %v4074_v35 = vsel %vm9288_vm6, %v9135_v55, %v4070_v63  ;;  %v4075_v27 = vand.u32 2147483647, %v9085_v49  ;;  %v4100_v33 = vadd.f32 %v9150_v56, %v4099_v34  ;;  %5649 = vpow2.f32 %v9126_v7 }
 0x781   : > { %v4090_v49 = vand.u32 2147483647, %v9087_v40  ;;  %5651 = vpow2.f32 %v9128_v20  ;;  %4335 = vmatpush.bf16.msrb.mxu0 %v4995_v25  ;;  %v4999_v7 = vor.u32 %v5088_v1, %v4996_v11  ;;  %v4987_v55 = vor.u32 %v5087_v50, %v4986_v16  ;;  %v9428_v25 = vld [vmem:[%s9603_s6 + $0x28] sm:$0xf0] }
 0x782   : > { %v4105_v10 = vand.u32 2147483647, %v9092_v42  ;;  %5653 = vtanh.f32 %v9121_v22  ;;  %v4203_v40 = vmul.f32 %v4195_v26, %v4064_v44  ;;  %v4207_v20 = vmul.f32 %v9168_v29, %v3988_v39  ;;  %v9422_v44 = vld [vmem:[%s9603_s6 + $0x24] sm:$0xf] }
 0x783   : > { %vm9344_vm10 = vcmp.eq.f32.partialorder %v4029_v28, 8.507059e+37  ;;  %v4089_v26 = vsel %vm9311_vm14, %v9144_v13, %v4085_v53  ;;  %5655 = vpow2.f32 %v9140_v46  ;;  %4354 = vmatpush.bf16.msrb.mxu1 %v4999_v7  ;;  %v4991_v22 = vor.u32 %v5086_v3, %v4988_v32  ;;  %v5084_v13 = vld [vmem:[%s9603_s6 + $0x54] sm:$0xf]  ;;  %v4980_v46 = vld [vmem:[%s9603_s6 + $0x58] sm:$0xf0] }
 0x784   : > { %v5646_v29 = vpop.eup %5645  ;;  %v4028_v19 = vsel %vm9340_vm3, %v9123_v14, %v4024_v6  ;;  %vm4076_vm2 = vcmp.eq.f32.partialorder %v4075_v27, 8.507059e+37  ;;  %v4104_v58 = vsel %vm9321_vm15, %v9150_v56, %v4100_v33  ;;  %5657 = vpow2.f32 %v9142_v8  ;;  %v9438_v27 = vld [vmem:[%s9603_s6 + $0x14] sm:$0xf0]  ;;  %v9444_v32 = vld [vmem:[%s9603_s6 + $0x14] sm:$0xf] }
 0x785   : > { %v5648_v31 = vpop.eup %5647  ;;  %v4032_v24 = vor.u32 1.1754944e-38, %v4031_v21  ;;  %v4079_v39 = vsel %vm4076_vm2, %v9179_v41, %v4074_v35  ;;  %vm4091_vm8 = vcmp.eq.f32.partialorder %v4090_v49, 8.507059e+37  ;;  %4336 = vmatpush.bf16.msrb.mxu0 %v4987_v55  ;;  %v4979_v14 = vor.u32 %v5085_v9, %v4978_v17  ;;  %v5083_v41 = vld [vmem:[%s9603_s6 + $0x44] sm:$0xf0]  ;;  %v9433_v35 = vld [vmem:[%s9603_s6 + $0x10] sm:$0xf] }
 0x786   : > { %v5650_v57 = vpop.eup %5649  ;;  %v4018_v56 = vsel %vm9267_vm7, %v4017_v45, %v4013_v59  ;;  %v4094_v8 = vsel %vm4091_vm8, %v9181_v2, %v4089_v26  ;;  %vm4106_vm1 = vcmp.eq.f32.partialorder %v4105_v10, 8.507059e+37  ;;  %v4211_v23 = vadd.f32 %v4207_v20, %v4203_v40  ;;  %v5082_v59 = vld [vmem:[%s9603_s6 + $0x44] sm:$0xf]  ;;  %v9454_v49 = vld [vmem:[%s9603_s6] sm:$0xf]  ;;  %v4373_v10 = vld [vmem:[%s9469_s23] sm:$0xff] }
 0x787   : > { %v5652_v62 = vpop.eup %5651  ;;  %v4033_v34 = vsel %vm9344_vm10, %v4032_v24, %v4028_v19  ;;  %v4109_v0 = vsel %vm4106_vm1, %v9190_v51, %v4104_v58  ;;  %v9378_v12 = vadd.f32 1.0, %v5650_v57  ;;  %4355 = vmatpush.bf16.msrb.mxu1 %v4991_v22  ;;  %v4983_v2 = vor.u32 %v5084_v13, %v4980_v46  ;;  %v4972_v51 = vld [vmem:[%s9603_s6 + $0x48] sm:$0xf0]  ;;  %v9460_v55 = vld [vmem:[%s9603_s6 + $0x4] sm:$0xf0] }
 0x788   : > { %v5654_v38 = vpop.eup %5653  ;;  %v4204_v63 = vmul.f32 %v4196_v18, %v4079_v39  ;;  %v4208_v52 = vmul.f32 %v5646_v29, %v9241_v43  ;;  %v9383_v1 = vadd.f32 1.0, %v5652_v62  ;;  %v4205_v45 = vmul.f32 %v4197_v15, %v4094_v8  ;;  %v4962_v18 = vld [vmem:[%s9603_s6 + $0x30] sm:$0xf]  ;;  %v5081_v43 = vld [vmem:[%s9603_s6 + $0x34] sm:$0xf0] }
 0x789   : > { %v5656_v37 = vpop.eup %5655  ;;  %v4209_v28 = vmul.f32 %v5648_v31, %v4018_v56  ;;  %4337 = vmatpush.bf16.msrb.mxu0 %v4979_v14  ;;  %v4971_v5 = vor.u32 %v5083_v41, %v4970_v47  ;;  %v4206_v6 = vmul.f32 %v4198_v30, %v4109_v0  ;;  %v4210_v21 = vmul.f32 %v5654_v38, %v4033_v34  ;;  %v4964_v15 = vld [vmem:[%s9603_s6 + $0x38] sm:$0xf0]  ;;  %v5079_v30 = vld [vmem:[%s9603_s6 + $0x24] sm:$0xf0]  ;;  %v9477_v9 = vld [vmem:[%s9603_s6 + $0x8] sm:$0xf0] }
 0x78a   : > { %v5658_v11 = vpop.eup %5657  ;;  %5659 = vtanh.f32 %v4211_v23  ;;  %v9402_v16 = vadd.f32 1.0, %v5656_v37  ;;  %v4975_v4 = vor.u32 %v5082_v59, %v4972_v51  ;;  %v4212_v53 = vadd.f32 %v4208_v52, %v4204_v63 }
 0x78b   : > { %v9410_v50 = vadd.f32 1.0, %v5658_v11  ;;  %5661 = vrcp.f32 %v9378_v12  ;;  %4356 = vmatpush.bf16.msrb.mxu1 %v4983_v2  ;;  %v4213_v33 = vadd.f32 %v4209_v28, %v4205_v45  ;;  %v4963_v3 = vor.u32 %v5081_v43, %v4962_v18 }
 0x78c   : > { %5663 = vrcp.f32 %v9383_v1  ;;  %v4214_v7 = vadd.f32 %v4210_v21, %v4206_v6  ;;  %v4140_v40 = vand.u32 2147483647, %v9378_v12  ;;  %v4142_v20 = vand.u32 2147483648, %v9378_v12 }
 0x78d   : > { %5665 = vrcp.f32 %v9402_v16  ;;  %4338 = vmatpush.bf16.msrb.mxu0 %v4971_v5  ;;  %v4967_v17 = vor.u32 %v5080_v36, %v4964_v15  ;;  %v4155_v60 = vand.u32 2147483647, %v9383_v1  ;;  %v4955_v26 = vor.u32 %v5079_v30, %v4954_v54  ;;  %v4374_v54 = vld [vmem:[%s9469_s23 + $0x8] sm:$0xff] }
 0x78e   : > { %5667 = vrcp.f32 %v9410_v50  ;;  %v4959_v22 = vor.u32 %v9422_v44, %v9428_v25  ;;  %v5711_v29 = vmov 0   ;;  %v4947_v58 = vor.u32 %v9438_v27, %v9433_v35 }
 0x78f   : > { %4357 = vmatpush.bf16.msrb.mxu1 %v4975_v4  ;;  %5669 = vtanh.f32 %v4212_v53  ;;  %5145 = vset.pattern.permute.xlu0 %v5711_v29  ;;  %v4951_v13 = vor.u32 %v9444_v32, %v9449_v61  ;;  %v4939_v46 = vor.u32 %v9460_v55, %v9454_v49  ;;  %vm4136_vm0 = vweird.f32 %v9378_v12  ;;  %v4375_v4 = vld [vmem:[%s9469_s23 + $0x10] sm:$0xff] }
 0x790   : > { %v9479_v42 = vpop.eup %5659  ;;  %5146 = vset.pattern.permute.xlu1 %v5711_v29  ;;  %5671 = vtanh.f32 %v4213_v33  ;;  %4379 = vperm.xlu0 %5145, %v4373_v10   ;;  %v4943_v39 = vor.u32 %v9465_v48, %v9477_v9  ;;  %vm9494_vm9 = vcmp.eq.f32.partialorder %v4140_v40, 8.507059e+37  ;;  %v4143_v56 = vor.u32 1.1754944e-38, %v4142_v20  ;;  %v4249_v48 = vld [vmem:[%s9604_s7] sm:$0x3] }
 0x791   : > { %v5662_v19 = vpop.eup %5661  ;;  %4339 = vmatpush.bf16.msrb.mxu0 %v4963_v3  ;;  %5673 = vtanh.f32 %v4214_v7  ;;  %vm4151_vm4 = vweird.f32 %v9383_v1  ;;  %vm9500_vm12 = vcmp.eq.f32.partialorder %v4155_v60, 8.507059e+37  ;;  %v4157_v62 = vand.u32 2147483648, %v9383_v1  ;;  %4389 = vperm.xlu1 %5146, %v4375_v4  }
 0x792   : > { %v5664_v31 = vpop.eup %5663  ;;  %v4132_v24 = vmul.f32 %v5662_v19, %v9378_v12  ;;  %vm4166_vm13 = vweird.f32 %v9402_v16  ;;  %v4170_v2 = vand.u32 2147483647, %v9402_v16  ;;  %vm4137_vm5 = vweird.f32 %v5662_v19 }
 0x793   : > { %v5666_v14 = vpop.eup %5665  ;;  %v4147_v8 = vmul.f32 %v5664_v31, %v9383_v1  ;;  %4358 = vmatpush.bf16.msrb.mxu1 %v4967_v17  ;;  %v4172_v51 = vand.u32 2147483648, %v9402_v16  ;;  %vm4152_vm7 = vweird.f32 %v5664_v31  ;;  %vm4181_vm11 = vweird.f32 %v9410_v50  ;;  %vm9514_vm14 = vmor %vm4136_vm0, %vm4137_vm5 }
 0x794   : > { %v5668_v23 = vpop.eup %5667  ;;  %v4133_v47 = vsub.f32 1.0, %v4132_v24  ;;  %v4162_v34 = vmul.f32 %v5666_v14, %v9402_v16  ;;  %vm4167_vm6 = vweird.f32 %v5666_v14  ;;  %v4187_v11 = vand.u32 2147483648, %v9410_v50  ;;  %vm4153_vm3 = vmor %vm4151_vm4, %vm4152_vm7 }
 0x795   : > { %v4148_v0 = vsub.f32 1.0, %v4147_v8  ;;  %v4177_v38 = vmul.f32 %v5668_v23, %v9410_v50  ;;  %4340 = vmatpush.bf16.msrb.mxu0 %v4955_v26  ;;  %v5670_v63 = vpop.eup %5669  ;;  %vm4182_vm15 = vweird.f32 %v5668_v23  ;;  %v4185_v15 = vand.u32 2147483647, %v9410_v50  ;;  %vm4168_vm2 = vmor %vm4166_vm13, %vm4167_vm6  ;;  %v4376_v50 = vld [vmem:[%s9469_s23 + $0x18] sm:$0xff] }
 0x796   : > { %v4134_v52 = vmul.f32 %v5662_v19, %v4133_v47  ;;  %v4163_v59 = vsub.f32 1.0, %v4162_v34  ;;  %v5672_v37 = vpop.eup %5671  ;;  %v4158_v12 = vor.u32 1.1754944e-38, %v4157_v62  ;;  %vm4171_vm10 = vcmp.eq.f32.partialorder %v4170_v2, 8.507059e+37  ;;  %vm4183_vm8 = vmor %vm4181_vm11, %vm4182_vm15 }
 0x797   : > { %v4149_v45 = vmul.f32 %v5664_v31, %v4148_v0  ;;  %v4178_v28 = vsub.f32 1.0, %v4177_v38  ;;  %4359 = vmatpush.bf16.msrb.mxu1 %v4959_v22  ;;  %v5674_v5 = vpop.eup %5673  ;;  %v4173_v35 = vor.u32 1.1754944e-38, %v4172_v51  ;;  %v4188_v3 = vor.u32 1.1754944e-38, %v4187_v11 }
 0x798   : > { %v4135_v18 = vadd.f32 %v5662_v19, %v4134_v52  ;;  %v4164_v43 = vmul.f32 %v5666_v14, %v4163_v59  ;;  %4384 = vperm.xlu0 %5145, %v4374_v54   ;;  %vm4186_vm1 = vcmp.eq.f32.partialorder %v4185_v15, 8.507059e+37  ;;  %v4251_v9 = vperm.slane %v4249_v48, 0 }
 0x799   : > { %v4150_v21 = vadd.f32 %v5664_v31, %v4149_v45  ;;  %v4179_v36 = vmul.f32 %v5668_v23, %v4178_v28  ;;  %4341 = vmatpush.bf16.msrb.mxu0 %v4947_v58  ;;  %4394 = vperm.xlu1 %5146, %v4376_v50   ;;  %v4252_v22 = vperm.slane %v4249_v48, 1 }
 0x79a   : > { %v4139_v30 = vsel %vm9514_vm14, %v5662_v19, %v4135_v18  ;;  %v4165_v44 = vadd.f32 %v5666_v14, %v4164_v43 }
 0x79b   : > { %v4144_v53 = vsel %vm9494_vm9, %v4143_v56, %v4139_v30  ;;  %v4154_v25 = vsel %vm4153_vm3, %v5664_v31, %v4150_v21  ;;  %v4180_v27 = vadd.f32 %v5668_v23, %v4179_v36  ;;  %4360 = vmatpush.bf16.msrb.mxu1 %v4951_v13 }
 0x79c   : > { %v4159_v1 = vsel %vm9500_vm12, %v4158_v12, %v4154_v25  ;;  %v4169_v33 = vsel %vm4168_vm2, %v5666_v14, %v4165_v44  ;;  %v4219_v32 = vmul.f32 %v9479_v42, %v4144_v53 }
 0x79d   : > { %v4174_v61 = vsel %vm4171_vm10, %v4173_v35, %v4169_v33  ;;  %v4184_v7 = vsel %vm4183_vm8, %v5668_v23, %v4180_v27  ;;  %v4220_v16 = vmul.f32 %v5670_v63, %v4159_v1  ;;  %4342 = vmatpush.bf16.msrb.mxu0 %v4939_v46 }
 0x79e   : > { %v4189_v10 = vsel %vm4186_vm1, %v4188_v3, %v4184_v7  ;;  %v4221_v40 = vmul.f32 %v5672_v37, %v4174_v61  ;;  %4223 = vst [vmem:[#allocation2 + $0x10] sm:$0x80] %v4219_v32 }
 0x79f   : > { %v4222_v20 = vmul.f32 %v5674_v5, %v4189_v10  ;;  %4224 = vst [vmem:[#allocation2] sm:$0x80] %v4220_v16  ;;  %4361 = vmatpush.bf16.msrb.mxu1 %v4943_v39 }
 0x7a0   : > { %4225 = vst [vmem:[#allocation2 + $0x18] sm:$0x80] %v4221_v40 }
 0x7a1   : > { %4226 = vst [vmem:[#allocation2 + $0x8] sm:$0x80] %v4222_v20 }
 0x7a5   : > { %v4227_v17 = vld [vmem:[#allocation2 + $0x10] sm:$0xff] }
 0x7a6   : > { %v4228_v42 = vld [vmem:[#allocation2] sm:$0xff] }
 0x7a7   : > { %v4231_v60 = vpack.c.bf16 %v4228_v42, %v4227_v17  ;;  %v4229_v49 = vld [vmem:[#allocation2 + $0x18] sm:$0xff] }
 0x7a8   : > { %v4230_v55 = vld [vmem:[#allocation2 + $0x8] sm:$0xff] }
 0x7a9   : > { %4343 = vmatmul.bf16.vlgmr.msrb.gmra.mxu0 %v4231_v60  ;;  %4362 = vmatmul.bf16.vlgmr.msrb.gmra.mxu1 %v4231_v60  ;;  %v4232_v26 = vpack.c.bf16 %v4230_v55, %v4229_v49 }
 0x7b9   : > { %4348 = vmatmul.bf16.gmra.mxu0 %v4232_v26  ;;  %4367 = vmatmul.bf16.gmra.mxu1 %v4232_v26 }
 0x802   : > { %v4380_v29 = vpop.permute.xlu0 %4379 }
 0x803   : > { %v4390_v41 = vpop.permute.xlu1 %4389 }
 0x80a   : > { %v4385_v39 = vpop.permute.xlu0 %4384 }
 0x80b   : > { %v4395_v45 = vpop.permute.xlu1 %4394 }
 0x826   : > { %v4344_v19 = vpop.f32.mrf.mxu0  ;;  %v4363_v58 = vpop.f32.mrf.mxu1 }
 0x827   : > { %v4345_v13 = vadd.f32 %v4344_v19, %v4251_v9  ;;  %v4364_v46 = vadd.f32 %v4363_v58, %v4252_v22 }
 0x829   : > { %v4397_v31 = vmul.f32 %v4380_v29, %v4345_v13  ;;  %v4398_v24 = vmul.f32 %v4380_v29, %v4364_v46 }
 0x82b   : > { %4405 = vst [vmem:[%s9548_s18] sm:$0xff] %v4397_v31 }
 0x82c   : > { %4406 = vst [vmem:[%s9548_s18 + $0x8] sm:$0xff] %v4398_v24 }
 0x82e   : > { %v4346_v14 = vpop.f32.mrf.mxu0  ;;  %v4365_v57 = vpop.f32.mrf.mxu1 }
 0x82f   : > { %v4347_v56 = vadd.f32 %v4346_v14, %v4251_v9  ;;  %v4366_v8 = vadd.f32 %v4365_v57, %v4252_v22 }
 0x831   : > { %v4399_v23 = vmul.f32 %v4385_v39, %v4347_v56  ;;  %v4400_v47 = vmul.f32 %v4385_v39, %v4366_v8 }
 0x833   : > { %4407 = vst [vmem:[%s9548_s18 + $0x10] sm:$0xff] %v4399_v23 }
 0x834   : > { %4408 = vst [vmem:[%s9548_s18 + $0x18] sm:$0xff] %v4400_v47 }
 0x836   : > { %v4349_v62 = vpop.f32.mrf.mxu0  ;;  %v4368_v34 = vpop.f32.mrf.mxu1 }
 0x837   : > { %v4350_v0 = vadd.f32 %v4349_v62, %v4251_v9  ;;  %v4369_v2 = vadd.f32 %v4368_v34, %v4252_v22 }
 0x839   : > { %v4401_v38 = vmul.f32 %v4390_v41, %v4350_v0  ;;  %v4402_v63 = vmul.f32 %v4390_v41, %v4369_v2 }
 0x83b   : > { %4409 = vst [vmem:[%s9548_s18 + $0x20] sm:$0xff] %v4401_v38 }
 0x83c   : > { %4410 = vst [vmem:[%s9548_s18 + $0x28] sm:$0xff] %v4402_v63 }
 0x83e   : > { %v4351_v52 = vpop.f32.mrf.mxu0  ;;  %v4370_v59 = vpop.f32.mrf.mxu1 }
 0x83f   : > { %v4352_v51 = vadd.f32 %v4351_v52, %v4251_v9  ;;  %v4371_v37 = vadd.f32 %v4370_v59, %v4252_v22 }
 0x841   : > { %v4403_v28 = vmul.f32 %v4395_v45, %v4352_v51  ;;  %v4404_v5 = vmul.f32 %v4395_v45, %v4371_v37 }
 0x843   : > { %4411 = vst [vmem:[%s9548_s18 + $0x30] sm:$0xff] %v4403_v28 }
 0x844   : > { %4412 = vst [vmem:[%s9548_s18 + $0x38] sm:$0xff] %v4404_v5 }
 0x845   : > { %s5091_s19 = sshll.u32 %s4556_s9, 5  ;;  %s4437_s12 = sshll.u32 %s9548_s18, 4  ;;  %s4438_s12 = int_to_ptr.vmem [resolvable:$true] %s4437_s12 }
 0x846   : > { %s4426_s23 = scalar_lea.hbm %s9605_s8, %s5091_s19  ;;  %s5712_s24 = smov 512  }
 0x847   : > { %s4439_s25 = sshll.u32 %s4426_s23, 4  ;;  %5092 = sst [smem:[#allocation9]] (%p5806_p6), %s5712_s24  ;;  %s4440_s25 = int_to_ptr.hbm [resolvable:$true] %s4439_s25 }
 0x848   : > { %s5713_s15 = smov 1024   ;;  %s5714_s10 = smov 2  }
 0x849   : > { %5093 = sst [smem:[#allocation9 + $0x1]] (%p5806_p6), %s5713_s15  ;;  %s5715_s9 = smov 256  }
 0x84a   : > { %5094 = sst [smem:[#allocation9 + $0x2]] (%p5806_p6), %s5714_s10  ;;  %s5716_s20 = smov 16  }
 0x84b   : > { %5095 = sst [smem:[#allocation9 + $0x3]] (%p5806_p6), %s5715_s9  ;;  %s5717_s13 = smov [#allocation8]  }
 0x84c   : > { %5096 = sst [smem:[#allocation9 + $0x4]] (%p5806_p6), %s5715_s9  ;;  %s5718_s18 = smov 0  }
 0x84d   : > { %5097 = sst [smem:[#allocation9 + $0x5]] (%p5806_p6), %s5716_s20 }
 0x84e   : > { %5098 = dma.general (%p5806_p6), %s4438_s12, 1024, %s4440_s25, %s4414_s22, %s5717_s13, [#allocation9], %s5718_s18, 0  }
 0x84f PF: > { %s4467_s19 = sand.u32 1, %s5697_s27   ;;  %p5101_p13 = pnand %p4559_p9, %p5810_p8 }
 0x850   : > { %s4468_s21 = scalar_lea.sflag [#allocation7], %s4467_s19 }
 0x851   : > { %p5102_p0 = pneg %p5101_p13 }
 0x853   : > { %5692 = dma.done.wait (%p5102_p0), %s4468_s21, 1024  }
 0x854   : > { %5694 = vsyncadd (%p5102_p0), %s4468_s21, 4294966272  ;;  %p18_p1 = scmp.ge.s32.totalorder %s5787_s11, 4   ;;  %s10156_s27 = smov %s5701_s28 }
 0x855   : > { %s10157_s28 = smov %s5705_s29  ;;  %s10158_s29 = smov %s5800_s14 }
 0x856   : > { %s10159_s30 = smov %s5787_s11  ;;  %20 = sbr.rel (!%p18_p1) target bundleno = 3 (0x3), region = 226 }
 0x85b   :  { %4474 = vsyncpa [#allocation7], 1 }
 0x85c   :  { %4476 = vsyncpa [#allocation7 + $0x1], 1 }

</bundles_post_ra>
